<compile_context>
chip_gen: v7x
topology: tpu7x:2x2x1
jax: 0.10.0
libtpu: 0.0.40
codegen_flags: <defaults>
</compile_context>

<pallas_src>
import functools

import jax
import jax.numpy as jnp
from jax import lax
from jax.experimental import pallas as pl
from jax.experimental.pallas import tpu as pltpu

_LANE = 128
_SUBLANE = 8
_VMEM = pl.BlockSpec(memory_space=pltpu.MemorySpace.VMEM)


def _round_up(n, m):
    return ((n + m - 1) // m) * m


# ----------------------------------------------------------------------------
# Fused Pallas kernel: all LSTM layers (wavefront schedule) + FC head.
# ----------------------------------------------------------------------------
def make_fused_kernel(num_layers, seq_len, bpad, hp):
    """Builds a kernel with signature:
       kernel(x_ref, wih0, whh0, b0, [wcomb_l, b_l]*(L-1), fcw, fcb,
              out_ref, xw_scr)
    Shapes (padded):
       x_ref  : (T*Bp, Din)     time-major rows (row = t*Bp + b), bf16
       wih0   : (Din, 4*Hp)     layer-0 W_ih^T, gate order [i, f, g, o], bf16
       whh0   : (Hp, 4*Hp)      layer-0 W_hh^T, bf16
       b0     : (1, 4*Hp)       layer-0 b_ih + b_hh, f32
       wcomb_l: (2*Hp, 4*Hp)    [W_ih^T ; W_hh^T] stacked, bf16 (layers >= 1)
       b_l    : (1, 4*Hp)       f32
       fcw    : (Hp, Op)        fc weight^T, bf16
       fcb    : (1, Op)         f32
       out    : (Bp, Op)        f32, lane-dense
       xw_scr : (T, Bp, 4*Hp)   hoisted layer-0 input projection, f32
    """
    T, L = seq_len, num_layers

    def kernel(*refs):
        idx = 0
        x_ref = refs[idx]; idx += 1
        wih0_ref = refs[idx]; idx += 1
        whh0_ref = refs[idx]; idx += 1
        b0_ref = refs[idx]; idx += 1
        wcomb_refs, b_refs = [], []
        for _ in range(1, L):
            wcomb_refs.append(refs[idx]); idx += 1
            b_refs.append(refs[idx]); idx += 1
        fcw_ref = refs[idx]; idx += 1
        fcb_ref = refs[idx]; idx += 1
        out_ref = refs[idx]; idx += 1
        xw_scr = refs[idx]; idx += 1

        # ---- Hoisted whole-sequence input projection for layer 0 (off the
        # serial recurrence): one big MXU matmul, bias folded in once. ----
        xw = jnp.dot(x_ref[...], wih0_ref[...],
                     preferred_element_type=jnp.float32)          # (T*Bp, 4Hp)
        xw_scr[...] = (xw + b0_ref[...]).reshape(T, bpad, 4 * hp)

        # Hoist weight loads and bias broadcasts out of the time loop.
        whh0 = whh0_ref[...]
        wcombs = [r[...] for r in wcomb_refs]
        biases = [jnp.broadcast_to(r[...], (bpad, 4 * hp)) for r in b_refs]

        def gate_update(gates, c_prev):
            # Lane-aligned gate slices (hp is a multiple of 128); f32 math.
            i_g = jax.nn.sigmoid(gates[:, 0 * hp:1 * hp])
            f_g = jax.nn.sigmoid(gates[:, 1 * hp:2 * hp])
            g_g = jnp.tanh(gates[:, 2 * hp:3 * hp])
            o_g = jax.nn.sigmoid(gates[:, 3 * hp:4 * hp])
            c_new = f_g * c_prev + i_g * g_g
            h_new = o_g * jnp.tanh(c_new)
            return h_new, c_new

        zeros = jnp.zeros((bpad, hp), jnp.float32)
        h = [zeros] * L
        c = [zeros] * L
        inp = [None] * L       # inp[l]: layer (l-1)'s output awaiting layer l

        # ---- Wavefront schedule: step s runs layer l on timestep t = s - l.
        # All work within a step only depends on the previous step, so the L
        # recurrent matmuls / nonlinearity chains are independent. ----
        for s in range(T + L - 1):
            nh, nc, ninp = list(h), list(c), list(inp)
            for l in range(L):
                t = s - l
                if not (0 <= t < T):
                    continue
                if l == 0:
                    gates = xw_scr[t] + jnp.dot(
                        h[0].astype(jnp.bfloat16), whh0,
                        preferred_element_type=jnp.float32)
                else:
                    # Fold input + recurrent projections: K = 2*Hp matmul.
                    z = jnp.concatenate([inp[l], h[l]], axis=1)
                    gates = jnp.dot(
                        z.astype(jnp.bfloat16), wcombs[l - 1],
                        preferred_element_type=jnp.float32) + biases[l - 1]
                h_new, c_new = gate_update(gates, c[l])
                nh[l], nc[l] = h_new, c_new
                if l + 1 < L:
                    ninp[l + 1] = h_new
            h, c, inp = nh, nc, ninp

        # ---- Fused FC head; (Bp, Op) output is lane-dense. ----
        out_ref[...] = (
            jnp.dot(h[L - 1].astype(jnp.bfloat16), fcw_ref[...],
                    preferred_element_type=jnp.float32) + fcb_ref[...]
        ).astype(out_ref.dtype)

    return kernel


# ----------------------------------------------------------------------------
# One-time weight preparation (outside the jitted forward).
# ----------------------------------------------------------------------------
def prepare_params(params):
    """Transpose, combine biases, zero-pad to 128 lanes, cast weights to bf16."""
    lstm = params["lstm"]
    H = lstm[0][1].shape[1]            # w_hh: (4H, H)
    hp = _round_up(H, _LANE)

    def pad_gates(w, rows, rows_pad):
        # w: (4H, rows) torch layout -> (rows_pad, 4*hp) with gate blocks.
        wt = jnp.transpose(w).reshape(rows, 4, H)
        return (jnp.zeros((rows_pad, 4, hp), jnp.float32)
                .at[:rows, :, :H].set(wt).reshape(rows_pad, 4 * hp))

    def pad_bias(b_ih, b_hh):
        b = (b_ih + b_hh).reshape(4, H)
        return (jnp.zeros((4, hp), jnp.float32)
                .at[:, :H].set(b).reshape(1, 4 * hp))

    w_ih0, w_hh0, b_ih0, b_hh0 = lstm[0]
    din0 = w_ih0.shape[1]
    l0 = (pad_gates(w_ih0, din0, din0).astype(jnp.bfloat16),
          pad_gates(w_hh0, H, hp).astype(jnp.bfloat16),
          pad_bias(b_ih0, b_hh0))

    rest = []
    for (w_ih, w_hh, b_ih, b_hh) in lstm[1:]:
        wcomb = jnp.concatenate(
            [pad_gates(w_ih, H, hp), pad_gates(w_hh, H, hp)], axis=0
        ).astype(jnp.bfloat16)                                   # (2hp, 4hp)
        rest.append((wcomb, pad_bias(b_ih, b_hh)))

    O = params["fc_w"].shape[0]
    op = _round_up(O, _LANE)
    fcw = (jnp.zeros((hp, op), jnp.float32)
           .at[:H, :O].set(jnp.transpose(params["fc_w"]))).astype(jnp.bfloat16)
    fcb = jnp.zeros((1, op), jnp.float32).at[0, :O].set(params["fc_b"])
    return {"l0": l0, "rest": rest, "fc_w": fcw, "fc_b": fcb}


# ----------------------------------------------------------------------------
# Forward wrapper (single fused pallas_call).
# ----------------------------------------------------------------------------
@functools.partial(jax.jit, static_argnames=("out_dim",))
def net_forward(x, prep, *, out_dim):
    """Equivalent of Net.forward: x (B, T, input_dim) -> (B, output_dim)."""
    B, T, din = x.shape
    hp = prep["fc_w"].shape[0]
    op = prep["fc_w"].shape[1]
    num_layers = 1 + len(prep["rest"])
    bp = _round_up(B, _SUBLANE)

    # Time-major; batch padded to a full sublane tile so every per-timestep
    # slab inside the kernel is (8,128)-aligned.  MXU operand in bf16.
    xt = jnp.transpose(x, (1, 0, 2))                       # (T, B, Din)
    xt = jnp.pad(xt, ((0, 0), (0, bp - B), (0, 0)))        # (T, Bp, Din)
    x2d = xt.reshape(T * bp, din).astype(jnp.bfloat16)

    wih0, whh0, b0 = prep["l0"]
    args = [x2d, wih0, whh0, b0]
    for (wc, b) in prep["rest"]:
        args += [wc, b]
    args += [prep["fc_w"], prep["fc_b"]]

    kernel = make_fused_kernel(num_layers, T, bp, hp)
    out_p = pl.pallas_call(
        kernel,
        out_shape=jax.ShapeDtypeStruct((bp, op), jnp.float32),
        in_specs=[_VMEM] * len(args),
        out_specs=_VMEM,
        scratch_shapes=[
            pltpu.VMEM((T, bp, 4 * hp), jnp.float32),   # hoisted l0 projection
        ],
        # Tiny here; set explicitly so production sizes (bigger scratch /
        # weights) don't silently hit the 16 MiB v5e scoped default.
        compiler_params=pltpu.CompilerParams(vmem_limit_bytes=32 * 1024 * 1024),
    )(*args)
    return out_p[:B, :out_dim]


# ----------------------------------------------------------------------------
# Pure-JAX reference (unpadded f32, for correctness check)
# ----------------------------------------------------------------------------
def lstm_layer_ref(x_tmaj, w_ih, w_hh, b_ih, b_hh):
    T, B, _ = x_tmaj.shape
    H = w_hh.shape[1]

    def step(carry, x_t):
        h, c = carry
        gates = x_t @ w_ih.T + h @ w_hh.T + b_ih + b_hh
        i_g = jax.nn.sigmoid(gates[:, 0 * H:1 * H])
        f_g = jax.nn.sigmoid(gates[:, 1 * H:2 * H])
        g_g = jnp.tanh(gates[:, 2 * H:3 * H])
        o_g = jax.nn.sigmoid(gates[:, 3 * H:4 * H])
        c_new = f_g * c + i_g * g_g
        h_new = o_g * jnp.tanh(c_new)
        return (h_new, c_new), h_new

    init = (jnp.zeros((B, H), jnp.float32), jnp.zeros((B, H), jnp.float32))
    _, hs = lax.scan(step, init, x_tmaj)
    return hs


def net_forward_ref(x, params):
    h = jnp.transpose(x, (1, 0, 2))
    for (w_ih, w_hh, b_ih, b_hh) in params["lstm"]:
        h = lstm_layer_ref(h, w_ih, w_hh, b_ih, b_hh)
    return h[-1] @ params["fc_w"].T + params["fc_b"]


# ----------------------------------------------------------------------------
# Deterministic parameter init (shapes follow nn.LSTM / nn.Linear)
# ----------------------------------------------------------------------------
def init_params(key, input_dim, hidden_dim, output_dim, layers):
    scale = 1.0 / jnp.sqrt(jnp.float32(hidden_dim))
    lstm_params = []
    for layer in range(layers):
        d_in = input_dim if layer == 0 else hidden_dim
        key, k1, k2, k3, k4 = jax.random.split(key, 5)
        w_ih = jax.random.uniform(k1, (4 * hidden_dim, d_in), jnp.float32, -scale, scale)
        w_hh = jax.random.uniform(k2, (4 * hidden_dim, hidden_dim), jnp.float32, -scale, scale)
        b_ih = jax.random.uniform(k3, (4 * hidden_dim,), jnp.float32, -scale, scale)
        b_hh = jax.random.uniform(k4, (4 * hidden_dim,), jnp.float32, -scale, scale)
        lstm_params.append((w_ih, w_hh, b_ih, b_hh))
    key, k5, k6 = jax.random.split(key, 3)
    fc_w = jax.random.uniform(k5, (output_dim, hidden_dim), jnp.float32, -scale, scale)
    fc_b = jax.random.uniform(k6, (output_dim,), jnp.float32, -scale, scale)
    return {"lstm": lstm_params, "fc_w": fc_w, "fc_b": fc_b}


# ----------------------------------------------------------------------------
if __name__ == "__main__":
    B, T = 2, 8                 # batch, seq_len
    INPUT_DIM = 4
    HIDDEN_DIM = 32
    OUTPUT_DIM = 1
    LAYERS = 2

    key = jax.random.PRNGKey(0)
    key, kx = jax.random.split(key)
    x = jax.random.normal(kx, (B, T, INPUT_DIM), jnp.float32)

    params = init_params(key, INPUT_DIM, HIDDEN_DIM, OUTPUT_DIM, LAYERS)
    prep = prepare_params(params)   # one-time weight transform, outside jit

    out = net_forward(x, prep, out_dim=OUTPUT_DIM)
    out = jax.block_until_ready(out)

    ref = net_forward_ref(x, params)
    assert out.shape == (B, OUTPUT_DIM), out.shape
    # bf16 MXU operands (f32 accumulation) -> loosened tolerance vs f32 ref.
    assert jnp.allclose(out, ref, rtol=5e-2, atol=5e-2), (out, ref)

    print("KERNEL_OK")
</pallas_src>

<mosaic_0001>
module attributes {stable_mosaic.version = 11 : i64} {
  func.func @kernel(%arg0: memref<64x4xbf16, #tpu.memory_space<vmem>>, %arg1: memref<4x512xbf16, #tpu.memory_space<vmem>>, %arg2: memref<128x512xbf16, #tpu.memory_space<vmem>>, %arg3: memref<1x512xf32, #tpu.memory_space<vmem>>, %arg4: memref<256x512xbf16, #tpu.memory_space<vmem>>, %arg5: memref<1x512xf32, #tpu.memory_space<vmem>>, %arg6: memref<128x128xbf16, #tpu.memory_space<vmem>>, %arg7: memref<1x128xf32, #tpu.memory_space<vmem>>, %arg8: memref<8x128xf32, #tpu.memory_space<vmem>>, %arg9: memref<8x8x512xf32, #tpu.memory_space<vmem>>) attributes {dimension_semantics = [], scalar_prefetch = 0 : i64, scratch_operands = 1 : i64, tpu.core_type = #tpu.core_type<tc>} {
    %c0 = arith.constant 0 : index
    %c0_0 = arith.constant 0 : index
    %0 = vector.load %arg0[%c0, %c0_0] : memref<64x4xbf16, #tpu.memory_space<vmem>>, vector<64x4xbf16>
    %c0_1 = arith.constant 0 : index
    %c0_2 = arith.constant 0 : index
    %1 = vector.load %arg1[%c0_1, %c0_2] : memref<4x512xbf16, #tpu.memory_space<vmem>>, vector<4x512xbf16>
    %cst = arith.constant dense<0.000000e+00> : vector<64x512xf32>
    %2 = tpu.matmul %0, %1, %cst {dimension_numbers = #tpu.dot_dimension_numbers<[1], [0], [0], [1], [0, 0, 1, 1], [], []>} : vector<64x4xbf16>, vector<4x512xbf16>, vector<64x512xf32> -> vector<64x512xf32>
    %c0_3 = arith.constant 0 : index
    %c0_4 = arith.constant 0 : index
    %3 = vector.load %arg3[%c0_3, %c0_4] : memref<1x512xf32, #tpu.memory_space<vmem>>, vector<1x512xf32>
    %4 = vector.broadcast %3 : vector<1x512xf32> to vector<64x512xf32>
    %5 = arith.addf %2, %4 : vector<64x512xf32>
    %6 = vector.shape_cast %5 : vector<64x512xf32> to vector<8x8x512xf32>
    %c0_5 = arith.constant 0 : index
    %c0_6 = arith.constant 0 : index
    %c0_7 = arith.constant 0 : index
    %7 = vector.load %arg9[%c0_5, %c0_6, %c0_7] : memref<8x8x512xf32, #tpu.memory_space<vmem>>, vector<8x8x512xf32>
    tpu.vector_store %arg9[%c0_5, %c0_6, %c0_7], %6 {strides = array<i32>} : memref<8x8x512xf32, #tpu.memory_space<vmem>>, vector<8x8x512xf32>,
    %c0_8 = arith.constant 0 : index
    %c0_9 = arith.constant 0 : index
    %8 = vector.load %arg2[%c0_8, %c0_9] : memref<128x512xbf16, #tpu.memory_space<vmem>>, vector<128x512xbf16>
    %c0_10 = arith.constant 0 : index
    %c0_11 = arith.constant 0 : index
    %9 = vector.load %arg4[%c0_10, %c0_11] : memref<256x512xbf16, #tpu.memory_space<vmem>>, vector<256x512xbf16>
    %c0_12 = arith.constant 0 : index
    %c0_13 = arith.constant 0 : index
    %10 = vector.load %arg5[%c0_12, %c0_13] : memref<1x512xf32, #tpu.memory_space<vmem>>, vector<1x512xf32>
    %11 = vector.shape_cast %10 : vector<1x512xf32> to vector<1x512xf32>
    %12 = vector.broadcast %11 : vector<1x512xf32> to vector<8x512xf32>
    %cst_14 = arith.constant 0.000000e+00 : f32
    %13 = vector.broadcast %cst_14 : f32 to vector<8x128xf32>
    %c0_15 = arith.constant 0 : index
    %c0_16 = arith.constant 0 : index
    %c0_17 = arith.constant 0 : index
    %14 = vector.load %arg9[%c0_15, %c0_16, %c0_17] : memref<8x8x512xf32, #tpu.memory_space<vmem>>, vector<1x8x512xf32>
    %15 = vector.shape_cast %14 : vector<1x8x512xf32> to vector<8x512xf32>
    %16 = arith.truncf %13 : vector<8x128xf32> to vector<8x128xbf16>
    %cst_18 = arith.constant dense<0.000000e+00> : vector<8x512xf32>
    %17 = tpu.matmul %16, %8, %cst_18 {dimension_numbers = #tpu.dot_dimension_numbers<[1], [0], [0], [1], [0, 0, 1, 1], [], []>} : vector<8x128xbf16>, vector<128x512xbf16>, vector<8x512xf32> -> vector<8x512xf32>
    %18 = arith.addf %15, %17 : vector<8x512xf32>
    %19 = vector.extract_strided_slice %18 {offsets = [0, 0], sizes = [8, 128], strides = [1, 1]} : vector<8x512xf32> to vector<8x128xf32>
    %20 = arith.negf %19 : vector<8x128xf32>
    %21 = math.exp %20 : vector<8x128xf32>
    %cst_19 = arith.constant 1.000000e+00 : f32
    %22 = vector.broadcast %cst_19 : f32 to vector<8x128xf32>
    %23 = arith.addf %22, %21 : vector<8x128xf32>
    %24 = arith.divf %22, %23 : vector<8x128xf32>
    %25 = vector.extract_strided_slice %18 {offsets = [0, 128], sizes = [8, 128], strides = [1, 1]} : vector<8x512xf32> to vector<8x128xf32>
    %26 = arith.negf %25 : vector<8x128xf32>
    %27 = math.exp %26 : vector<8x128xf32>
    %cst_20 = arith.constant 1.000000e+00 : f32
    %28 = vector.broadcast %cst_20 : f32 to vector<8x128xf32>
    %29 = arith.addf %28, %27 : vector<8x128xf32>
    %30 = arith.divf %28, %29 : vector<8x128xf32>
    %31 = vector.extract_strided_slice %18 {offsets = [0, 256], sizes = [8, 128], strides = [1, 1]} : vector<8x512xf32> to vector<8x128xf32>
    %32 = math.tanh %31 : vector<8x128xf32>
    %33 = vector.extract_strided_slice %18 {offsets = [0, 384], sizes = [8, 128], strides = [1, 1]} : vector<8x512xf32> to vector<8x128xf32>
    %34 = arith.negf %33 : vector<8x128xf32>
    %35 = math.exp %34 : vector<8x128xf32>
    %cst_21 = arith.constant 1.000000e+00 : f32
    %36 = vector.broadcast %cst_21 : f32 to vector<8x128xf32>
    %37 = arith.addf %36, %35 : vector<8x128xf32>
    %38 = arith.divf %36, %37 : vector<8x128xf32>
    %39 = arith.mulf %30, %13 : vector<8x128xf32>
    %40 = arith.mulf %24, %32 : vector<8x128xf32>
    %41 = arith.addf %39, %40 : vector<8x128xf32>
    %42 = math.tanh %41 : vector<8x128xf32>
    %43 = arith.mulf %38, %42 : vector<8x128xf32>
    %c1 = arith.constant 1 : index
    %c0_22 = arith.constant 0 : index
    %c0_23 = arith.constant 0 : index
    %44 = vector.load %arg9[%c1, %c0_22, %c0_23] : memref<8x8x512xf32, #tpu.memory_space<vmem>>, vector<1x8x512xf32>
    %45 = vector.shape_cast %44 : vector<1x8x512xf32> to vector<8x512xf32>
    %46 = arith.truncf %43 : vector<8x128xf32> to vector<8x128xbf16>
    %cst_24 = arith.constant dense<0.000000e+00> : vector<8x512xf32>
    %47 = tpu.matmul %46, %8, %cst_24 {dimension_numbers = #tpu.dot_dimension_numbers<[1], [0], [0], [1], [0, 0, 1, 1], [], []>} : vector<8x128xbf16>, vector<128x512xbf16>, vector<8x512xf32> -> vector<8x512xf32>
    %48 = arith.addf %45, %47 : vector<8x512xf32>
    %49 = vector.extract_strided_slice %48 {offsets = [0, 0], sizes = [8, 128], strides = [1, 1]} : vector<8x512xf32> to vector<8x128xf32>
    %50 = arith.negf %49 : vector<8x128xf32>
    %51 = math.exp %50 : vector<8x128xf32>
    %cst_25 = arith.constant 1.000000e+00 : f32
    %52 = vector.broadcast %cst_25 : f32 to vector<8x128xf32>
    %53 = arith.addf %52, %51 : vector<8x128xf32>
    %54 = arith.divf %52, %53 : vector<8x128xf32>
    %55 = vector.extract_strided_slice %48 {offsets = [0, 128], sizes = [8, 128], strides = [1, 1]} : vector<8x512xf32> to vector<8x128xf32>
    %56 = arith.negf %55 : vector<8x128xf32>
    %57 = math.exp %56 : vector<8x128xf32>
    %cst_26 = arith.constant 1.000000e+00 : f32
    %58 = vector.broadcast %cst_26 : f32 to vector<8x128xf32>
    %59 = arith.addf %58, %57 : vector<8x128xf32>
    %60 = arith.divf %58, %59 : vector<8x128xf32>
    %61 = vector.extract_strided_slice %48 {offsets = [0, 256], sizes = [8, 128], strides = [1, 1]} : vector<8x512xf32> to vector<8x128xf32>
    %62 = math.tanh %61 : vector<8x128xf32>
    %63 = vector.extract_strided_slice %48 {offsets = [0, 384], sizes = [8, 128], strides = [1, 1]} : vector<8x512xf32> to vector<8x128xf32>
    %64 = arith.negf %63 : vector<8x128xf32>
    %65 = math.exp %64 : vector<8x128xf32>
    %cst_27 = arith.constant 1.000000e+00 : f32
    %66 = vector.broadcast %cst_27 : f32 to vector<8x128xf32>
    %67 = arith.addf %66, %65 : vector<8x128xf32>
    %68 = arith.divf %66, %67 : vector<8x128xf32>
    %69 = arith.mulf %60, %41 : vector<8x128xf32>
    %70 = arith.mulf %54, %62 : vector<8x128xf32>
    %71 = arith.addf %69, %70 : vector<8x128xf32>
    %72 = math.tanh %71 : vector<8x128xf32>
    %73 = arith.mulf %68, %72 : vector<8x128xf32>
    %74 = tpu.concatenate %43, %13 in 1 : vector<8x128xf32>, vector<8x128xf32> -> vector<8x256xf32>
    %75 = arith.truncf %74 : vector<8x256xf32> to vector<8x256xbf16>
    %cst_28 = arith.constant dense<0.000000e+00> : vector<8x512xf32>
    %76 = tpu.matmul %75, %9, %cst_28 {dimension_numbers = #tpu.dot_dimension_numbers<[1], [0], [0], [1], [0, 0, 1, 1], [], []>} : vector<8x256xbf16>, vector<256x512xbf16>, vector<8x512xf32> -> vector<8x512xf32>
    %77 = arith.addf %76, %12 : vector<8x512xf32>
    %78 = vector.extract_strided_slice %77 {offsets = [0, 0], sizes = [8, 128], strides = [1, 1]} : vector<8x512xf32> to vector<8x128xf32>
    %79 = arith.negf %78 : vector<8x128xf32>
    %80 = math.exp %79 : vector<8x128xf32>
    %cst_29 = arith.constant 1.000000e+00 : f32
    %81 = vector.broadcast %cst_29 : f32 to vector<8x128xf32>
    %82 = arith.addf %81, %80 : vector<8x128xf32>
    %83 = arith.divf %81, %82 : vector<8x128xf32>
    %84 = vector.extract_strided_slice %77 {offsets = [0, 128], sizes = [8, 128], strides = [1, 1]} : vector<8x512xf32> to vector<8x128xf32>
    %85 = arith.negf %84 : vector<8x128xf32>
    %86 = math.exp %85 : vector<8x128xf32>
    %cst_30 = arith.constant 1.000000e+00 : f32
    %87 = vector.broadcast %cst_30 : f32 to vector<8x128xf32>
    %88 = arith.addf %87, %86 : vector<8x128xf32>
    %89 = arith.divf %87, %88 : vector<8x128xf32>
    %90 = vector.extract_strided_slice %77 {offsets = [0, 256], sizes = [8, 128], strides = [1, 1]} : vector<8x512xf32> to vector<8x128xf32>
    %91 = math.tanh %90 : vector<8x128xf32>
    %92 = vector.extract_strided_slice %77 {offsets = [0, 384], sizes = [8, 128], strides = [1, 1]} : vector<8x512xf32> to vector<8x128xf32>
    %93 = arith.negf %92 : vector<8x128xf32>
    %94 = math.exp %93 : vector<8x128xf32>
    %cst_31 = arith.constant 1.000000e+00 : f32
    %95 = vector.broadcast %cst_31 : f32 to vector<8x128xf32>
    %96 = arith.addf %95, %94 : vector<8x128xf32>
    %97 = arith.divf %95, %96 : vector<8x128xf32>
    %98 = arith.mulf %89, %13 : vector<8x128xf32>
    %99 = arith.mulf %83, %91 : vector<8x128xf32>
    %100 = arith.addf %98, %99 : vector<8x128xf32>
    %101 = math.tanh %100 : vector<8x128xf32>
    %102 = arith.mulf %97, %101 : vector<8x128xf32>
    %c2 = arith.constant 2 : index
    %c0_32 = arith.constant 0 : index
    %c0_33 = arith.constant 0 : index
    %103 = vector.load %arg9[%c2, %c0_32, %c0_33] : memref<8x8x512xf32, #tpu.memory_space<vmem>>, vector<1x8x512xf32>
    %104 = vector.shape_cast %103 : vector<1x8x512xf32> to vector<8x512xf32>
    %105 = arith.truncf %73 : vector<8x128xf32> to vector<8x128xbf16>
    %cst_34 = arith.constant dense<0.000000e+00> : vector<8x512xf32>
    %106 = tpu.matmul %105, %8, %cst_34 {dimension_numbers = #tpu.dot_dimension_numbers<[1], [0], [0], [1], [0, 0, 1, 1], [], []>} : vector<8x128xbf16>, vector<128x512xbf16>, vector<8x512xf32> -> vector<8x512xf32>
    %107 = arith.addf %104, %106 : vector<8x512xf32>
    %108 = vector.extract_strided_slice %107 {offsets = [0, 0], sizes = [8, 128], strides = [1, 1]} : vector<8x512xf32> to vector<8x128xf32>
    %109 = arith.negf %108 : vector<8x128xf32>
    %110 = math.exp %109 : vector<8x128xf32>
    %cst_35 = arith.constant 1.000000e+00 : f32
    %111 = vector.broadcast %cst_35 : f32 to vector<8x128xf32>
    %112 = arith.addf %111, %110 : vector<8x128xf32>
    %113 = arith.divf %111, %112 : vector<8x128xf32>
    %114 = vector.extract_strided_slice %107 {offsets = [0, 128], sizes = [8, 128], strides = [1, 1]} : vector<8x512xf32> to vector<8x128xf32>
    %115 = arith.negf %114 : vector<8x128xf32>
    %116 = math.exp %115 : vector<8x128xf32>
    %cst_36 = arith.constant 1.000000e+00 : f32
    %117 = vector.broadcast %cst_36 : f32 to vector<8x128xf32>
    %118 = arith.addf %117, %116 : vector<8x128xf32>
    %119 = arith.divf %117, %118 : vector<8x128xf32>
    %120 = vector.extract_strided_slice %107 {offsets = [0, 256], sizes = [8, 128], strides = [1, 1]} : vector<8x512xf32> to vector<8x128xf32>
    %121 = math.tanh %120 : vector<8x128xf32>
    %122 = vector.extract_strided_slice %107 {offsets = [0, 384], sizes = [8, 128], strides = [1, 1]} : vector<8x512xf32> to vector<8x128xf32>
    %123 = arith.negf %122 : vector<8x128xf32>
    %124 = math.exp %123 : vector<8x128xf32>
    %cst_37 = arith.constant 1.000000e+00 : f32
    %125 = vector.broadcast %cst_37 : f32 to vector<8x128xf32>
    %126 = arith.addf %125, %124 : vector<8x128xf32>
    %127 = arith.divf %125, %126 : vector<8x128xf32>
    %128 = arith.mulf %119, %71 : vector<8x128xf32>
    %129 = arith.mulf %113, %121 : vector<8x128xf32>
    %130 = arith.addf %128, %129 : vector<8x128xf32>
    %131 = math.tanh %130 : vector<8x128xf32>
    %132 = arith.mulf %127, %131 : vector<8x128xf32>
    %133 = tpu.concatenate %73, %102 in 1 : vector<8x128xf32>, vector<8x128xf32> -> vector<8x256xf32>
    %134 = arith.truncf %133 : vector<8x256xf32> to vector<8x256xbf16>
    %cst_38 = arith.constant dense<0.000000e+00> : vector<8x512xf32>
    %135 = tpu.matmul %134, %9, %cst_38 {dimension_numbers = #tpu.dot_dimension_numbers<[1], [0], [0], [1], [0, 0, 1, 1], [], []>} : vector<8x256xbf16>, vector<256x512xbf16>, vector<8x512xf32> -> vector<8x512xf32>
    %136 = arith.addf %135, %12 : vector<8x512xf32>
    %137 = vector.extract_strided_slice %136 {offsets = [0, 0], sizes = [8, 128], strides = [1, 1]} : vector<8x512xf32> to vector<8x128xf32>
    %138 = arith.negf %137 : vector<8x128xf32>
    %139 = math.exp %138 : vector<8x128xf32>
    %cst_39 = arith.constant 1.000000e+00 : f32
    %140 = vector.broadcast %cst_39 : f32 to vector<8x128xf32>
    %141 = arith.addf %140, %139 : vector<8x128xf32>
    %142 = arith.divf %140, %141 : vector<8x128xf32>
    %143 = vector.extract_strided_slice %136 {offsets = [0, 128], sizes = [8, 128], strides = [1, 1]} : vector<8x512xf32> to vector<8x128xf32>
    %144 = arith.negf %143 : vector<8x128xf32>
    %145 = math.exp %144 : vector<8x128xf32>
    %cst_40 = arith.constant 1.000000e+00 : f32
    %146 = vector.broadcast %cst_40 : f32 to vector<8x128xf32>
    %147 = arith.addf %146, %145 : vector<8x128xf32>
    %148 = arith.divf %146, %147 : vector<8x128xf32>
    %149 = vector.extract_strided_slice %136 {offsets = [0, 256], sizes = [8, 128], strides = [1, 1]} : vector<8x512xf32> to vector<8x128xf32>
    %150 = math.tanh %149 : vector<8x128xf32>
    %151 = vector.extract_strided_slice %136 {offsets = [0, 384], sizes = [8, 128], strides = [1, 1]} : vector<8x512xf32> to vector<8x128xf32>
    %152 = arith.negf %151 : vector<8x128xf32>
    %153 = math.exp %152 : vector<8x128xf32>
    %cst_41 = arith.constant 1.000000e+00 : f32
    %154 = vector.broadcast %cst_41 : f32 to vector<8x128xf32>
    %155 = arith.addf %154, %153 : vector<8x128xf32>
    %156 = arith.divf %154, %155 : vector<8x128xf32>
    %157 = arith.mulf %148, %100 : vector<8x128xf32>
    %158 = arith.mulf %142, %150 : vector<8x128xf32>
    %159 = arith.addf %157, %158 : vector<8x128xf32>
    %160 = math.tanh %159 : vector<8x128xf32>
    %161 = arith.mulf %156, %160 : vector<8x128xf32>
    %c3 = arith.constant 3 : index
    %c0_42 = arith.constant 0 : index
    %c0_43 = arith.constant 0 : index
    %162 = vector.load %arg9[%c3, %c0_42, %c0_43] : memref<8x8x512xf32, #tpu.memory_space<vmem>>, vector<1x8x512xf32>
    %163 = vector.shape_cast %162 : vector<1x8x512xf32> to vector<8x512xf32>
    %164 = arith.truncf %132 : vector<8x128xf32> to vector<8x128xbf16>
    %cst_44 = arith.constant dense<0.000000e+00> : vector<8x512xf32>
    %165 = tpu.matmul %164, %8, %cst_44 {dimension_numbers = #tpu.dot_dimension_numbers<[1], [0], [0], [1], [0, 0, 1, 1], [], []>} : vector<8x128xbf16>, vector<128x512xbf16>, vector<8x512xf32> -> vector<8x512xf32>
    %166 = arith.addf %163, %165 : vector<8x512xf32>
    %167 = vector.extract_strided_slice %166 {offsets = [0, 0], sizes = [8, 128], strides = [1, 1]} : vector<8x512xf32> to vector<8x128xf32>
    %168 = arith.negf %167 : vector<8x128xf32>
    %169 = math.exp %168 : vector<8x128xf32>
    %cst_45 = arith.constant 1.000000e+00 : f32
    %170 = vector.broadcast %cst_45 : f32 to vector<8x128xf32>
    %171 = arith.addf %170, %169 : vector<8x128xf32>
    %172 = arith.divf %170, %171 : vector<8x128xf32>
    %173 = vector.extract_strided_slice %166 {offsets = [0, 128], sizes = [8, 128], strides = [1, 1]} : vector<8x512xf32> to vector<8x128xf32>
    %174 = arith.negf %173 : vector<8x128xf32>
    %175 = math.exp %174 : vector<8x128xf32>
    %cst_46 = arith.constant 1.000000e+00 : f32
    %176 = vector.broadcast %cst_46 : f32 to vector<8x128xf32>
    %177 = arith.addf %176, %175 : vector<8x128xf32>
    %178 = arith.divf %176, %177 : vector<8x128xf32>
    %179 = vector.extract_strided_slice %166 {offsets = [0, 256], sizes = [8, 128], strides = [1, 1]} : vector<8x512xf32> to vector<8x128xf32>
    %180 = math.tanh %179 : vector<8x128xf32>
    %181 = vector.extract_strided_slice %166 {offsets = [0, 384], sizes = [8, 128], strides = [1, 1]} : vector<8x512xf32> to vector<8x128xf32>
    %182 = arith.negf %181 : vector<8x128xf32>
    %183 = math.exp %182 : vector<8x128xf32>
    %cst_47 = arith.constant 1.000000e+00 : f32
    %184 = vector.broadcast %cst_47 : f32 to vector<8x128xf32>
    %185 = arith.addf %184, %183 : vector<8x128xf32>
    %186 = arith.divf %184, %185 : vector<8x128xf32>
    %187 = arith.mulf %178, %130 : vector<8x128xf32>
    %188 = arith.mulf %172, %180 : vector<8x128xf32>
    %189 = arith.addf %187, %188 : vector<8x128xf32>
    %190 = math.tanh %189 : vector<8x128xf32>
    %191 = arith.mulf %186, %190 : vector<8x128xf32>
    %192 = tpu.concatenate %132, %161 in 1 : vector<8x128xf32>, vector<8x128xf32> -> vector<8x256xf32>
    %193 = arith.truncf %192 : vector<8x256xf32> to vector<8x256xbf16>
    %cst_48 = arith.constant dense<0.000000e+00> : vector<8x512xf32>
    %194 = tpu.matmul %193, %9, %cst_48 {dimension_numbers = #tpu.dot_dimension_numbers<[1], [0], [0], [1], [0, 0, 1, 1], [], []>} : vector<8x256xbf16>, vector<256x512xbf16>, vector<8x512xf32> -> vector<8x512xf32>
    %195 = arith.addf %194, %12 : vector<8x512xf32>
    %196 = vector.extract_strided_slice %195 {offsets = [0, 0], sizes = [8, 128], strides = [1, 1]} : vector<8x512xf32> to vector<8x128xf32>
    %197 = arith.negf %196 : vector<8x128xf32>
    %198 = math.exp %197 : vector<8x128xf32>
    %cst_49 = arith.constant 1.000000e+00 : f32
    %199 = vector.broadcast %cst_49 : f32 to vector<8x128xf32>
    %200 = arith.addf %199, %198 : vector<8x128xf32>
    %201 = arith.divf %199, %200 : vector<8x128xf32>
    %202 = vector.extract_strided_slice %195 {offsets = [0, 128], sizes = [8, 128], strides = [1, 1]} : vector<8x512xf32> to vector<8x128xf32>
    %203 = arith.negf %202 : vector<8x128xf32>
    %204 = math.exp %203 : vector<8x128xf32>
    %cst_50 = arith.constant 1.000000e+00 : f32
    %205 = vector.broadcast %cst_50 : f32 to vector<8x128xf32>
    %206 = arith.addf %205, %204 : vector<8x128xf32>
    %207 = arith.divf %205, %206 : vector<8x128xf32>
    %208 = vector.extract_strided_slice %195 {offsets = [0, 256], sizes = [8, 128], strides = [1, 1]} : vector<8x512xf32> to vector<8x128xf32>
    %209 = math.tanh %208 : vector<8x128xf32>
    %210 = vector.extract_strided_slice %195 {offsets = [0, 384], sizes = [8, 128], strides = [1, 1]} : vector<8x512xf32> to vector<8x128xf32>
    %211 = arith.negf %210 : vector<8x128xf32>
    %212 = math.exp %211 : vector<8x128xf32>
    %cst_51 = arith.constant 1.000000e+00 : f32
    %213 = vector.broadcast %cst_51 : f32 to vector<8x128xf32>
    %214 = arith.addf %213, %212 : vector<8x128xf32>
    %215 = arith.divf %213, %214 : vector<8x128xf32>
    %216 = arith.mulf %207, %159 : vector<8x128xf32>
    %217 = arith.mulf %201, %209 : vector<8x128xf32>
    %218 = arith.addf %216, %217 : vector<8x128xf32>
    %219 = math.tanh %218 : vector<8x128xf32>
    %220 = arith.mulf %215, %219 : vector<8x128xf32>
    %c4 = arith.constant 4 : index
    %c0_52 = arith.constant 0 : index
    %c0_53 = arith.constant 0 : index
    %221 = vector.load %arg9[%c4, %c0_52, %c0_53] : memref<8x8x512xf32, #tpu.memory_space<vmem>>, vector<1x8x512xf32>
    %222 = vector.shape_cast %221 : vector<1x8x512xf32> to vector<8x512xf32>
    %223 = arith.truncf %191 : vector<8x128xf32> to vector<8x128xbf16>
    %cst_54 = arith.constant dense<0.000000e+00> : vector<8x512xf32>
    %224 = tpu.matmul %223, %8, %cst_54 {dimension_numbers = #tpu.dot_dimension_numbers<[1], [0], [0], [1], [0, 0, 1, 1], [], []>} : vector<8x128xbf16>, vector<128x512xbf16>, vector<8x512xf32> -> vector<8x512xf32>
    %225 = arith.addf %222, %224 : vector<8x512xf32>
    %226 = vector.extract_strided_slice %225 {offsets = [0, 0], sizes = [8, 128], strides = [1, 1]} : vector<8x512xf32> to vector<8x128xf32>
    %227 = arith.negf %226 : vector<8x128xf32>
    %228 = math.exp %227 : vector<8x128xf32>
    %cst_55 = arith.constant 1.000000e+00 : f32
    %229 = vector.broadcast %cst_55 : f32 to vector<8x128xf32>
    %230 = arith.addf %229, %228 : vector<8x128xf32>
    %231 = arith.divf %229, %230 : vector<8x128xf32>
    %232 = vector.extract_strided_slice %225 {offsets = [0, 128], sizes = [8, 128], strides = [1, 1]} : vector<8x512xf32> to vector<8x128xf32>
    %233 = arith.negf %232 : vector<8x128xf32>
    %234 = math.exp %233 : vector<8x128xf32>
    %cst_56 = arith.constant 1.000000e+00 : f32
    %235 = vector.broadcast %cst_56 : f32 to vector<8x128xf32>
    %236 = arith.addf %235, %234 : vector<8x128xf32>
    %237 = arith.divf %235, %236 : vector<8x128xf32>
    %238 = vector.extract_strided_slice %225 {offsets = [0, 256], sizes = [8, 128], strides = [1, 1]} : vector<8x512xf32> to vector<8x128xf32>
    %239 = math.tanh %238 : vector<8x128xf32>
    %240 = vector.extract_strided_slice %225 {offsets = [0, 384], sizes = [8, 128], strides = [1, 1]} : vector<8x512xf32> to vector<8x128xf32>
    %241 = arith.negf %240 : vector<8x128xf32>
    %242 = math.exp %241 : vector<8x128xf32>
    %cst_57 = arith.constant 1.000000e+00 : f32
    %243 = vector.broadcast %cst_57 : f32 to vector<8x128xf32>
    %244 = arith.addf %243, %242 : vector<8x128xf32>
    %245 = arith.divf %243, %244 : vector<8x128xf32>
    %246 = arith.mulf %237, %189 : vector<8x128xf32>
    %247 = arith.mulf %231, %239 : vector<8x128xf32>
    %248 = arith.addf %246, %247 : vector<8x128xf32>
    %249 = math.tanh %248 : vector<8x128xf32>
    %250 = arith.mulf %245, %249 : vector<8x128xf32>
    %251 = tpu.concatenate %191, %220 in 1 : vector<8x128xf32>, vector<8x128xf32> -> vector<8x256xf32>
    %252 = arith.truncf %251 : vector<8x256xf32> to vector<8x256xbf16>
    %cst_58 = arith.constant dense<0.000000e+00> : vector<8x512xf32>
    %253 = tpu.matmul %252, %9, %cst_58 {dimension_numbers = #tpu.dot_dimension_numbers<[1], [0], [0], [1], [0, 0, 1, 1], [], []>} : vector<8x256xbf16>, vector<256x512xbf16>, vector<8x512xf32> -> vector<8x512xf32>
    %254 = arith.addf %253, %12 : vector<8x512xf32>
    %255 = vector.extract_strided_slice %254 {offsets = [0, 0], sizes = [8, 128], strides = [1, 1]} : vector<8x512xf32> to vector<8x128xf32>
    %256 = arith.negf %255 : vector<8x128xf32>
    %257 = math.exp %256 : vector<8x128xf32>
    %cst_59 = arith.constant 1.000000e+00 : f32
    %258 = vector.broadcast %cst_59 : f32 to vector<8x128xf32>
    %259 = arith.addf %258, %257 : vector<8x128xf32>
    %260 = arith.divf %258, %259 : vector<8x128xf32>
    %261 = vector.extract_strided_slice %254 {offsets = [0, 128], sizes = [8, 128], strides = [1, 1]} : vector<8x512xf32> to vector<8x128xf32>
    %262 = arith.negf %261 : vector<8x128xf32>
    %263 = math.exp %262 : vector<8x128xf32>
    %cst_60 = arith.constant 1.000000e+00 : f32
    %264 = vector.broadcast %cst_60 : f32 to vector<8x128xf32>
    %265 = arith.addf %264, %263 : vector<8x128xf32>
    %266 = arith.divf %264, %265 : vector<8x128xf32>
    %267 = vector.extract_strided_slice %254 {offsets = [0, 256], sizes = [8, 128], strides = [1, 1]} : vector<8x512xf32> to vector<8x128xf32>
    %268 = math.tanh %267 : vector<8x128xf32>
    %269 = vector.extract_strided_slice %254 {offsets = [0, 384], sizes = [8, 128], strides = [1, 1]} : vector<8x512xf32> to vector<8x128xf32>
    %270 = arith.negf %269 : vector<8x128xf32>
    %271 = math.exp %270 : vector<8x128xf32>
    %cst_61 = arith.constant 1.000000e+00 : f32
    %272 = vector.broadcast %cst_61 : f32 to vector<8x128xf32>
    %273 = arith.addf %272, %271 : vector<8x128xf32>
    %274 = arith.divf %272, %273 : vector<8x128xf32>
    %275 = arith.mulf %266, %218 : vector<8x128xf32>
    %276 = arith.mulf %260, %268 : vector<8x128xf32>
    %277 = arith.addf %275, %276 : vector<8x128xf32>
    %278 = math.tanh %277 : vector<8x128xf32>
    %279 = arith.mulf %274, %278 : vector<8x128xf32>
    %c5 = arith.constant 5 : index
    %c0_62 = arith.constant 0 : index
    %c0_63 = arith.constant 0 : index
    %280 = vector.load %arg9[%c5, %c0_62, %c0_63] : memref<8x8x512xf32, #tpu.memory_space<vmem>>, vector<1x8x512xf32>
    %281 = vector.shape_cast %280 : vector<1x8x512xf32> to vector<8x512xf32>
    %282 = arith.truncf %250 : vector<8x128xf32> to vector<8x128xbf16>
    %cst_64 = arith.constant dense<0.000000e+00> : vector<8x512xf32>
    %283 = tpu.matmul %282, %8, %cst_64 {dimension_numbers = #tpu.dot_dimension_numbers<[1], [0], [0], [1], [0, 0, 1, 1], [], []>} : vector<8x128xbf16>, vector<128x512xbf16>, vector<8x512xf32> -> vector<8x512xf32>
    %284 = arith.addf %281, %283 : vector<8x512xf32>
    %285 = vector.extract_strided_slice %284 {offsets = [0, 0], sizes = [8, 128], strides = [1, 1]} : vector<8x512xf32> to vector<8x128xf32>
    %286 = arith.negf %285 : vector<8x128xf32>
    %287 = math.exp %286 : vector<8x128xf32>
    %cst_65 = arith.constant 1.000000e+00 : f32
    %288 = vector.broadcast %cst_65 : f32 to vector<8x128xf32>
    %289 = arith.addf %288, %287 : vector<8x128xf32>
    %290 = arith.divf %288, %289 : vector<8x128xf32>
    %291 = vector.extract_strided_slice %284 {offsets = [0, 128], sizes = [8, 128], strides = [1, 1]} : vector<8x512xf32> to vector<8x128xf32>
    %292 = arith.negf %291 : vector<8x128xf32>
    %293 = math.exp %292 : vector<8x128xf32>
    %cst_66 = arith.constant 1.000000e+00 : f32
    %294 = vector.broadcast %cst_66 : f32 to vector<8x128xf32>
    %295 = arith.addf %294, %293 : vector<8x128xf32>
    %296 = arith.divf %294, %295 : vector<8x128xf32>
    %297 = vector.extract_strided_slice %284 {offsets = [0, 256], sizes = [8, 128], strides = [1, 1]} : vector<8x512xf32> to vector<8x128xf32>
    %298 = math.tanh %297 : vector<8x128xf32>
    %299 = vector.extract_strided_slice %284 {offsets = [0, 384], sizes = [8, 128], strides = [1, 1]} : vector<8x512xf32> to vector<8x128xf32>
    %300 = arith.negf %299 : vector<8x128xf32>
    %301 = math.exp %300 : vector<8x128xf32>
    %cst_67 = arith.constant 1.000000e+00 : f32
    %302 = vector.broadcast %cst_67 : f32 to vector<8x128xf32>
    %303 = arith.addf %302, %301 : vector<8x128xf32>
    %304 = arith.divf %302, %303 : vector<8x128xf32>
    %305 = arith.mulf %296, %248 : vector<8x128xf32>
    %306 = arith.mulf %290, %298 : vector<8x128xf32>
    %307 = arith.addf %305, %306 : vector<8x128xf32>
    %308 = math.tanh %307 : vector<8x128xf32>
    %309 = arith.mulf %304, %308 : vector<8x128xf32>
    %310 = tpu.concatenate %250, %279 in 1 : vector<8x128xf32>, vector<8x128xf32> -> vector<8x256xf32>
    %311 = arith.truncf %310 : vector<8x256xf32> to vector<8x256xbf16>
    %cst_68 = arith.constant dense<0.000000e+00> : vector<8x512xf32>
    %312 = tpu.matmul %311, %9, %cst_68 {dimension_numbers = #tpu.dot_dimension_numbers<[1], [0], [0], [1], [0, 0, 1, 1], [], []>} : vector<8x256xbf16>, vector<256x512xbf16>, vector<8x512xf32> -> vector<8x512xf32>
    %313 = arith.addf %312, %12 : vector<8x512xf32>
    %314 = vector.extract_strided_slice %313 {offsets = [0, 0], sizes = [8, 128], strides = [1, 1]} : vector<8x512xf32> to vector<8x128xf32>
    %315 = arith.negf %314 : vector<8x128xf32>
    %316 = math.exp %315 : vector<8x128xf32>
    %cst_69 = arith.constant 1.000000e+00 : f32
    %317 = vector.broadcast %cst_69 : f32 to vector<8x128xf32>
    %318 = arith.addf %317, %316 : vector<8x128xf32>
    %319 = arith.divf %317, %318 : vector<8x128xf32>
    %320 = vector.extract_strided_slice %313 {offsets = [0, 128], sizes = [8, 128], strides = [1, 1]} : vector<8x512xf32> to vector<8x128xf32>
    %321 = arith.negf %320 : vector<8x128xf32>
    %322 = math.exp %321 : vector<8x128xf32>
    %cst_70 = arith.constant 1.000000e+00 : f32
    %323 = vector.broadcast %cst_70 : f32 to vector<8x128xf32>
    %324 = arith.addf %323, %322 : vector<8x128xf32>
    %325 = arith.divf %323, %324 : vector<8x128xf32>
    %326 = vector.extract_strided_slice %313 {offsets = [0, 256], sizes = [8, 128], strides = [1, 1]} : vector<8x512xf32> to vector<8x128xf32>
    %327 = math.tanh %326 : vector<8x128xf32>
    %328 = vector.extract_strided_slice %313 {offsets = [0, 384], sizes = [8, 128], strides = [1, 1]} : vector<8x512xf32> to vector<8x128xf32>
    %329 = arith.negf %328 : vector<8x128xf32>
    %330 = math.exp %329 : vector<8x128xf32>
    %cst_71 = arith.constant 1.000000e+00 : f32
    %331 = vector.broadcast %cst_71 : f32 to vector<8x128xf32>
    %332 = arith.addf %331, %330 : vector<8x128xf32>
    %333 = arith.divf %331, %332 : vector<8x128xf32>
    %334 = arith.mulf %325, %277 : vector<8x128xf32>
    %335 = arith.mulf %319, %327 : vector<8x128xf32>
    %336 = arith.addf %334, %335 : vector<8x128xf32>
    %337 = math.tanh %336 : vector<8x128xf32>
    %338 = arith.mulf %333, %337 : vector<8x128xf32>
    %c6 = arith.constant 6 : index
    %c0_72 = arith.constant 0 : index
    %c0_73 = arith.constant 0 : index
    %339 = vector.load %arg9[%c6, %c0_72, %c0_73] : memref<8x8x512xf32, #tpu.memory_space<vmem>>, vector<1x8x512xf32>
    %340 = vector.shape_cast %339 : vector<1x8x512xf32> to vector<8x512xf32>
    %341 = arith.truncf %309 : vector<8x128xf32> to vector<8x128xbf16>
    %cst_74 = arith.constant dense<0.000000e+00> : vector<8x512xf32>
    %342 = tpu.matmul %341, %8, %cst_74 {dimension_numbers = #tpu.dot_dimension_numbers<[1], [0], [0], [1], [0, 0, 1, 1], [], []>} : vector<8x128xbf16>, vector<128x512xbf16>, vector<8x512xf32> -> vector<8x512xf32>
    %343 = arith.addf %340, %342 : vector<8x512xf32>
    %344 = vector.extract_strided_slice %343 {offsets = [0, 0], sizes = [8, 128], strides = [1, 1]} : vector<8x512xf32> to vector<8x128xf32>
    %345 = arith.negf %344 : vector<8x128xf32>
    %346 = math.exp %345 : vector<8x128xf32>
    %cst_75 = arith.constant 1.000000e+00 : f32
    %347 = vector.broadcast %cst_75 : f32 to vector<8x128xf32>
    %348 = arith.addf %347, %346 : vector<8x128xf32>
    %349 = arith.divf %347, %348 : vector<8x128xf32>
    %350 = vector.extract_strided_slice %343 {offsets = [0, 128], sizes = [8, 128], strides = [1, 1]} : vector<8x512xf32> to vector<8x128xf32>
    %351 = arith.negf %350 : vector<8x128xf32>
    %352 = math.exp %351 : vector<8x128xf32>
    %cst_76 = arith.constant 1.000000e+00 : f32
    %353 = vector.broadcast %cst_76 : f32 to vector<8x128xf32>
    %354 = arith.addf %353, %352 : vector<8x128xf32>
    %355 = arith.divf %353, %354 : vector<8x128xf32>
    %356 = vector.extract_strided_slice %343 {offsets = [0, 256], sizes = [8, 128], strides = [1, 1]} : vector<8x512xf32> to vector<8x128xf32>
    %357 = math.tanh %356 : vector<8x128xf32>
    %358 = vector.extract_strided_slice %343 {offsets = [0, 384], sizes = [8, 128], strides = [1, 1]} : vector<8x512xf32> to vector<8x128xf32>
    %359 = arith.negf %358 : vector<8x128xf32>
    %360 = math.exp %359 : vector<8x128xf32>
    %cst_77 = arith.constant 1.000000e+00 : f32
    %361 = vector.broadcast %cst_77 : f32 to vector<8x128xf32>
    %362 = arith.addf %361, %360 : vector<8x128xf32>
    %363 = arith.divf %361, %362 : vector<8x128xf32>
    %364 = arith.mulf %355, %307 : vector<8x128xf32>
    %365 = arith.mulf %349, %357 : vector<8x128xf32>
    %366 = arith.addf %364, %365 : vector<8x128xf32>
    %367 = math.tanh %366 : vector<8x128xf32>
    %368 = arith.mulf %363, %367 : vector<8x128xf32>
    %369 = tpu.concatenate %309, %338 in 1 : vector<8x128xf32>, vector<8x128xf32> -> vector<8x256xf32>
    %370 = arith.truncf %369 : vector<8x256xf32> to vector<8x256xbf16>
    %cst_78 = arith.constant dense<0.000000e+00> : vector<8x512xf32>
    %371 = tpu.matmul %370, %9, %cst_78 {dimension_numbers = #tpu.dot_dimension_numbers<[1], [0], [0], [1], [0, 0, 1, 1], [], []>} : vector<8x256xbf16>, vector<256x512xbf16>, vector<8x512xf32> -> vector<8x512xf32>
    %372 = arith.addf %371, %12 : vector<8x512xf32>
    %373 = vector.extract_strided_slice %372 {offsets = [0, 0], sizes = [8, 128], strides = [1, 1]} : vector<8x512xf32> to vector<8x128xf32>
    %374 = arith.negf %373 : vector<8x128xf32>
    %375 = math.exp %374 : vector<8x128xf32>
    %cst_79 = arith.constant 1.000000e+00 : f32
    %376 = vector.broadcast %cst_79 : f32 to vector<8x128xf32>
    %377 = arith.addf %376, %375 : vector<8x128xf32>
    %378 = arith.divf %376, %377 : vector<8x128xf32>
    %379 = vector.extract_strided_slice %372 {offsets = [0, 128], sizes = [8, 128], strides = [1, 1]} : vector<8x512xf32> to vector<8x128xf32>
    %380 = arith.negf %379 : vector<8x128xf32>
    %381 = math.exp %380 : vector<8x128xf32>
    %cst_80 = arith.constant 1.000000e+00 : f32
    %382 = vector.broadcast %cst_80 : f32 to vector<8x128xf32>
    %383 = arith.addf %382, %381 : vector<8x128xf32>
    %384 = arith.divf %382, %383 : vector<8x128xf32>
    %385 = vector.extract_strided_slice %372 {offsets = [0, 256], sizes = [8, 128], strides = [1, 1]} : vector<8x512xf32> to vector<8x128xf32>
    %386 = math.tanh %385 : vector<8x128xf32>
    %387 = vector.extract_strided_slice %372 {offsets = [0, 384], sizes = [8, 128], strides = [1, 1]} : vector<8x512xf32> to vector<8x128xf32>
    %388 = arith.negf %387 : vector<8x128xf32>
    %389 = math.exp %388 : vector<8x128xf32>
    %cst_81 = arith.constant 1.000000e+00 : f32
    %390 = vector.broadcast %cst_81 : f32 to vector<8x128xf32>
    %391 = arith.addf %390, %389 : vector<8x128xf32>
    %392 = arith.divf %390, %391 : vector<8x128xf32>
    %393 = arith.mulf %384, %336 : vector<8x128xf32>
    %394 = arith.mulf %378, %386 : vector<8x128xf32>
    %395 = arith.addf %393, %394 : vector<8x128xf32>
    %396 = math.tanh %395 : vector<8x128xf32>
    %397 = arith.mulf %392, %396 : vector<8x128xf32>
    %c7 = arith.constant 7 : index
    %c0_82 = arith.constant 0 : index
    %c0_83 = arith.constant 0 : index
    %398 = vector.load %arg9[%c7, %c0_82, %c0_83] : memref<8x8x512xf32, #tpu.memory_space<vmem>>, vector<1x8x512xf32>
    %399 = vector.shape_cast %398 : vector<1x8x512xf32> to vector<8x512xf32>
    %400 = arith.truncf %368 : vector<8x128xf32> to vector<8x128xbf16>
    %cst_84 = arith.constant dense<0.000000e+00> : vector<8x512xf32>
    %401 = tpu.matmul %400, %8, %cst_84 {dimension_numbers = #tpu.dot_dimension_numbers<[1], [0], [0], [1], [0, 0, 1, 1], [], []>} : vector<8x128xbf16>, vector<128x512xbf16>, vector<8x512xf32> -> vector<8x512xf32>
    %402 = arith.addf %399, %401 : vector<8x512xf32>
    %403 = vector.extract_strided_slice %402 {offsets = [0, 0], sizes = [8, 128], strides = [1, 1]} : vector<8x512xf32> to vector<8x128xf32>
    %404 = arith.negf %403 : vector<8x128xf32>
    %405 = math.exp %404 : vector<8x128xf32>
    %cst_85 = arith.constant 1.000000e+00 : f32
    %406 = vector.broadcast %cst_85 : f32 to vector<8x128xf32>
    %407 = arith.addf %406, %405 : vector<8x128xf32>
    %408 = arith.divf %406, %407 : vector<8x128xf32>
    %409 = vector.extract_strided_slice %402 {offsets = [0, 128], sizes = [8, 128], strides = [1, 1]} : vector<8x512xf32> to vector<8x128xf32>
    %410 = arith.negf %409 : vector<8x128xf32>
    %411 = math.exp %410 : vector<8x128xf32>
    %cst_86 = arith.constant 1.000000e+00 : f32
    %412 = vector.broadcast %cst_86 : f32 to vector<8x128xf32>
    %413 = arith.addf %412, %411 : vector<8x128xf32>
    %414 = arith.divf %412, %413 : vector<8x128xf32>
    %415 = vector.extract_strided_slice %402 {offsets = [0, 256], sizes = [8, 128], strides = [1, 1]} : vector<8x512xf32> to vector<8x128xf32>
    %416 = math.tanh %415 : vector<8x128xf32>
    %417 = vector.extract_strided_slice %402 {offsets = [0, 384], sizes = [8, 128], strides = [1, 1]} : vector<8x512xf32> to vector<8x128xf32>
    %418 = arith.negf %417 : vector<8x128xf32>
    %419 = math.exp %418 : vector<8x128xf32>
    %cst_87 = arith.constant 1.000000e+00 : f32
    %420 = vector.broadcast %cst_87 : f32 to vector<8x128xf32>
    %421 = arith.addf %420, %419 : vector<8x128xf32>
    %422 = arith.divf %420, %421 : vector<8x128xf32>
    %423 = arith.mulf %414, %366 : vector<8x128xf32>
    %424 = arith.mulf %408, %416 : vector<8x128xf32>
    %425 = arith.addf %423, %424 : vector<8x128xf32>
    %426 = math.tanh %425 : vector<8x128xf32>
    %427 = arith.mulf %422, %426 : vector<8x128xf32>
    %428 = tpu.concatenate %368, %397 in 1 : vector<8x128xf32>, vector<8x128xf32> -> vector<8x256xf32>
    %429 = arith.truncf %428 : vector<8x256xf32> to vector<8x256xbf16>
    %cst_88 = arith.constant dense<0.000000e+00> : vector<8x512xf32>
    %430 = tpu.matmul %429, %9, %cst_88 {dimension_numbers = #tpu.dot_dimension_numbers<[1], [0], [0], [1], [0, 0, 1, 1], [], []>} : vector<8x256xbf16>, vector<256x512xbf16>, vector<8x512xf32> -> vector<8x512xf32>
    %431 = arith.addf %430, %12 : vector<8x512xf32>
    %432 = vector.extract_strided_slice %431 {offsets = [0, 0], sizes = [8, 128], strides = [1, 1]} : vector<8x512xf32> to vector<8x128xf32>
    %433 = arith.negf %432 : vector<8x128xf32>
    %434 = math.exp %433 : vector<8x128xf32>
    %cst_89 = arith.constant 1.000000e+00 : f32
    %435 = vector.broadcast %cst_89 : f32 to vector<8x128xf32>
    %436 = arith.addf %435, %434 : vector<8x128xf32>
    %437 = arith.divf %435, %436 : vector<8x128xf32>
    %438 = vector.extract_strided_slice %431 {offsets = [0, 128], sizes = [8, 128], strides = [1, 1]} : vector<8x512xf32> to vector<8x128xf32>
    %439 = arith.negf %438 : vector<8x128xf32>
    %440 = math.exp %439 : vector<8x128xf32>
    %cst_90 = arith.constant 1.000000e+00 : f32
    %441 = vector.broadcast %cst_90 : f32 to vector<8x128xf32>
    %442 = arith.addf %441, %440 : vector<8x128xf32>
    %443 = arith.divf %441, %442 : vector<8x128xf32>
    %444 = vector.extract_strided_slice %431 {offsets = [0, 256], sizes = [8, 128], strides = [1, 1]} : vector<8x512xf32> to vector<8x128xf32>
    %445 = math.tanh %444 : vector<8x128xf32>
    %446 = vector.extract_strided_slice %431 {offsets = [0, 384], sizes = [8, 128], strides = [1, 1]} : vector<8x512xf32> to vector<8x128xf32>
    %447 = arith.negf %446 : vector<8x128xf32>
    %448 = math.exp %447 : vector<8x128xf32>
    %cst_91 = arith.constant 1.000000e+00 : f32
    %449 = vector.broadcast %cst_91 : f32 to vector<8x128xf32>
    %450 = arith.addf %449, %448 : vector<8x128xf32>
    %451 = arith.divf %449, %450 : vector<8x128xf32>
    %452 = arith.mulf %443, %395 : vector<8x128xf32>
    %453 = arith.mulf %437, %445 : vector<8x128xf32>
    %454 = arith.addf %452, %453 : vector<8x128xf32>
    %455 = math.tanh %454 : vector<8x128xf32>
    %456 = arith.mulf %451, %455 : vector<8x128xf32>
    %457 = tpu.concatenate %427, %456 in 1 : vector<8x128xf32>, vector<8x128xf32> -> vector<8x256xf32>
    %458 = arith.truncf %457 : vector<8x256xf32> to vector<8x256xbf16>
    %cst_92 = arith.constant dense<0.000000e+00> : vector<8x512xf32>
    %459 = tpu.matmul %458, %9, %cst_92 {dimension_numbers = #tpu.dot_dimension_numbers<[1], [0], [0], [1], [0, 0, 1, 1], [], []>} : vector<8x256xbf16>, vector<256x512xbf16>, vector<8x512xf32> -> vector<8x512xf32>
    %460 = arith.addf %459, %12 : vector<8x512xf32>
    %461 = vector.extract_strided_slice %460 {offsets = [0, 0], sizes = [8, 128], strides = [1, 1]} : vector<8x512xf32> to vector<8x128xf32>
    %462 = arith.negf %461 : vector<8x128xf32>
    %463 = math.exp %462 : vector<8x128xf32>
    %cst_93 = arith.constant 1.000000e+00 : f32
    %464 = vector.broadcast %cst_93 : f32 to vector<8x128xf32>
    %465 = arith.addf %464, %463 : vector<8x128xf32>
    %466 = arith.divf %464, %465 : vector<8x128xf32>
    %467 = vector.extract_strided_slice %460 {offsets = [0, 128], sizes = [8, 128], strides = [1, 1]} : vector<8x512xf32> to vector<8x128xf32>
    %468 = arith.negf %467 : vector<8x128xf32>
    %469 = math.exp %468 : vector<8x128xf32>
    %cst_94 = arith.constant 1.000000e+00 : f32
    %470 = vector.broadcast %cst_94 : f32 to vector<8x128xf32>
    %471 = arith.addf %470, %469 : vector<8x128xf32>
    %472 = arith.divf %470, %471 : vector<8x128xf32>
    %473 = vector.extract_strided_slice %460 {offsets = [0, 256], sizes = [8, 128], strides = [1, 1]} : vector<8x512xf32> to vector<8x128xf32>
    %474 = math.tanh %473 : vector<8x128xf32>
    %475 = vector.extract_strided_slice %460 {offsets = [0, 384], sizes = [8, 128], strides = [1, 1]} : vector<8x512xf32> to vector<8x128xf32>
    %476 = arith.negf %475 : vector<8x128xf32>
    %477 = math.exp %476 : vector<8x128xf32>
    %cst_95 = arith.constant 1.000000e+00 : f32
    %478 = vector.broadcast %cst_95 : f32 to vector<8x128xf32>
    %479 = arith.addf %478, %477 : vector<8x128xf32>
    %480 = arith.divf %478, %479 : vector<8x128xf32>
    %481 = arith.mulf %472, %454 : vector<8x128xf32>
    %482 = arith.mulf %466, %474 : vector<8x128xf32>
    %483 = arith.addf %481, %482 : vector<8x128xf32>
    %484 = math.tanh %483 : vector<8x128xf32>
    %485 = arith.mulf %480, %484 : vector<8x128xf32>
    %486 = arith.truncf %485 : vector<8x128xf32> to vector<8x128xbf16>
    %c0_96 = arith.constant 0 : index
    %c0_97 = arith.constant 0 : index
    %487 = vector.load %arg6[%c0_96, %c0_97] : memref<128x128xbf16, #tpu.memory_space<vmem>>, vector<128x128xbf16>
    %cst_98 = arith.constant dense<0.000000e+00> : vector<8x128xf32>
    %488 = tpu.matmul %486, %487, %cst_98 {dimension_numbers = #tpu.dot_dimension_numbers<[1], [0], [0], [1], [0, 0, 1, 1], [], []>} : vector<8x128xbf16>, vector<128x128xbf16>, vector<8x128xf32> -> vector<8x128xf32>
    %c0_99 = arith.constant 0 : index
    %c0_100 = arith.constant 0 : index
    %489 = vector.load %arg7[%c0_99, %c0_100] : memref<1x128xf32, #tpu.memory_space<vmem>>, vector<1x128xf32>
    %490 = vector.broadcast %489 : vector<1x128xf32> to vector<8x128xf32>
    %491 = arith.addf %488, %490 : vector<8x128xf32>
    %c0_101 = arith.constant 0 : index
    %c0_102 = arith.constant 0 : index
    %492 = vector.load %arg8[%c0_101, %c0_102] : memref<8x128xf32, #tpu.memory_space<vmem>>, vector<8x128xf32>
    tpu.vector_store %arg8[%c0_101, %c0_102], %491 {strides = array<i32>} : memref<8x128xf32, #tpu.memory_space<vmem>>, vector<8x128xf32>,
    return
  }
}

</mosaic_0001>

<bundles_post_ra>
// kernel: net_forward.1
= control target key start
LH: loop header
LB: loop body
LE: loop exit
PB: predicated region body
PF: predicated region fallthrough
CT: control target
= control target key end

     0   :  { %13 = vsyncpa [#allocation4], 0  ;;  %s5477_s0 = inlined_call_operand.vmem [shape: bf16[64,4], index: 0, kind: input, shape index: {}]   ;;  %s5478_s1 = inlined_call_operand.vmem [shape: bf16[4,512], index: 1, kind: input, shape index: {}]   ;;  %s5479_s2 = inlined_call_operand.hbm [shape: bf16[128,512], index: 2, kind: input, shape index: {}]   ;;  %s5480_s3 = inlined_call_operand.vmem [shape: f32[1,512], index: 3, kind: input, shape index: {}]   ;;  %s5481_s4 = inlined_call_operand.hbm [shape: bf16[256,512], index: 4, kind: input, shape index: {}]   ;;  %s5482_s5 = inlined_call_operand.vmem [shape: f32[1,512], index: 5, kind: input, shape index: {}]   ;;  %s5483_s6 = inlined_call_operand.vmem [shape: bf16[128,128], index: 6, kind: input, shape index: {}]   ;;  %s5484_s7 = inlined_call_operand.vmem [shape: f32[1,128], index: 7, kind: input, shape index: {}]   ;;  %s5485_s8 = inlined_call_operand.vmem [shape: f32[8,128], index: 8, kind: output, shape index: {}]  }
   0x1   :  { %14 = vsyncpa [#allocation6], 0  ;;  %s3689_s27 = smov [#allocation3]   ;;  %s3641_s9 = scalar_lea.hbm %s5479_s2, 4096 }
   0x2   :  { %s24_s28 = sshll.u32 %s3689_s27, 4  ;;  %p3642_p0 = scmp.ne.s32.totalorder %s5479_s2, %s3641_s9  ;;  %s25_s28 = int_to_ptr.vmem [resolvable:$true] %s24_s28 }
   0x3   :  { %p3645_p1 = scmp.lt.u32.totalorder %s3641_s9, %s5479_s2 }
   0x5   :  { %p3647_p2 = pnand %p3645_p1, %p3642_p0 }
   0x7   :  { %3650 = shalt.err (!%p3647_p2)
}
   0x8   :  { %s3651_s14 = scalar_lea.vmem %s25_s28, 4096  ;;  %p3656_p4 = scmp.lt.s32.totalorder %s25_s28, %s25_s28 }
   0x9   :  { %p3652_p3 = scmp.ne.s32.totalorder %s25_s28, %s3651_s14  ;;  %p3657_p5 = scmp.lt.s32.totalorder %s3651_s14, %s3651_s14 }
   0xb   :  { %p3658_p6 = por %p3657_p5, %p3656_p4 }
   0xd   :  { %p3659_p7 = pnand %p3658_p6, %p3652_p3 }
   0xf   :  { %3662 = shalt.err (!%p3659_p7)
}
  0x10   :  { %s3690_s15 = smov 256   ;;  %s3691_s16 = smov 16  }
  0x11   :  { %30 = dma.hbm_to_vmem [thread:$0]  %s5479_s2, 4096, %s25_s28, [#allocation4], %s3690_s15, %s3690_s15, %s3691_s16  }
  0x12   :  { %s3692_s19 = smov [#allocation5]   ;;  %s3663_s23 = scalar_lea.hbm %s5481_s4, 8192 }
  0x13   :  { %s38_s20 = sshll.u32 %s3692_s19, 4  ;;  %p3664_p8 = scmp.ne.s32.totalorder %s5481_s4, %s3663_s23  ;;  %s39_s20 = int_to_ptr.vmem [resolvable:$true] %s38_s20 }
  0x14   :  { %p3667_p9 = scmp.lt.u32.totalorder %s3663_s23, %s5481_s4 }
  0x16   :  { %p3669_p10 = pnand %p3667_p9, %p3664_p8 }
  0x18   :  { %3672 = shalt.err (!%p3669_p10)
}
  0x19   :  { %s3673_s29 = scalar_lea.vmem %s39_s20, 8192  ;;  %p3678_p12 = scmp.lt.s32.totalorder %s39_s20, %s39_s20 }
  0x1a   :  { %p3674_p11 = scmp.ne.s32.totalorder %s39_s20, %s3673_s29  ;;  %p3679_p13 = scmp.lt.s32.totalorder %s3673_s29, %s3673_s29 }
  0x1c   :  { %p3680_p0 = por %p3679_p13, %p3678_p12 }
  0x1e   :  { %p3681_p1 = pnand %p3680_p0, %p3674_p11 }
  0x20   :  { %3684 = shalt.err (!%p3681_p1)
}
  0x21   :  { %44 = dma.hbm_to_vmem [thread:$0]  %s5481_s4, 8192, %s39_s20, [#allocation6], %s3690_s15, %s3690_s15, %s3691_s16  }
  0x22   :  { %3685 = dma.done.wait [#allocation4], 4096  }
  0x23   :  { %3686 = vsyncadd [#allocation4], 4294963200 }
  0x24   :  { %3687 = dma.done.wait [#allocation6], 8192  }
  0x25   :  { %3688 = vsyncadd [#allocation6], 4294959104  ;;  %v69_v0 = vlaneseq  ;;  %v3693_v1 = vmov 1983009808   ;;  %v5490_v3 = vmov 0   ;;  %v66_v7 = vld [vmem:[%s5478_s1] sm:$0xff] }
  0x26   :  { %v112_v2 = vunpack.c.l.s4 %v3693_v1  ;;  %185 = vmatprep.mubr.bf16.mxu0 %v5490_v3  ;;  %258 = vmatprep.mubr.bf16.mxu1 %v5490_v3  ;;  %vm140_vm0 = vcmask 1041408   ;;  %v110_v9 = vcombine.high %v66_v7, %v66_v7  ;;  %v3775_v13 = vld [vmem:[#allocation3 + $0x4] ss:$16 sps:$4 sm:$0xff]   ;;  %v3037_v14 = vld [vmem:[%s5477_s0] sm:$0xff]   ;;  %vm127_vm1 = vcmask 31744   ;;  %v3063_v34 = vld [vmem:[%s5477_s0 + $0x10] sm:$0xff]  }
  0x27   :  { %v3769_v4 = vshrl.u32 %v69_v0, 7  ;;  %v3780_v17 = vld [vmem:[#allocation3 + $0xc] ss:$16 sps:$4 sm:$0xff]   ;;  %v3782_v18 = vld [vmem:[#allocation3] ss:$16 sps:$4 sm:$0xff]   ;;  %vm3697_vm2 = vmmov 0  }
  0x28   :  { %v113_v5 = vunpack.c.0.s8 %v112_v2  ;;  %v3785_v19 = vld [vmem:[#allocation3 + $0x24] ss:$16 sps:$4 sm:$0xff]   ;;  %v3787_v20 = vld [vmem:[#allocation3 + $0x8] ss:$16 sps:$4 sm:$0xff]   ;;  %v3791_v21 = vld [vmem:[#allocation3 + $0x2c] ss:$16 sps:$4 sm:$0xff]  }
  0x29   :  { %v3794_v22 = vld [vmem:[#allocation3 + $0x20] ss:$16 sps:$4 sm:$0xff]   ;;  %v3799_v23 = vld [vmem:[#allocation3 + $0x44] ss:$16 sps:$4 sm:$0xff]   ;;  %v3802_v24 = vld [vmem:[#allocation3 + $0x28] ss:$16 sps:$4 sm:$0xff]  }
  0x2a   :  { %v116_v6 = vsub.s32 %v113_v5, %v3769_v4  ;;  %v3050_v25 = vld [vmem:[%s5477_s0 + $0x8] sm:$0xff]   ;;  %v3809_v26 = vld [vmem:[#allocation3 + $0x4c] ss:$16 sps:$4 sm:$0xff]   ;;  %v3818_v29 = vld [vmem:[#allocation3 + $0x48] ss:$16 sps:$4 sm:$0xff]   ;;  %v5489_v53 = vsub.s32 0, %v3769_v4 }
  0x2b   :  { %v3812_v27 = vld [vmem:[#allocation3 + $0x40] ss:$16 sps:$4 sm:$0xff]   ;;  %v3815_v28 = vld [vmem:[#allocation3 + $0x64] ss:$16 sps:$4 sm:$0xff]   ;;  %v3822_v30 = vld [vmem:[#allocation3 + $0x6c] ss:$16 sps:$4 sm:$0xff]  }
  0x2c   :  { %v117_v8 = vrot.slane %v66_v7, %v116_v6  ;;  %v124_v12 = vrot.slane %v110_v9, %v116_v6  ;;  %v3825_v31 = vld [vmem:[#allocation3 + $0x60] ss:$16 sps:$4 sm:$0xff]   ;;  %v3830_v32 = vld [vmem:[#allocation3 + $0x84] ss:$16 sps:$4 sm:$0xff]   ;;  %v3833_v33 = vld [vmem:[#allocation3 + $0x68] ss:$16 sps:$4 sm:$0xff]  }
  0x2d   :  { %v3840_v35 = vld [vmem:[#allocation3 + $0x8c] ss:$16 sps:$4 sm:$0xff]   ;;  %v3843_v36 = vld [vmem:[#allocation3 + $0x80] ss:$16 sps:$4 sm:$0xff]   ;;  %v3846_v37 = vld [vmem:[#allocation3 + $0xa4] ss:$16 sps:$4 sm:$0xff]  }
  0x2e   :  { %v125_v10 = vcombine.high %v117_v8, %v117_v8  ;;  %v142_v11 = vsel %vm140_vm0, %v117_v8, 0  ;;  %v126_v15 = vcombine.high %v124_v12, %v124_v12  ;;  %v148_v16 = vsel %vm140_vm0, %v124_v12, 0  ;;  %v3849_v38 = vld [vmem:[#allocation3 + $0x88] ss:$16 sps:$4 sm:$0xff]   ;;  %v3853_v39 = vld [vmem:[#allocation3 + $0xa0] ss:$16 sps:$4 sm:$0xff]  }
  0x2f   :  { %v3855_v40 = vld [vmem:[#allocation3 + $0xac] ss:$16 sps:$4 sm:$0xff]   ;;  %v3857_v41 = vld [vmem:[#allocation3 + $0xc4] ss:$16 sps:$4 sm:$0xff]   ;;  %v3861_v42 = vld [vmem:[#allocation3 + $0xa8] ss:$16 sps:$4 sm:$0xff]  }
  0x30   :  { %2835 = vmatprep.subr.msk.bf16.mxu0 %vm140_vm0, %v125_v10  ;;  %2840 = vmatprep.subr.msk.bf16.mxu1 %vm140_vm0, %v126_v15  ;;  %v3076_v43 = vld [vmem:[%s5477_s0 + $0x18] sm:$0xff]   ;;  %v3868_v44 = vld [vmem:[#allocation3 + $0xcc] ss:$16 sps:$4 sm:$0xff]   ;;  %v3878_v47 = vld [vmem:[#allocation3 + $0xc8] ss:$16 sps:$4 sm:$0xff]   ;;  %v5486_v54 = vsub.s32 2, %v3769_v4 }
  0x31   :  { %154 = vmatpush1.bf16.msra.mxu0 %v142_v11  ;;  %227 = vmatpush1.bf16.msra.mxu1 %v148_v16  ;;  %v3872_v45 = vld [vmem:[#allocation3 + $0xc0] ss:$16 sps:$4 sm:$0xff]   ;;  %v3875_v46 = vld [vmem:[#allocation3 + $0xe4] ss:$16 sps:$4 sm:$0xff]   ;;  %v3881_v48 = vld [vmem:[#allocation3 + $0xec] ss:$16 sps:$4 sm:$0xff]  }
  0x32   :  { %613 = vmatprep.subr.bf16.mxu0 %v3775_v13  ;;  %654 = vmatprep.subr.bf16.mxu1 %v3780_v17  ;;  %v3884_v49 = vld [vmem:[#allocation3 + $0xe0] ss:$16 sps:$4 sm:$0xff]   ;;  %v3890_v50 = vld [vmem:[#allocation3 + $0xe8] ss:$16 sps:$4 sm:$0xff]   ;;  %v3935_v51 = vld [vmem:[#allocation5 + $0x4] ss:$16 sps:$4 sm:$0xff]  }
  0x33   :  { %v3937_v52 = vld [vmem:[#allocation5 + $0xc] ss:$16 sps:$4 sm:$0xff]   ;;  %v67_v55 = vld [vmem:[%s5480_s3] sm:$0xf]  ;;  %v5488_v56 = vsub.s32 1, %v3769_v4  ;;  %v5487_v57 = vsub.s32 3, %v3769_v4 }
  0x34   :  { %2836 = vmatmul.mubr.msk.bf16.vlgmr.msra.gmra.mrb[0].mxu0 %vm127_vm1, %v3037_v14  ;;  %2841 = vmatmul.mubr.msk.bf16.vlgmr.msra.gmra.mrb[0].mxu1 %vm127_vm1, %v3037_v14  ;;  %v3952_v59 = vrot.slane %v67_v55, %v5489_v53  ;;  %v3958_v61 = vrot.slane %v67_v55, %v5486_v54 }
  0x35   :  { %614 = vmatpush1.bf16.msra.mxu0 %v3782_v18  ;;  %195 = vmatprep.mubr.bf16.mxu0 %v5490_v3  ;;  %v76_v62 = vrot.slane %v67_v55, %v5488_v56  ;;  %v3964_v1 = vrot.slane %v67_v55, %v5487_v57 }
  0x36   :  { %615 = vmatprep.subr.bf16.mxu0 %v3785_v19  ;;  %655 = vmatpush1.bf16.msra.mxu1 %v3787_v20 }
  0x37   :  { %268 = vmatprep.mubr.bf16.mxu1 %v5490_v3  ;;  %656 = vmatprep.subr.bf16.mxu1 %v3791_v21 }
  0x39   :  { %616 = vmatpush1.bf16.msra.mxu0 %v3794_v22 }
  0x3a   :  { %617 = vmatprep.subr.bf16.mxu0 %v3799_v23  ;;  %657 = vmatpush1.bf16.msra.mxu1 %v3802_v24 }
  0x3b   :  { %658 = vmatprep.subr.bf16.mxu1 %v3809_v26 }
  0x3c   :  { %2837 = vmatmul.mubr.msk.bf16.gmra.mrb[4].mxu0 %vm127_vm1, %v3050_v25  ;;  %2842 = vmatmul.mubr.msk.bf16.gmra.mrb[4].mxu1 %vm127_vm1, %v3050_v25 }
  0x3d   :  { %618 = vmatpush1.bf16.msra.mxu0 %v3812_v27  ;;  %205 = vmatprep.mubr.bf16.mxu0 %v5490_v3 }
  0x3e   :  { %619 = vmatprep.subr.bf16.mxu0 %v3815_v28  ;;  %659 = vmatpush1.bf16.msra.mxu1 %v3818_v29 }
  0x3f   :  { %278 = vmatprep.mubr.bf16.mxu1 %v5490_v3  ;;  %660 = vmatprep.subr.bf16.mxu1 %v3822_v30 }
  0x41   :  { %620 = vmatpush1.bf16.msra.mxu0 %v3825_v31 }
  0x42   :  { %621 = vmatprep.subr.bf16.mxu0 %v3830_v32  ;;  %661 = vmatpush1.bf16.msra.mxu1 %v3833_v33 }
  0x43   :  { %662 = vmatprep.subr.bf16.mxu1 %v3840_v35 }
  0x44   :  { %2838 = vmatmul.mubr.msk.bf16.gmra.mrb[8].mxu0 %vm127_vm1, %v3063_v34  ;;  %2843 = vmatmul.mubr.msk.bf16.gmra.mrb[8].mxu1 %vm127_vm1, %v3063_v34 }
  0x45   :  { %622 = vmatpush1.bf16.msra.mxu0 %v3843_v36  ;;  %215 = vmatprep.mubr.bf16.mxu0 %v5490_v3 }
  0x46   :  { %623 = vmatprep.subr.bf16.mxu0 %v3846_v37  ;;  %663 = vmatpush1.bf16.msra.mxu1 %v3849_v38 }
  0x47   :  { %288 = vmatprep.mubr.bf16.mxu1 %v5490_v3  ;;  %664 = vmatprep.subr.bf16.mxu1 %v3855_v40 }
  0x49   :  { %624 = vmatpush1.bf16.msra.mxu0 %v3853_v39 }
  0x4a   :  { %625 = vmatprep.subr.bf16.mxu0 %v3857_v41  ;;  %665 = vmatpush1.bf16.msra.mxu1 %v3861_v42 }
  0x4b   :  { %666 = vmatprep.subr.bf16.mxu1 %v3868_v44 }
  0x4c   :  { %2839 = vmatmul.mubr.msk.bf16.gmra.mrb[12].mxu0 %vm127_vm1, %v3076_v43  ;;  %2844 = vmatmul.mubr.msk.bf16.gmra.mrb[12].mxu1 %vm127_vm1, %v3076_v43 }
  0x4d   :  { %626 = vmatpush1.bf16.msra.mxu0 %v3872_v45  ;;  %645 = vmatprep.mubr.bf16.mxu0 %v5490_v3 }
  0x4e   :  { %627 = vmatprep.subr.bf16.mxu0 %v3875_v46  ;;  %667 = vmatpush1.bf16.msra.mxu1 %v3878_v47 }
  0x4f   :  { %686 = vmatprep.mubr.bf16.mxu1 %v5490_v3  ;;  %668 = vmatprep.subr.bf16.mxu1 %v3881_v48 }
  0x51   :  { %628 = vmatpush1.bf16.msra.mxu0 %v3884_v49 }
  0x52   :  { %729 = vmatprep.subr.bf16.mxu0 %v3775_v13  ;;  %669 = vmatpush1.bf16.msra.mxu1 %v3890_v50 }
  0x53   :  { %770 = vmatprep.subr.bf16.mxu1 %v3780_v17 }
  0x54   :  { %646 = vmatmul.mubr.bf16.vlgmr.msra.gmra.mrb[16].mxu0 %v5490_v3 }
  0x55   :  { %730 = vmatpush1.bf16.msra.mxu0 %v3782_v18  ;;  %761 = vmatprep.mubr.bf16.mxu0 %v5490_v3 }
  0x56   :  { %687 = vmatmul.mubr.bf16.vlgmr.msra.gmra.mrb[16].mxu1 %v5490_v3  ;;  %731 = vmatprep.subr.bf16.mxu0 %v3785_v19 }
  0x57   :  { %771 = vmatpush1.bf16.msra.mxu1 %v3787_v20  ;;  %802 = vmatprep.mubr.bf16.mxu1 %v5490_v3 }
  0x58   :  { %772 = vmatprep.subr.bf16.mxu1 %v3791_v21 }
  0x59   :  { %732 = vmatpush1.bf16.msra.mxu0 %v3794_v22 }
  0x5a   :  { %733 = vmatprep.subr.bf16.mxu0 %v3799_v23 }
  0x5b   :  { %773 = vmatpush1.bf16.msra.mxu1 %v3802_v24 }
  0x5c   :  { %774 = vmatprep.subr.bf16.mxu1 %v3809_v26 }
  0x5d   :  { %734 = vmatpush1.bf16.msra.mxu0 %v3812_v27 }
  0x5e   :  { %735 = vmatprep.subr.bf16.mxu0 %v3815_v28 }
  0x5f   :  { %775 = vmatpush1.bf16.msra.mxu1 %v3818_v29 }
  0x60   :  { %776 = vmatprep.subr.bf16.mxu1 %v3822_v30 }
  0x61   :  { %736 = vmatpush1.bf16.msra.mxu0 %v3825_v31 }
  0x62   :  { %737 = vmatprep.subr.bf16.mxu0 %v3830_v32 }
  0x63   :  { %777 = vmatpush1.bf16.msra.mxu1 %v3833_v33 }
  0x64   :  { %778 = vmatprep.subr.bf16.mxu1 %v3840_v35 }
  0x65   :  { %738 = vmatpush1.bf16.msra.mxu0 %v3843_v36 }
  0x66   :  { %739 = vmatprep.subr.bf16.mxu0 %v3846_v37 }
  0x67   :  { %779 = vmatpush1.bf16.msra.mxu1 %v3849_v38 }
  0x68   :  { %780 = vmatprep.subr.bf16.mxu1 %v3855_v40 }
  0x69   :  { %740 = vmatpush1.bf16.msra.mxu0 %v3853_v39 }
  0x6a   :  { %741 = vmatprep.subr.bf16.mxu0 %v3857_v41 }
  0x6b   :  { %781 = vmatpush1.bf16.msra.mxu1 %v3861_v42 }
  0x6c   :  { %782 = vmatprep.subr.bf16.mxu1 %v3868_v44 }
  0x6d   :  { %742 = vmatpush1.bf16.msra.mxu0 %v3872_v45 }
  0x6e   :  { %743 = vmatprep.subr.bf16.mxu0 %v3875_v46 }
  0x6f   :  { %783 = vmatpush1.bf16.msra.mxu1 %v3878_v47 }
  0x70   :  { %784 = vmatprep.subr.bf16.mxu1 %v3881_v48 }
  0x71   :  { %744 = vmatpush1.bf16.msra.mxu0 %v3884_v49 }
  0x72   :  { %1160 = vmatprep.subr.bf16.mxu0 %v3935_v51 }
  0x73   :  { %785 = vmatpush1.bf16.msra.mxu1 %v3890_v50 }
  0x74   :  { %1201 = vmatprep.subr.bf16.mxu1 %v3937_v52 }
 0x107   :  { %v3948_v58 = vpop.f32.mrb[0].mxu0  ;;  %v260_v0 = vpop.f32.mrb[0].mxu1 }
 0x108   :  { %v3954_v60 = vpop.f32.mrb[1].mxu0  ;;  %v262_v6 = vpop.f32.mrb[1].mxu1 }
 0x109   :  { %v191_v63 = vpop.f32.mrb[2].mxu0  ;;  %v264_v8 = vpop.f32.mrb[2].mxu1 }
 0x10a   :  { %v3967_v2 = vadd.f32 %v191_v63, %v3952_v59  ;;  %v193_v5 = vpop.f32.mrb[3].mxu0  ;;  %v3972_v9 = vadd.f32 %v264_v8, %v3958_v61  ;;  %v266_v10 = vpop.f32.mrb[3].mxu1 }
 0x10b   :  { %v3969_v7 = vadd.f32 %v193_v5, %v76_v62  ;;  %v3975_v11 = vadd.f32 %v266_v10, %v3964_v1 }
 0x10f   :  { %v197_v12 = vpop.f32.mrb[4].mxu0  ;;  %v270_v34 = vpop.f32.mrb[4].mxu1 }
 0x110   :  { %v3978_v14 = vadd.f32 %v197_v12, %v3952_v59  ;;  %v199_v15 = vpop.f32.mrb[5].mxu0  ;;  %v3986_v63 = vadd.f32 %v270_v34, %v3958_v61  ;;  %v272_v5 = vpop.f32.mrb[5].mxu1 }
 0x111   :  { %v3980_v16 = vadd.f32 %v199_v15, %v76_v62  ;;  %v201_v25 = vpop.f32.mrb[6].mxu0  ;;  %v3991_v10 = vadd.f32 %v272_v5, %v3964_v1  ;;  %v274_v12 = vpop.f32.mrb[6].mxu1 }
 0x112   :  { %5784 = vst [vmem:[#allocation9_spill] sm:$0xff] %v3978_v14  ;;  %v3983_v43 = vadd.f32 %v201_v25, %v3952_v59  ;;  %v203_v55 = vpop.f32.mrb[7].mxu0  ;;  %5787 = vst [vmem:[#allocation12_spill] sm:$0xff] %v3986_v63  ;;  %v3994_v54 = vadd.f32 %v274_v12, %v3958_v61  ;;  %v276_v15 = vpop.f32.mrb[7].mxu1 }
 0x113   :  { %5785 = vst [vmem:[#allocation10_spill] sm:$0xff] %v3980_v16  ;;  %v3988_v8 = vadd.f32 %v203_v55, %v76_v62  ;;  %5789 = vst [vmem:[#allocation14_spill] sm:$0xff] %v3991_v10  ;;  %v3997_v57 = vadd.f32 %v276_v15, %v3964_v1 }
 0x114   :  { %5786 = vst [vmem:[#allocation11_spill] sm:$0xff] %v3983_v43  ;;  %5790 = vst [vmem:[#allocation15_spill] sm:$0xff] %v3994_v54 }
 0x115   :  { %5788 = vst [vmem:[#allocation13_spill] sm:$0xff] %v3988_v8  ;;  %5791 = vst [vmem:[#allocation16_spill] sm:$0xff] %v3997_v57 }
 0x117   :  { %v207_v25 = vpop.f32.mrb[8].mxu0  ;;  %v280_v3 = vpop.f32.mrb[8].mxu1 }
 0x118   :  { %v4000_v56 = vadd.f32 %v207_v25, %v3952_v59  ;;  %v209_v34 = vpop.f32.mrb[9].mxu0  ;;  %v4008_v12 = vadd.f32 %v280_v3, %v3958_v61  ;;  %v282_v54 = vpop.f32.mrb[9].mxu1 }
 0x119   :  { %v4002_v53 = vadd.f32 %v209_v34, %v76_v62  ;;  %v211_v55 = vpop.f32.mrb[10].mxu0  ;;  %v4013_v15 = vadd.f32 %v282_v54, %v3964_v1  ;;  %v284_v25 = vpop.f32.mrb[10].mxu1 }
 0x11a   :  { %5792 = vst [vmem:[#allocation17_spill] sm:$0xff] %v4000_v56  ;;  %v4005_v5 = vadd.f32 %v211_v55, %v3952_v59  ;;  %v213_v8 = vpop.f32.mrb[11].mxu0  ;;  %5795 = vst [vmem:[#allocation20_spill] sm:$0xff] %v4008_v12  ;;  %v4016_v56 = vadd.f32 %v284_v25, %v3958_v61  ;;  %v286_v34 = vpop.f32.mrb[11].mxu1 }
 0x11b   :  { %5793 = vst [vmem:[#allocation18_spill] sm:$0xff] %v4002_v53  ;;  %v4010_v43 = vadd.f32 %v213_v8, %v76_v62  ;;  %5797 = vst [vmem:[#allocation22_spill] sm:$0xff] %v4013_v15  ;;  %v4019_v53 = vadd.f32 %v286_v34, %v3964_v1 }
 0x11c   :  { %5794 = vst [vmem:[#allocation19_spill] sm:$0xff] %v4005_v5  ;;  %5798 = vst [vmem:[#allocation23_spill] sm:$0xff] %v4016_v56 }
 0x11d   :  { %5796 = vst [vmem:[#allocation21_spill] sm:$0xff] %v4010_v43  ;;  %5799 = vst [vmem:[#allocation24_spill] sm:$0xff] %v4019_v53 }
 0x11f   :  { %v217_v55 = vpop.f32.mrb[12].mxu0  ;;  %v290_v43 = vpop.f32.mrb[12].mxu1 }
 0x120   :  { %v4022_v5 = vadd.f32 %v217_v55, %v3952_v59  ;;  %v219_v3 = vpop.f32.mrb[13].mxu0  ;;  %v4030_v25 = vadd.f32 %v290_v43, %v3958_v61  ;;  %v292_v56 = vpop.f32.mrb[13].mxu1  ;;  %v190_v43 = vadd.f32 %v3954_v60, %v76_v62 }
 0x121   :  { %v4024_v12 = vadd.f32 %v219_v3, %v76_v62  ;;  %v221_v8 = vpop.f32.mrb[14].mxu0  ;;  %v4035_v34 = vadd.f32 %v292_v56, %v3964_v1  ;;  %v294_v55 = vpop.f32.mrb[14].mxu1  ;;  %v263_v56 = vadd.f32 %v262_v6, %v3964_v1 }
 0x122   :  { %5800 = vst [vmem:[#allocation25_spill] sm:$0xff] %v4022_v5  ;;  %v4027_v54 = vadd.f32 %v221_v8, %v3952_v59  ;;  %v223_v15 = vpop.f32.mrb[15].mxu0  ;;  %5803 = vst [vmem:[#allocation28_spill] sm:$0xff] %v4030_v25  ;;  %v4038_v5 = vadd.f32 %v294_v55, %v3958_v61  ;;  %v296_v3 = vpop.f32.mrb[15].mxu1  ;;  %v188_v8 = vadd.f32 %v3948_v58, %v3952_v59 }
 0x123   :  { %5801 = vst [vmem:[#allocation26_spill] sm:$0xff] %v4024_v12  ;;  %v4032_v57 = vadd.f32 %v223_v15, %v76_v62  ;;  %5805 = vst [vmem:[#allocation30_spill] sm:$0xff] %v4035_v34  ;;  %v4041_v12 = vadd.f32 %v296_v3, %v3964_v1  ;;  %v261_v15 = vadd.f32 %v260_v0, %v3958_v61 }
 0x124   :  { %5802 = vst [vmem:[#allocation27_spill] sm:$0xff] %v4027_v54  ;;  %5806 = vst [vmem:[#allocation31_spill] sm:$0xff] %v4038_v5 }
 0x125   :  { %5804 = vst [vmem:[#allocation29_spill] sm:$0xff] %v4032_v57  ;;  %5807 = vst [vmem:[#allocation32_spill] sm:$0xff] %v4041_v12 }
 0x127   :  { %v647_v54 = vpop.f32.mrb[16].mxu0 }
 0x128   :  { %v695_v57 = vadd.f32 %v647_v54, %v188_v8  ;;  %v649_v25 = vpop.f32.mrb[17].mxu0 }
 0x129   :  { %v696_v34 = vadd.f32 %v649_v25, %v190_v43  ;;  %v651_v53 = vpop.f32.mrb[18].mxu0  ;;  %v688_v55 = vpop.f32.mrb[16].mxu1  ;;  %v4057_v43 = vld [vmem:[#allocation5 + $0x24] ss:$16 sps:$4 sm:$0xff]  }
 0x12a   :  { %v2877_v5 = vmul.f32 -1.442695, %v695_v57  ;;  %v697_v10 = vadd.f32 %v688_v55, %v261_v15  ;;  %v652_v16 = vpop.f32.mrb[19].mxu0  ;;  %v690_v3 = vpop.f32.mrb[17].mxu1  ;;  %v4059_v15 = vld [vmem:[#allocation5 + $0x2c] ss:$16 sps:$4 sm:$0xff]  }
 0x12b   :  { %v2878_v12 = vmul.f32 -1.442695, %v696_v34  ;;  %v698_v63 = vadd.f32 %v690_v3, %v263_v56  ;;  %v692_v14 = vpop.f32.mrb[18].mxu1  ;;  %v4051_v34 = vld [vmem:[#allocation5] ss:$16 sps:$4 sm:$0xff]  }
 0x12c   :  { %3193 = vpow2.f32 %v2877_v5  ;;  %v693_v58 = vpop.f32.mrb[19].mxu1  ;;  %v4065_v56 = vld [vmem:[#allocation5 + $0x20] ss:$16 sps:$4 sm:$0xff]   ;;  %v4067_v55 = vld [vmem:[#allocation5 + $0x28] ss:$16 sps:$4 sm:$0xff]  }
 0x12d   :  { %3195 = vpow2.f32 %v2878_v12  ;;  %v2879_v59 = vmul.f32 -1.442695, %v698_v63  ;;  %v4071_v3 = vld [vmem:[#allocation5 + $0x44] ss:$16 sps:$4 sm:$0xff]   ;;  %v4073_v58 = vld [vmem:[#allocation5 + $0x4c] ss:$16 sps:$4 sm:$0xff]  }
 0x12f   :  { %3197 = vpow2.f32 %v2879_v59  ;;  %v3695_v59 = vmov 0.0|0.0  }
 0x130   :  { %3199 = vtanh.f32 %v697_v10  ;;  %v4053_v10 = vld [vmem:[#allocation5 + $0x8] ss:$16 sps:$4 sm:$0xff]  }
 0x136   :  { %v3194_v60 = vpop.eup %3193 }
 0x137   :  { %v3196_v61 = vpop.eup %3195  ;;  %v702_v62 = vadd.f32 1.0, %v3194_v60  ;;  %v4077_v60 = vld [vmem:[#allocation5 + $0x40] ss:$16 sps:$4 sm:$0xff]  }
 0x138   :  { %v708_v0 = vadd.f32 1.0, %v3196_v61  ;;  %v4079_v61 = vld [vmem:[#allocation5 + $0x48] ss:$16 sps:$4 sm:$0xff]  }
 0x139   :  { %3201 = vrcp.f32 %v702_v62  ;;  %v3198_v53 = vpop.eup %3197  ;;  %v4083_v62 = vld [vmem:[#allocation5 + $0x64] ss:$16 sps:$4 sm:$0xff]  }
 0x13a   :  { %3203 = vrcp.f32 %v708_v0  ;;  %v3200_v57 = vpop.eup %3199  ;;  %v715_v54 = vadd.f32 1.0, %v3198_v53  ;;  %v4085_v0 = vld [vmem:[#allocation5 + $0x6c] ss:$16 sps:$4 sm:$0xff]   ;;  %v4089_v53 = vld [vmem:[#allocation5 + $0x60] ss:$16 sps:$4 sm:$0xff]  }
 0x13c   :  { %3205 = vrcp.f32 %v715_v54  ;;  %v4103_v54 = vld [vmem:[#allocation5 + $0x88] ss:$16 sps:$4 sm:$0xff]  }
 0x13d   :  { %5811 = vst [vmem:[#allocation36_spill] sm:$0xff] %v4103_v54 }
 0x143   :  { %v3202_v1 = vpop.eup %3201 }
 0x144   :  { %v3204_v6 = vpop.eup %3203  ;;  %v719_v16 = vmul.f32 %v3202_v1, %v3200_v57  ;;  %v4091_v57 = vld [vmem:[#allocation5 + $0x68] ss:$16 sps:$4 sm:$0xff]   ;;  %v4095_v1 = vld [vmem:[#allocation5 + $0x84] ss:$16 sps:$4 sm:$0xff]  }
 0x145   :  { %v718_v25 = vmul.f32 0.0, %v3204_v6  ;;  %5808 = vst [vmem:[#allocation33_spill] sm:$0xff] %v4095_v1  ;;  %v4097_v6 = vld [vmem:[#allocation5 + $0x8c] ss:$16 sps:$4 sm:$0xff]  }
 0x146   :  { %v3206_v63 = vpop.eup %3205  ;;  %5809 = vst [vmem:[#allocation34_spill] sm:$0xff] %v4097_v6 }
 0x147   :  { %v4048_v14 = vadd.f32 %v719_v16, %v718_v25  ;;  %v4101_v16 = vld [vmem:[#allocation5 + $0x80] ss:$16 sps:$4 sm:$0xff]   ;;  %v4107_v25 = vld [vmem:[#allocation5 + $0xa4] ss:$16 sps:$4 sm:$0xff]  }
 0x148   :  { %5810 = vst [vmem:[#allocation35_spill] sm:$0xff] %v4101_v16  ;;  %5812 = vst [vmem:[#allocation37_spill] sm:$0xff] %v4107_v25 }
 0x149   :  { %3207 = vtanh.f32 %v4048_v14 }
 0x153   :  { %v3208_v5 = vpop.eup %3207 }
 0x154   :  { %v722_v12 = vmul.f32 %v3208_v5, %v3206_v63  ;;  %v4109_v63 = vld [vmem:[#allocation5 + $0xac] ss:$16 sps:$4 sm:$0xff]   ;;  %v4113_v5 = vld [vmem:[#allocation5 + $0xa0] ss:$16 sps:$4 sm:$0xff]  }
 0x155   :  { %5813 = vst [vmem:[#allocation38_spill] sm:$0xff] %v4109_v63  ;;  %5814 = vst [vmem:[#allocation39_spill] sm:$0xff] %v4113_v5 }
 0x156   :  { %v4055_v8 = vpack.c.bf16 %v722_v12, %v722_v12  ;;  %v4115_v12 = vld [vmem:[#allocation5 + $0xa8] ss:$16 sps:$4 sm:$0xff]  }
 0x157   :  { %5815 = vst [vmem:[#allocation40_spill] sm:$0xff] %v4115_v12 }
 0x158   :  { %762 = vmatmul.mubr.bf16.vlgmr.msra.gmra.mrb[20].mxu0 %v4055_v8  ;;  %803 = vmatmul.mubr.bf16.vlgmr.msra.gmra.mrb[20].mxu1 %v4055_v8 }
 0x159   :  { %1161 = vmatpush1.bf16.msra.mxu0 %v4051_v34  ;;  %1202 = vmatpush1.bf16.msra.mxu1 %v4053_v10 }
 0x15a   :  { %1162 = vmatprep.subr.bf16.mxu0 %v4057_v43  ;;  %1203 = vmatprep.subr.bf16.mxu1 %v4059_v15 }
 0x15b   :  { %1192 = vmatprep.mubr.bf16.mxu0 %v3695_v59  ;;  %1233 = vmatprep.mubr.bf16.mxu1 %v3695_v59  ;;  %v4119_v59 = vld [vmem:[#allocation5 + $0xc4] ss:$16 sps:$4 sm:$0xff]  }
 0x15c   :  { %5816 = vst [vmem:[#allocation41_spill] sm:$0xff] %v4119_v59 }
 0x15d   :  { %1163 = vmatpush1.bf16.msra.mxu0 %v4065_v56  ;;  %1204 = vmatpush1.bf16.msra.mxu1 %v4067_v55 }
 0x15e   :  { %1164 = vmatprep.subr.bf16.mxu0 %v4071_v3  ;;  %1205 = vmatprep.subr.bf16.mxu1 %v4073_v58 }
 0x161   :  { %1165 = vmatpush1.bf16.msra.mxu0 %v4077_v60  ;;  %1206 = vmatpush1.bf16.msra.mxu1 %v4079_v61 }
 0x162   :  { %1166 = vmatprep.subr.bf16.mxu0 %v4083_v62  ;;  %1207 = vmatprep.subr.bf16.mxu1 %v4085_v0 }
 0x165   :  { %1167 = vmatpush1.bf16.msra.mxu0 %v4089_v53  ;;  %1208 = vmatpush1.bf16.msra.mxu1 %v4091_v57 }
 0x166   :  { %1168 = vmatprep.subr.bf16.mxu0 %v4095_v1  ;;  %1209 = vmatprep.subr.bf16.mxu1 %v4097_v6  ;;  %v4121_v1 = vld [vmem:[#allocation5 + $0xcc] ss:$16 sps:$4 sm:$0xff]   ;;  %v4125_v6 = vld [vmem:[#allocation5 + $0xc0] ss:$16 sps:$4 sm:$0xff]  }
 0x167   :  { %5817 = vst [vmem:[#allocation42_spill] sm:$0xff] %v4121_v1  ;;  %5818 = vst [vmem:[#allocation43_spill] sm:$0xff] %v4125_v6 }
 0x169   :  { %1169 = vmatpush1.bf16.msra.mxu0 %v4101_v16  ;;  %1210 = vmatpush1.bf16.msra.mxu1 %v4103_v54  ;;  %v4127_v16 = vld [vmem:[#allocation5 + $0xc8] ss:$16 sps:$4 sm:$0xff]   ;;  %v4131_v54 = vld [vmem:[#allocation5 + $0xe4] ss:$16 sps:$4 sm:$0xff]  }
 0x16a   :  { %1170 = vmatprep.subr.bf16.mxu0 %v4107_v25  ;;  %1211 = vmatprep.subr.bf16.mxu1 %v4109_v63  ;;  %5819 = vst [vmem:[#allocation44_spill] sm:$0xff] %v4127_v16  ;;  %5820 = vst [vmem:[#allocation45_spill] sm:$0xff] %v4131_v54  ;;  %v4133_v25 = vld [vmem:[#allocation5 + $0xec] ss:$16 sps:$4 sm:$0xff]   ;;  %v4137_v63 = vld [vmem:[#allocation5 + $0xe0] ss:$16 sps:$4 sm:$0xff]  }
 0x16b   :  { %5821 = vst [vmem:[#allocation46_spill] sm:$0xff] %v4133_v25  ;;  %5822 = vst [vmem:[#allocation47_spill] sm:$0xff] %v4137_v63 }
 0x16d   :  { %1171 = vmatpush1.bf16.msra.mxu0 %v4113_v5  ;;  %1212 = vmatpush1.bf16.msra.mxu1 %v4115_v12  ;;  %v4139_v5 = vld [vmem:[#allocation5 + $0xe8] ss:$16 sps:$4 sm:$0xff]   ;;  %v4143_v12 = vld [vmem:[#allocation5 + $0x104] ss:$16 sps:$4 sm:$0xff]  }
 0x16e   :  { %1172 = vmatprep.subr.bf16.mxu0 %v4119_v59  ;;  %1213 = vmatprep.subr.bf16.mxu1 %v4121_v1  ;;  %5823 = vst [vmem:[#allocation48_spill] sm:$0xff] %v4139_v5  ;;  %5824 = vst [vmem:[#allocation49_spill] sm:$0xff] %v4143_v12  ;;  %v4145_v59 = vld [vmem:[#allocation5 + $0x10c] ss:$16 sps:$4 sm:$0xff]   ;;  %v4149_v1 = vld [vmem:[#allocation5 + $0x100] ss:$16 sps:$4 sm:$0xff]  }
 0x16f   :  { %5825 = vst [vmem:[#allocation50_spill] sm:$0xff] %v4145_v59  ;;  %5826 = vst [vmem:[#allocation51_spill] sm:$0xff] %v4149_v1 }
 0x171   :  { %1173 = vmatpush1.bf16.msra.mxu0 %v4125_v6  ;;  %1214 = vmatpush1.bf16.msra.mxu1 %v4127_v16  ;;  %v4151_v6 = vld [vmem:[#allocation5 + $0x108] ss:$16 sps:$4 sm:$0xff]   ;;  %v4155_v16 = vld [vmem:[#allocation5 + $0x124] ss:$16 sps:$4 sm:$0xff]  }
 0x172   :  { %1174 = vmatprep.subr.bf16.mxu0 %v4131_v54  ;;  %1215 = vmatprep.subr.bf16.mxu1 %v4133_v25  ;;  %5827 = vst [vmem:[#allocation52_spill] sm:$0xff] %v4151_v6  ;;  %5828 = vst [vmem:[#allocation53_spill] sm:$0xff] %v4155_v16  ;;  %v4157_v54 = vld [vmem:[#allocation5 + $0x12c] ss:$16 sps:$4 sm:$0xff]   ;;  %v4161_v25 = vld [vmem:[#allocation5 + $0x120] ss:$16 sps:$4 sm:$0xff]  }
 0x173   :  { %5829 = vst [vmem:[#allocation54_spill] sm:$0xff] %v4157_v54  ;;  %5830 = vst [vmem:[#allocation55_spill] sm:$0xff] %v4161_v25 }
 0x175   :  { %1175 = vmatpush1.bf16.msra.mxu0 %v4137_v63  ;;  %1216 = vmatpush1.bf16.msra.mxu1 %v4139_v5  ;;  %v4163_v63 = vld [vmem:[#allocation5 + $0x128] ss:$16 sps:$4 sm:$0xff]   ;;  %v4167_v5 = vld [vmem:[#allocation5 + $0x144] ss:$16 sps:$4 sm:$0xff]  }
 0x176   :  { %1176 = vmatprep.subr.bf16.mxu0 %v4143_v12  ;;  %1217 = vmatprep.subr.bf16.mxu1 %v4145_v59  ;;  %5831 = vst [vmem:[#allocation56_spill] sm:$0xff] %v4163_v63  ;;  %5832 = vst [vmem:[#allocation57_spill] sm:$0xff] %v4167_v5  ;;  %v4169_v12 = vld [vmem:[#allocation5 + $0x14c] ss:$16 sps:$4 sm:$0xff]   ;;  %v4173_v59 = vld [vmem:[#allocation5 + $0x140] ss:$16 sps:$4 sm:$0xff]  }
 0x177   :  { %5833 = vst [vmem:[#allocation58_spill] sm:$0xff] %v4169_v12  ;;  %5834 = vst [vmem:[#allocation59_spill] sm:$0xff] %v4173_v59 }
 0x179   :  { %1177 = vmatpush1.bf16.msra.mxu0 %v4149_v1  ;;  %1218 = vmatpush1.bf16.msra.mxu1 %v4151_v6  ;;  %v4175_v1 = vld [vmem:[#allocation5 + $0x148] ss:$16 sps:$4 sm:$0xff]   ;;  %v4179_v6 = vld [vmem:[#allocation5 + $0x164] ss:$16 sps:$4 sm:$0xff]  }
 0x17a   :  { %1178 = vmatprep.subr.bf16.mxu0 %v4155_v16  ;;  %1219 = vmatprep.subr.bf16.mxu1 %v4157_v54  ;;  %5835 = vst [vmem:[#allocation60_spill] sm:$0xff] %v4175_v1  ;;  %5836 = vst [vmem:[#allocation61_spill] sm:$0xff] %v4179_v6  ;;  %v4181_v16 = vld [vmem:[#allocation5 + $0x16c] ss:$16 sps:$4 sm:$0xff]   ;;  %v4185_v54 = vld [vmem:[#allocation5 + $0x160] ss:$16 sps:$4 sm:$0xff]  }
 0x17b   :  { %5837 = vst [vmem:[#allocation62_spill] sm:$0xff] %v4181_v16  ;;  %5838 = vst [vmem:[#allocation63_spill] sm:$0xff] %v4185_v54 }
 0x17d   :  { %1179 = vmatpush1.bf16.msra.mxu0 %v4161_v25  ;;  %1220 = vmatpush1.bf16.msra.mxu1 %v4163_v63  ;;  %v4187_v25 = vld [vmem:[#allocation5 + $0x168] ss:$16 sps:$4 sm:$0xff]   ;;  %v4191_v63 = vld [vmem:[#allocation5 + $0x184] ss:$16 sps:$4 sm:$0xff]  }
 0x17e   :  { %1180 = vmatprep.subr.bf16.mxu0 %v4167_v5  ;;  %1221 = vmatprep.subr.bf16.mxu1 %v4169_v12  ;;  %5839 = vst [vmem:[#allocation64_spill] sm:$0xff] %v4187_v25  ;;  %5840 = vst [vmem:[#allocation65_spill] sm:$0xff] %v4191_v63  ;;  %v4193_v5 = vld [vmem:[#allocation5 + $0x18c] ss:$16 sps:$4 sm:$0xff]   ;;  %v4197_v12 = vld [vmem:[#allocation5 + $0x180] ss:$16 sps:$4 sm:$0xff]  }
 0x17f   :  { %5841 = vst [vmem:[#allocation66_spill] sm:$0xff] %v4193_v5  ;;  %5842 = vst [vmem:[#allocation67_spill] sm:$0xff] %v4197_v12 }
 0x181   :  { %1181 = vmatpush1.bf16.msra.mxu0 %v4173_v59  ;;  %1222 = vmatpush1.bf16.msra.mxu1 %v4175_v1  ;;  %v4199_v59 = vld [vmem:[#allocation5 + $0x188] ss:$16 sps:$4 sm:$0xff]   ;;  %v4203_v1 = vld [vmem:[#allocation5 + $0x1a4] ss:$16 sps:$4 sm:$0xff]  }
 0x182   :  { %1182 = vmatprep.subr.bf16.mxu0 %v4179_v6  ;;  %1223 = vmatprep.subr.bf16.mxu1 %v4181_v16  ;;  %5843 = vst [vmem:[#allocation68_spill] sm:$0xff] %v4199_v59  ;;  %5844 = vst [vmem:[#allocation69_spill] sm:$0xff] %v4203_v1  ;;  %v4205_v6 = vld [vmem:[#allocation5 + $0x1ac] ss:$16 sps:$4 sm:$0xff]   ;;  %v4209_v16 = vld [vmem:[#allocation5 + $0x1a0] ss:$16 sps:$4 sm:$0xff]  }
 0x183   :  { %5845 = vst [vmem:[#allocation70_spill] sm:$0xff] %v4205_v6  ;;  %5846 = vst [vmem:[#allocation71_spill] sm:$0xff] %v4209_v16 }
 0x185   :  { %1183 = vmatpush1.bf16.msra.mxu0 %v4185_v54  ;;  %1224 = vmatpush1.bf16.msra.mxu1 %v4187_v25  ;;  %v4211_v54 = vld [vmem:[#allocation5 + $0x1a8] ss:$16 sps:$4 sm:$0xff]   ;;  %v4215_v25 = vld [vmem:[#allocation5 + $0x1c4] ss:$16 sps:$4 sm:$0xff]  }
 0x186   :  { %1184 = vmatprep.subr.bf16.mxu0 %v4191_v63  ;;  %1225 = vmatprep.subr.bf16.mxu1 %v4193_v5  ;;  %5847 = vst [vmem:[#allocation72_spill] sm:$0xff] %v4211_v54  ;;  %5848 = vst [vmem:[#allocation73_spill] sm:$0xff] %v4215_v25  ;;  %v4217_v63 = vld [vmem:[#allocation5 + $0x1cc] ss:$16 sps:$4 sm:$0xff]   ;;  %v4221_v5 = vld [vmem:[#allocation5 + $0x1c0] ss:$16 sps:$4 sm:$0xff]  }
 0x187   :  { %5849 = vst [vmem:[#allocation74_spill] sm:$0xff] %v4217_v63  ;;  %5850 = vst [vmem:[#allocation75_spill] sm:$0xff] %v4221_v5 }
 0x189   :  { %1185 = vmatpush1.bf16.msra.mxu0 %v4197_v12  ;;  %1226 = vmatpush1.bf16.msra.mxu1 %v4199_v59  ;;  %v4223_v12 = vld [vmem:[#allocation5 + $0x1c8] ss:$16 sps:$4 sm:$0xff]   ;;  %v4227_v59 = vld [vmem:[#allocation5 + $0x1e4] ss:$16 sps:$4 sm:$0xff]  }
 0x18a   :  { %1186 = vmatprep.subr.bf16.mxu0 %v4203_v1  ;;  %1227 = vmatprep.subr.bf16.mxu1 %v4205_v6  ;;  %5851 = vst [vmem:[#allocation76_spill] sm:$0xff] %v4223_v12  ;;  %5852 = vst [vmem:[#allocation77_spill] sm:$0xff] %v4227_v59  ;;  %v4229_v1 = vld [vmem:[#allocation5 + $0x1ec] ss:$16 sps:$4 sm:$0xff]   ;;  %v4233_v6 = vld [vmem:[#allocation5 + $0x1e0] ss:$16 sps:$4 sm:$0xff]  }
 0x18b   :  { %5853 = vst [vmem:[#allocation78_spill] sm:$0xff] %v4229_v1  ;;  %5854 = vst [vmem:[#allocation79_spill] sm:$0xff] %v4233_v6 }
 0x18d   :  { %1187 = vmatpush1.bf16.msra.mxu0 %v4209_v16  ;;  %1228 = vmatpush1.bf16.msra.mxu1 %v4211_v54  ;;  %v4235_v16 = vld [vmem:[#allocation5 + $0x1e8] ss:$16 sps:$4 sm:$0xff]  }
 0x18e   :  { %1188 = vmatprep.subr.bf16.mxu0 %v4215_v25  ;;  %1229 = vmatprep.subr.bf16.mxu1 %v4217_v63  ;;  %5855 = vst [vmem:[#allocation80_spill] sm:$0xff] %v4235_v16 }
 0x191   :  { %1189 = vmatpush1.bf16.msra.mxu0 %v4221_v5  ;;  %1230 = vmatpush1.bf16.msra.mxu1 %v4223_v12 }
 0x192   :  { %1190 = vmatprep.subr.bf16.mxu0 %v4227_v59  ;;  %1231 = vmatprep.subr.bf16.mxu1 %v4229_v1  ;;  %v5856_v1 = vmov 0  }
 0x195   :  { %1191 = vmatpush1.bf16.msra.mxu0 %v4233_v6  ;;  %1232 = vmatpush1.bf16.msra.mxu1 %v4235_v16 }
 0x196   :  { %1272 = vmatprep.subr.bf16.mxu0 %v3775_v13  ;;  %1313 = vmatprep.subr.bf16.mxu1 %v3780_v17 }
 0x198   :  { %1193 = vmatmul.mubr.bf16.vlgmr.msra.gmra.mrb[24].mxu0 %v4055_v8  ;;  %1234 = vmatmul.mubr.bf16.vlgmr.msra.gmra.mrb[24].mxu1 %v4055_v8  ;;  %v5862_v8 = vld [vmem:[#allocation34_spill] sm:$0xff] }
 0x199   :  { %1273 = vmatpush1.bf16.msra.mxu0 %v3782_v18  ;;  %1314 = vmatpush1.bf16.msra.mxu1 %v3787_v20 }
 0x19a   :  { %1274 = vmatprep.subr.bf16.mxu0 %v3785_v19  ;;  %1315 = vmatprep.subr.bf16.mxu1 %v3791_v21 }
 0x19b   :  { %1304 = vmatprep.mubr.bf16.mxu0 %v5856_v1  ;;  %1345 = vmatprep.mubr.bf16.mxu1 %v5856_v1 }
 0x19d   :  { %1275 = vmatpush1.bf16.msra.mxu0 %v3794_v22  ;;  %1316 = vmatpush1.bf16.msra.mxu1 %v3802_v24 }
 0x19e   :  { %1276 = vmatprep.subr.bf16.mxu0 %v3799_v23  ;;  %1317 = vmatprep.subr.bf16.mxu1 %v3809_v26 }
 0x1a1   :  { %1277 = vmatpush1.bf16.msra.mxu0 %v3812_v27  ;;  %1318 = vmatpush1.bf16.msra.mxu1 %v3818_v29 }
 0x1a2   :  { %1278 = vmatprep.subr.bf16.mxu0 %v3815_v28  ;;  %1319 = vmatprep.subr.bf16.mxu1 %v3822_v30 }
 0x1a5   :  { %1279 = vmatpush1.bf16.msra.mxu0 %v3825_v31  ;;  %1320 = vmatpush1.bf16.msra.mxu1 %v3833_v33 }
 0x1a6   :  { %1280 = vmatprep.subr.bf16.mxu0 %v3830_v32  ;;  %1321 = vmatprep.subr.bf16.mxu1 %v3840_v35 }
 0x1a9   :  { %1281 = vmatpush1.bf16.msra.mxu0 %v3843_v36  ;;  %1322 = vmatpush1.bf16.msra.mxu1 %v3849_v38 }
 0x1aa   :  { %1282 = vmatprep.subr.bf16.mxu0 %v3846_v37  ;;  %1323 = vmatprep.subr.bf16.mxu1 %v3855_v40 }
 0x1ad   :  { %1283 = vmatpush1.bf16.msra.mxu0 %v3853_v39  ;;  %1324 = vmatpush1.bf16.msra.mxu1 %v3861_v42 }
 0x1ae   :  { %1284 = vmatprep.subr.bf16.mxu0 %v3857_v41  ;;  %1325 = vmatprep.subr.bf16.mxu1 %v3868_v44 }
 0x1b1   :  { %1285 = vmatpush1.bf16.msra.mxu0 %v3872_v45  ;;  %1326 = vmatpush1.bf16.msra.mxu1 %v3878_v47 }
 0x1b2   :  { %1286 = vmatprep.subr.bf16.mxu0 %v3875_v46  ;;  %1327 = vmatprep.subr.bf16.mxu1 %v3881_v48 }
 0x1b5   :  { %1287 = vmatpush1.bf16.msra.mxu0 %v3884_v49  ;;  %1328 = vmatpush1.bf16.msra.mxu1 %v3890_v50  ;;  %v427_v50 = vld [vmem:[%s5482_s5] sm:$0xf] }
 0x1b6   :  { %1383 = vmatprep.subr.bf16.mxu0 %v3935_v51  ;;  %1424 = vmatprep.subr.bf16.mxu1 %v3937_v52 }
 0x22b   :  { %v763_v13 = vpop.f32.mrb[20].mxu0  ;;  %v804_v17 = vpop.f32.mrb[20].mxu1 }
 0x22c   :  { %v811_v18 = vadd.f32 %v763_v13, %v3967_v2  ;;  %v813_v19 = vadd.f32 %v804_v17, %v3972_v9  ;;  %v765_v20 = vpop.f32.mrb[21].mxu0  ;;  %v806_v21 = vpop.f32.mrb[21].mxu1  ;;  %v5857_v2 = vsub.s32 0, %v3769_v4  ;;  %v5859_v9 = vsub.s32 1, %v3769_v4 }
 0x22d   :  { %v812_v22 = vadd.f32 %v765_v20, %v3969_v7  ;;  %v814_v23 = vadd.f32 %v806_v21, %v3975_v11  ;;  %v767_v24 = vpop.f32.mrb[22].mxu0  ;;  %v808_v26 = vpop.f32.mrb[22].mxu1 }
 0x22e   :  { %v2880_v27 = vmul.f32 -1.442695, %v811_v18  ;;  %v768_v28 = vpop.f32.mrb[23].mxu0  ;;  %v809_v29 = vpop.f32.mrb[23].mxu1  ;;  %v4308_v7 = vrot.slane %v427_v50, %v5857_v2  ;;  %v4314_v11 = vrot.slane %v427_v50, %v5859_v9  ;;  %v5863_v24 = vld [vmem:[#allocation35_spill] sm:$0xff]  ;;  %v5864_v26 = vld [vmem:[#allocation36_spill] sm:$0xff] }
 0x22f   :  { %v2881_v30 = vmul.f32 -1.442695, %v812_v22  ;;  %v2882_v31 = vmul.f32 -1.442695, %v814_v23 }
 0x230   :  { %3209 = vpow2.f32 %v2880_v27  ;;  %5858 = vst [vmem:[#allocation81_spill] sm:$0xff] %v4308_v7  ;;  %5860 = vst [vmem:[#allocation82_spill] sm:$0xff] %v4314_v11 }
 0x231   :  { %3211 = vpow2.f32 %v2881_v30  ;;  %v5865_v30 = vld [vmem:[#allocation37_spill] sm:$0xff] }
 0x232   :  { %3213 = vpow2.f32 %v2882_v31  ;;  %v5866_v31 = vld [vmem:[#allocation38_spill] sm:$0xff] }
 0x233   :  { %3215 = vtanh.f32 %v813_v19 }
 0x23a   :  { %v3210_v32 = vpop.eup %3209 }
 0x23b   :  { %v3212_v33 = vpop.eup %3211  ;;  %v818_v35 = vadd.f32 1.0, %v3210_v32 }
 0x23c   :  { %v824_v36 = vadd.f32 1.0, %v3212_v33  ;;  %v3214_v37 = vpop.eup %3213  ;;  %v5867_v33 = vsub.s32 3, %v3769_v4 }
 0x23d   :  { %3217 = vrcp.f32 %v818_v35  ;;  %v3216_v38 = vpop.eup %3215  ;;  %v831_v42 = vadd.f32 1.0, %v3214_v37  ;;  %v5870_v37 = vld [vmem:[#allocation40_spill] sm:$0xff] }
 0x23e   :  { %3219 = vrcp.f32 %v824_v36  ;;  %v4326_v35 = vrot.slane %v427_v50, %v5867_v33  ;;  %v5869_v36 = vld [vmem:[#allocation39_spill] sm:$0xff]  ;;  %v5889_v33 = vld [vmem:[#allocation57_spill] sm:$0xff] }
 0x23f   :  { %3221 = vrcp.f32 %v831_v42 }
 0x247   :  { %v3218_v39 = vpop.eup %3217 }
 0x248   :  { %v3220_v40 = vpop.eup %3219  ;;  %v835_v41 = vmul.f32 %v3218_v39, %v3216_v38  ;;  %v5871_v38 = vld [vmem:[#allocation41_spill] sm:$0xff]  ;;  %v5872_v39 = vld [vmem:[#allocation42_spill] sm:$0xff] }
 0x249   :  { %v834_v44 = vmul.f32 %v3220_v40, %v4048_v14  ;;  %v3222_v46 = vpop.eup %3221  ;;  %v5861_v14 = vld [vmem:[#allocation33_spill] sm:$0xff] }
 0x24a   :  { %5868 = vst [vmem:[#allocation33_spill] sm:$0xff] %v4326_v35 }
 0x24b   :  { %v4284_v45 = vadd.f32 %v835_v41, %v834_v44  ;;  %v5873_v41 = vsub.s32 2, %v3769_v4  ;;  %v5875_v44 = vld [vmem:[#allocation43_spill] sm:$0xff]  ;;  %v5882_v4 = vld [vmem:[#allocation50_spill] sm:$0xff] }
 0x24d   :  { %3223 = vtanh.f32 %v4284_v45  ;;  %v4335_v42 = vrot.slane %v427_v50, %v5873_v41 }
 0x24f   :  { %5874 = vst [vmem:[#allocation34_spill] sm:$0xff] %v4335_v42 }
 0x257   :  { %v3224_v47 = vpop.eup %3223 }
 0x258   :  { %v838_v48 = vmul.f32 %v3224_v47, %v3222_v46  ;;  %v5876_v46 = vld [vmem:[#allocation44_spill] sm:$0xff]  ;;  %v5877_v47 = vld [vmem:[#allocation45_spill] sm:$0xff] }
 0x25a   :  { %v4287_v49 = vpack.c.bf16 %v838_v48, %v838_v48  ;;  %v5878_v48 = vld [vmem:[#allocation46_spill] sm:$0xff] }
 0x25c   :  { %1305 = vmatmul.mubr.bf16.vlgmr.msra.gmra.mrb[28].mxu0 %v4287_v49  ;;  %1346 = vmatmul.mubr.bf16.vlgmr.msra.gmra.mrb[28].mxu1 %v4287_v49 }
 0x25d   :  { %1384 = vmatpush1.bf16.msra.mxu0 %v4051_v34  ;;  %1425 = vmatpush1.bf16.msra.mxu1 %v4053_v10 }
 0x25e   :  { %1385 = vmatprep.subr.bf16.mxu0 %v4057_v43  ;;  %1426 = vmatprep.subr.bf16.mxu1 %v4059_v15 }
 0x261   :  { %1386 = vmatpush1.bf16.msra.mxu0 %v4065_v56  ;;  %1427 = vmatpush1.bf16.msra.mxu1 %v4067_v55 }
 0x262   :  { %1387 = vmatprep.subr.bf16.mxu0 %v4071_v3  ;;  %1428 = vmatprep.subr.bf16.mxu1 %v4073_v58 }
 0x265   :  { %1388 = vmatpush1.bf16.msra.mxu0 %v4077_v60  ;;  %1429 = vmatpush1.bf16.msra.mxu1 %v4079_v61 }
 0x266   :  { %1389 = vmatprep.subr.bf16.mxu0 %v4083_v62  ;;  %1430 = vmatprep.subr.bf16.mxu1 %v4085_v0 }
 0x269   :  { %1390 = vmatpush1.bf16.msra.mxu0 %v4089_v53  ;;  %1431 = vmatpush1.bf16.msra.mxu1 %v4091_v57 }
 0x26a   :  { %1391 = vmatprep.subr.bf16.mxu0 %v5861_v14  ;;  %1432 = vmatprep.subr.bf16.mxu1 %v5862_v8 }
 0x26b   :  { %v1194_v13 = vpop.f32.mrb[24].mxu0  ;;  %v1235_v17 = vpop.f32.mrb[24].mxu1 }
 0x26c   :  { %v1195_v18 = vadd.f32 %v1194_v13, %v4308_v7  ;;  %v1196_v19 = vpop.f32.mrb[25].mxu0  ;;  %v1237_v20 = vpop.f32.mrb[25].mxu1  ;;  %v1236_v9 = vadd.f32 %v1235_v17, %v4335_v42  ;;  %v5879_v13 = vld [vmem:[#allocation47_spill] sm:$0xff]  ;;  %v5885_v17 = vld [vmem:[#allocation53_spill] sm:$0xff] }
 0x26d   :  { %v1197_v21 = vadd.f32 %v1196_v19, %v4314_v11  ;;  %v1198_v22 = vpop.f32.mrb[26].mxu0  ;;  %v1239_v23 = vpop.f32.mrb[26].mxu1  ;;  %1392 = vmatpush1.bf16.msra.mxu0 %v5863_v24  ;;  %1433 = vmatpush1.bf16.msra.mxu1 %v5864_v26  ;;  %v1238_v40 = vadd.f32 %v1237_v20, %v4326_v35  ;;  %v5881_v20 = vld [vmem:[#allocation49_spill] sm:$0xff] }
 0x26e   :  { %v2947_v27 = vmul.f32 -1.442695, %v1195_v18  ;;  %v1199_v28 = vpop.f32.mrb[27].mxu0  ;;  %v1240_v29 = vpop.f32.mrb[27].mxu1  ;;  %1393 = vmatprep.subr.bf16.mxu0 %v5865_v30  ;;  %1434 = vmatprep.subr.bf16.mxu1 %v5866_v31  ;;  %v5880_v18 = vld [vmem:[#allocation48_spill] sm:$0xff]  ;;  %v5883_v23 = vld [vmem:[#allocation51_spill] sm:$0xff] }
 0x26f   :  { %v2948_v32 = vmul.f32 -1.442695, %v1197_v21  ;;  %v2949_v2 = vmul.f32 -1.442695, %v1238_v40  ;;  %v5886_v28 = vld [vmem:[#allocation54_spill] sm:$0xff]  ;;  %v5887_v29 = vld [vmem:[#allocation55_spill] sm:$0xff] }
 0x270   :  { %3225 = vpow2.f32 %v2947_v27  ;;  %v5884_v27 = vld [vmem:[#allocation52_spill] sm:$0xff]  ;;  %v5890_v40 = vld [vmem:[#allocation58_spill] sm:$0xff] }
 0x271   :  { %3227 = vpow2.f32 %v2948_v32  ;;  %1394 = vmatpush1.bf16.msra.mxu0 %v5869_v36  ;;  %1435 = vmatpush1.bf16.msra.mxu1 %v5870_v37  ;;  %v5888_v32 = vld [vmem:[#allocation56_spill] sm:$0xff] }
 0x272   :  { %1395 = vmatprep.subr.bf16.mxu0 %v5871_v38  ;;  %1436 = vmatprep.subr.bf16.mxu1 %v5872_v39  ;;  %3229 = vpow2.f32 %v2949_v2  ;;  %v5891_v2 = vld [vmem:[#allocation59_spill] sm:$0xff] }
 0x273   :  { %3231 = vtanh.f32 %v1236_v9  ;;  %v5892_v9 = vld [vmem:[#allocation60_spill] sm:$0xff] }
 0x275   :  { %1396 = vmatpush1.bf16.msra.mxu0 %v5875_v44  ;;  %1437 = vmatpush1.bf16.msra.mxu1 %v5876_v46 }
 0x276   :  { %1397 = vmatprep.subr.bf16.mxu0 %v5877_v47  ;;  %1438 = vmatprep.subr.bf16.mxu1 %v5878_v48 }
 0x279   :  { %1398 = vmatpush1.bf16.msra.mxu0 %v5879_v13  ;;  %1439 = vmatpush1.bf16.msra.mxu1 %v5880_v18 }
 0x27a   :  { %v3226_v19 = vpop.eup %3225  ;;  %1399 = vmatprep.subr.bf16.mxu0 %v5881_v20  ;;  %1440 = vmatprep.subr.bf16.mxu1 %v5882_v4 }
 0x27b   :  { %v3228_v50 = vpop.eup %3227  ;;  %v1245_v21 = vadd.f32 1.0, %v3226_v19 }
 0x27c   :  { %v1251_v22 = vadd.f32 1.0, %v3228_v50  ;;  %v3230_v41 = vpop.eup %3229  ;;  %v5893_v50 = vld [vmem:[#allocation61_spill] sm:$0xff] }
 0x27d   :  { %3233 = vrcp.f32 %v1245_v21  ;;  %1400 = vmatpush1.bf16.msra.mxu0 %v5883_v23  ;;  %1441 = vmatpush1.bf16.msra.mxu1 %v5884_v27  ;;  %v3232_v19 = vpop.eup %3231  ;;  %v5894_v21 = vld [vmem:[#allocation62_spill] sm:$0xff] }
 0x27e   :  { %3235 = vrcp.f32 %v1251_v22  ;;  %1401 = vmatprep.subr.bf16.mxu0 %v5885_v17  ;;  %1442 = vmatprep.subr.bf16.mxu1 %v5886_v28  ;;  %v5898_v23 = vld [vmem:[#allocation66_spill] sm:$0xff] }
 0x281   :  { %1402 = vmatpush1.bf16.msra.mxu0 %v5887_v29  ;;  %1443 = vmatpush1.bf16.msra.mxu1 %v5888_v32  ;;  %v1258_v29 = vadd.f32 1.0, %v3230_v41  ;;  %v5895_v32 = vld [vmem:[#allocation63_spill] sm:$0xff] }
 0x282   :  { %1403 = vmatprep.subr.bf16.mxu0 %v5889_v33  ;;  %1444 = vmatprep.subr.bf16.mxu1 %v5890_v40  ;;  %v5896_v33 = vld [vmem:[#allocation64_spill] sm:$0xff]  ;;  %v5897_v40 = vld [vmem:[#allocation65_spill] sm:$0xff]  ;;  %v5903_v41 = vld [vmem:[#allocation71_spill] sm:$0xff] }
 0x283   :  { %3237 = vrcp.f32 %v1258_v29 }
 0x285   :  { %1404 = vmatpush1.bf16.msra.mxu0 %v5891_v2  ;;  %1445 = vmatpush1.bf16.msra.mxu1 %v5892_v9 }
 0x286   :  { %1405 = vmatprep.subr.bf16.mxu0 %v5893_v50  ;;  %1446 = vmatprep.subr.bf16.mxu1 %v5894_v21  ;;  %v5899_v50 = vld [vmem:[#allocation67_spill] sm:$0xff]  ;;  %v5900_v21 = vld [vmem:[#allocation68_spill] sm:$0xff] }
 0x287   :  { %v3234_v22 = vpop.eup %3233 }
 0x288   :  { %v3236_v28 = vpop.eup %3235  ;;  %v1262_v17 = vmul.f32 %v3234_v22, %v3232_v19  ;;  %v5901_v19 = vld [vmem:[#allocation69_spill] sm:$0xff] }
 0x289   :  { %v1261_v27 = vmul.f32 0.0, %v3236_v28  ;;  %1406 = vmatpush1.bf16.msra.mxu0 %v5895_v32  ;;  %1447 = vmatpush1.bf16.msra.mxu1 %v5896_v33  ;;  %v5902_v28 = vld [vmem:[#allocation70_spill] sm:$0xff] }
 0x28a   :  { %1407 = vmatprep.subr.bf16.mxu0 %v5897_v40  ;;  %1448 = vmatprep.subr.bf16.mxu1 %v5898_v23 }
 0x28b   :  { %v4362_v2 = vadd.f32 %v1262_v17, %v1261_v27  ;;  %v5904_v17 = vld [vmem:[#allocation78_spill] sm:$0xff] }
 0x28d   :  { %3239 = vtanh.f32 %v4362_v2  ;;  %1408 = vmatpush1.bf16.msra.mxu0 %v5899_v50  ;;  %1449 = vmatpush1.bf16.msra.mxu1 %v5900_v21  ;;  %v3238_v27 = vpop.eup %3237 }
 0x28e   :  { %1409 = vmatprep.subr.bf16.mxu0 %v5901_v19  ;;  %1450 = vmatprep.subr.bf16.mxu1 %v5902_v28 }
 0x291   :  { %1410 = vmatpush1.bf16.msra.mxu0 %v5903_v41  ;;  %1451 = vmatpush1.bf16.msra.mxu1 %v4211_v54  ;;  %v4379_v41 = vld [vmem:[#allocation3 + $0x4] ss:$16 sps:$4 sm:$0xff]  }
 0x292   :  { %1411 = vmatprep.subr.bf16.mxu0 %v4215_v25  ;;  %1452 = vmatprep.subr.bf16.mxu1 %v4217_v63  ;;  %5905 = vst [vmem:[#allocation35_spill] sm:$0xff] %v4379_v41  ;;  %v4382_v63 = vld [vmem:[#allocation3 + $0xc] ss:$16 sps:$4 sm:$0xff]  }
 0x293   :  { %5906 = vst [vmem:[#allocation36_spill] sm:$0xff] %v4382_v63 }
 0x295   :  { %1412 = vmatpush1.bf16.msra.mxu0 %v4221_v5  ;;  %1453 = vmatpush1.bf16.msra.mxu1 %v4223_v12  ;;  %v5940_v12 = vld [vmem:[#allocation14_spill] sm:$0xff] }
 0x296   :  { %1413 = vmatprep.subr.bf16.mxu0 %v4227_v59  ;;  %1454 = vmatprep.subr.bf16.mxu1 %v5904_v17  ;;  %v5939_v17 = vld [vmem:[#allocation10_spill] sm:$0xff] }
 0x297   :  { %v3240_v29 = vpop.eup %3239 }
 0x298   :  { %v1265_v22 = vmul.f32 %v3240_v29, %v3238_v27  ;;  %v4387_v27 = vld [vmem:[#allocation3] ss:$16 sps:$4 sm:$0xff]   ;;  %v4390_v29 = vld [vmem:[#allocation3 + $0x8] ss:$16 sps:$4 sm:$0xff]  }
 0x299   :  { %1414 = vmatpush1.bf16.msra.mxu0 %v4233_v6  ;;  %1455 = vmatpush1.bf16.msra.mxu1 %v4235_v16  ;;  %5907 = vst [vmem:[#allocation37_spill] sm:$0xff] %v4387_v27  ;;  %5908 = vst [vmem:[#allocation38_spill] sm:$0xff] %v4390_v29 }
 0x29a   :  { %v1382_v54 = vpack.c.bf16 %v1265_v22, %v1265_v22  ;;  %1495 = vmatprep.subr.bf16.mxu0 %v4379_v41  ;;  %1536 = vmatprep.subr.bf16.mxu1 %v4382_v63  ;;  %v4393_v22 = vld [vmem:[#allocation3 + $0x24] ss:$16 sps:$4 sm:$0xff]   ;;  %v4396_v41 = vld [vmem:[#allocation3 + $0x2c] ss:$16 sps:$4 sm:$0xff]  }
 0x29b   :  { %5909 = vst [vmem:[#allocation39_spill] sm:$0xff] %v4393_v22  ;;  %5910 = vst [vmem:[#allocation40_spill] sm:$0xff] %v4396_v41  ;;  %v5938_v63 = vld [vmem:[#allocation12_spill] sm:$0xff] }
 0x29c   :  { %1415 = vmatprep.mubr.bf16.mxu0 %v1382_v54  ;;  %1456 = vmatprep.mubr.bf16.mxu1 %v1382_v54  ;;  %v4401_v54 = vld [vmem:[#allocation3 + $0x20] ss:$16 sps:$4 sm:$0xff]  }
 0x29d   :  { %1416 = vmatmul.mubr.bf16.vlgmr.msra.gmra.mrb[32].mxu0 %v4287_v49  ;;  %1457 = vmatmul.mubr.bf16.vlgmr.msra.gmra.mrb[32].mxu1 %v4287_v49  ;;  %5911 = vst [vmem:[#allocation41_spill] sm:$0xff] %v4401_v54  ;;  %v4404_v49 = vld [vmem:[#allocation3 + $0x28] ss:$16 sps:$4 sm:$0xff]  }
 0x29e   :  { %1496 = vmatpush1.bf16.msra.mxu0 %v4387_v27  ;;  %1537 = vmatpush1.bf16.msra.mxu1 %v4390_v29  ;;  %5912 = vst [vmem:[#allocation42_spill] sm:$0xff] %v4404_v49  ;;  %v4407_v29 = vld [vmem:[#allocation3 + $0x44] ss:$16 sps:$4 sm:$0xff]  }
 0x29f   :  { %1497 = vmatprep.subr.bf16.mxu0 %v4393_v22  ;;  %1538 = vmatprep.subr.bf16.mxu1 %v4396_v41  ;;  %5913 = vst [vmem:[#allocation43_spill] sm:$0xff] %v4407_v29  ;;  %v4410_v22 = vld [vmem:[#allocation3 + $0x4c] ss:$16 sps:$4 sm:$0xff]   ;;  %v4413_v41 = vld [vmem:[#allocation3 + $0x40] ss:$16 sps:$4 sm:$0xff]  }
 0x2a0   :  { %1527 = vmatprep.mubr.bf16.mxu0 %v5856_v1  ;;  %1568 = vmatprep.mubr.bf16.mxu1 %v5856_v1  ;;  %5914 = vst [vmem:[#allocation44_spill] sm:$0xff] %v4410_v22  ;;  %5915 = vst [vmem:[#allocation45_spill] sm:$0xff] %v4413_v41  ;;  %v4416_v1 = vld [vmem:[#allocation3 + $0x48] ss:$16 sps:$4 sm:$0xff]   ;;  %v5937_v27 = vld [vmem:[#allocation9_spill] sm:$0xff] }
 0x2a1   :  { %5916 = vst [vmem:[#allocation46_spill] sm:$0xff] %v4416_v1 }
 0x2a2   :  { %1498 = vmatpush1.bf16.msra.mxu0 %v4401_v54  ;;  %1539 = vmatpush1.bf16.msra.mxu1 %v4404_v49  ;;  %v4419_v54 = vld [vmem:[#allocation3 + $0x64] ss:$16 sps:$4 sm:$0xff]   ;;  %v4422_v49 = vld [vmem:[#allocation3 + $0x6c] ss:$16 sps:$4 sm:$0xff]  }
 0x2a3   :  { %1499 = vmatprep.subr.bf16.mxu0 %v4407_v29  ;;  %1540 = vmatprep.subr.bf16.mxu1 %v4410_v22  ;;  %5917 = vst [vmem:[#allocation47_spill] sm:$0xff] %v4419_v54  ;;  %5918 = vst [vmem:[#allocation48_spill] sm:$0xff] %v4422_v49  ;;  %v4425_v29 = vld [vmem:[#allocation3 + $0x60] ss:$16 sps:$4 sm:$0xff]   ;;  %v4428_v22 = vld [vmem:[#allocation3 + $0x68] ss:$16 sps:$4 sm:$0xff]  }
 0x2a4   :  { %5919 = vst [vmem:[#allocation49_spill] sm:$0xff] %v4425_v29  ;;  %5920 = vst [vmem:[#allocation50_spill] sm:$0xff] %v4428_v22 }
 0x2a6   :  { %1500 = vmatpush1.bf16.msra.mxu0 %v4413_v41  ;;  %1541 = vmatpush1.bf16.msra.mxu1 %v4416_v1  ;;  %v4431_v41 = vld [vmem:[#allocation3 + $0x84] ss:$16 sps:$4 sm:$0xff]   ;;  %v4434_v1 = vld [vmem:[#allocation3 + $0x8c] ss:$16 sps:$4 sm:$0xff]  }
 0x2a7   :  { %1501 = vmatprep.subr.bf16.mxu0 %v4419_v54  ;;  %1542 = vmatprep.subr.bf16.mxu1 %v4422_v49  ;;  %5921 = vst [vmem:[#allocation60_spill] sm:$0xff] %v4431_v41  ;;  %5922 = vst [vmem:[#allocation63_spill] sm:$0xff] %v4434_v1  ;;  %v4437_v54 = vld [vmem:[#allocation3 + $0x80] ss:$16 sps:$4 sm:$0xff]   ;;  %v4440_v49 = vld [vmem:[#allocation3 + $0x88] ss:$16 sps:$4 sm:$0xff]  }
 0x2a8   :  { %5923 = vst [vmem:[#allocation64_spill] sm:$0xff] %v4437_v54  ;;  %5924 = vst [vmem:[#allocation65_spill] sm:$0xff] %v4440_v49 }
 0x2aa   :  { %1502 = vmatpush1.bf16.msra.mxu0 %v4425_v29  ;;  %1543 = vmatpush1.bf16.msra.mxu1 %v4428_v22  ;;  %v4443_v29 = vld [vmem:[#allocation3 + $0xa4] ss:$16 sps:$4 sm:$0xff]   ;;  %v4446_v22 = vld [vmem:[#allocation3 + $0xac] ss:$16 sps:$4 sm:$0xff]  }
 0x2ab   :  { %1503 = vmatprep.subr.bf16.mxu0 %v4431_v41  ;;  %1544 = vmatprep.subr.bf16.mxu1 %v4434_v1  ;;  %5925 = vst [vmem:[#allocation66_spill] sm:$0xff] %v4443_v29  ;;  %5926 = vst [vmem:[#allocation83_spill] sm:$0xff] %v4446_v22  ;;  %v4449_v41 = vld [vmem:[#allocation3 + $0xa0] ss:$16 sps:$4 sm:$0xff]   ;;  %v4452_v1 = vld [vmem:[#allocation3 + $0xa8] ss:$16 sps:$4 sm:$0xff]  }
 0x2ac   :  { %5927 = vst [vmem:[#allocation84_spill] sm:$0xff] %v4449_v41  ;;  %5928 = vst [vmem:[#allocation85_spill] sm:$0xff] %v4452_v1 }
 0x2ae   :  { %1504 = vmatpush1.bf16.msra.mxu0 %v4437_v54  ;;  %1545 = vmatpush1.bf16.msra.mxu1 %v4440_v49  ;;  %v4455_v54 = vld [vmem:[#allocation3 + $0xc4] ss:$16 sps:$4 sm:$0xff]   ;;  %v4458_v49 = vld [vmem:[#allocation3 + $0xcc] ss:$16 sps:$4 sm:$0xff]  }
 0x2af   :  { %1505 = vmatprep.subr.bf16.mxu0 %v4443_v29  ;;  %1546 = vmatprep.subr.bf16.mxu1 %v4446_v22  ;;  %5929 = vst [vmem:[#allocation86_spill] sm:$0xff] %v4455_v54  ;;  %5930 = vst [vmem:[#allocation87_spill] sm:$0xff] %v4458_v49  ;;  %v4461_v29 = vld [vmem:[#allocation3 + $0xc0] ss:$16 sps:$4 sm:$0xff]   ;;  %v4464_v22 = vld [vmem:[#allocation3 + $0xc8] ss:$16 sps:$4 sm:$0xff]  }
 0x2b0   :  { %5931 = vst [vmem:[#allocation88_spill] sm:$0xff] %v4461_v29  ;;  %5932 = vst [vmem:[#allocation89_spill] sm:$0xff] %v4464_v22 }
 0x2b2   :  { %1506 = vmatpush1.bf16.msra.mxu0 %v4449_v41  ;;  %1547 = vmatpush1.bf16.msra.mxu1 %v4452_v1  ;;  %v4467_v41 = vld [vmem:[#allocation3 + $0xe4] ss:$16 sps:$4 sm:$0xff]   ;;  %v4470_v1 = vld [vmem:[#allocation3 + $0xec] ss:$16 sps:$4 sm:$0xff]  }
 0x2b3   :  { %1507 = vmatprep.subr.bf16.mxu0 %v4455_v54  ;;  %1548 = vmatprep.subr.bf16.mxu1 %v4458_v49  ;;  %5933 = vst [vmem:[#allocation90_spill] sm:$0xff] %v4467_v41  ;;  %5934 = vst [vmem:[#allocation91_spill] sm:$0xff] %v4470_v1  ;;  %v4473_v54 = vld [vmem:[#allocation3 + $0xe0] ss:$16 sps:$4 sm:$0xff]   ;;  %v4476_v49 = vld [vmem:[#allocation3 + $0xe8] ss:$16 sps:$4 sm:$0xff]  }
 0x2b4   :  { %5935 = vst [vmem:[#allocation92_spill] sm:$0xff] %v4473_v54  ;;  %5936 = vst [vmem:[#allocation93_spill] sm:$0xff] %v4476_v49 }
 0x2b6   :  { %1508 = vmatpush1.bf16.msra.mxu0 %v4461_v29  ;;  %1549 = vmatpush1.bf16.msra.mxu1 %v4464_v22 }
 0x2b7   :  { %1509 = vmatprep.subr.bf16.mxu0 %v4467_v41  ;;  %1550 = vmatprep.subr.bf16.mxu1 %v4470_v1 }
 0x2ba   :  { %1510 = vmatpush1.bf16.msra.mxu0 %v4473_v54  ;;  %1551 = vmatpush1.bf16.msra.mxu1 %v4476_v49 }
 0x2bb   :  { %1606 = vmatprep.subr.bf16.mxu0 %v3935_v51  ;;  %1647 = vmatprep.subr.bf16.mxu1 %v3937_v52 }
 0x32f   :  { %v1306_v22 = vpop.f32.mrb[28].mxu0  ;;  %v1347_v29 = vpop.f32.mrb[28].mxu1 }
 0x330   :  { %v1354_v41 = vadd.f32 %v1306_v22, %v5937_v27  ;;  %v1356_v16 = vadd.f32 %v1347_v29, %v5938_v63  ;;  %v1308_v6 = vpop.f32.mrb[29].mxu0  ;;  %v1349_v1 = vpop.f32.mrb[29].mxu1 }
 0x331   :  { %v1355_v59 = vadd.f32 %v1308_v6, %v5939_v17  ;;  %v1357_v54 = vadd.f32 %v1349_v1, %v5940_v12  ;;  %v1310_v5 = vpop.f32.mrb[30].mxu0  ;;  %v1351_v25 = vpop.f32.mrb[30].mxu1 }
 0x332   :  { %v2950_v28 = vmul.f32 -1.442695, %v1354_v41  ;;  %v1311_v49 = vpop.f32.mrb[31].mxu0  ;;  %v1352_v19 = vpop.f32.mrb[31].mxu1 }
 0x333   :  { %v2951_v51 = vmul.f32 -1.442695, %v1355_v59  ;;  %v2952_v52 = vmul.f32 -1.442695, %v1357_v54  ;;  %v5952_v49 = vld [vmem:[#allocation67_spill] sm:$0xff] }
 0x334   :  { %3241 = vpow2.f32 %v2950_v28 }
 0x335   :  { %3243 = vpow2.f32 %v2951_v51  ;;  %v5953_v51 = vld [vmem:[#allocation68_spill] sm:$0xff] }
 0x336   :  { %3245 = vpow2.f32 %v2952_v52  ;;  %v5954_v52 = vld [vmem:[#allocation69_spill] sm:$0xff] }
 0x337   :  { %3247 = vtanh.f32 %v1356_v16 }
 0x33e   :  { %v3242_v21 = vpop.eup %3241 }
 0x33f   :  { %v3244_v50 = vpop.eup %3243  ;;  %v1361_v27 = vadd.f32 1.0, %v3242_v21 }
 0x340   :  { %v1367_v63 = vadd.f32 1.0, %v3244_v50  ;;  %v3246_v6 = vpop.eup %3245 }
 0x341   :  { %3249 = vrcp.f32 %v1361_v27  ;;  %v3248_v17 = vpop.eup %3247  ;;  %v1374_v12 = vadd.f32 1.0, %v3246_v6  ;;  %v5955_v27 = vld [vmem:[#allocation70_spill] sm:$0xff]  ;;  %v5962_v6 = vld [vmem:[#allocation77_spill] sm:$0xff] }
 0x342   :  { %3251 = vrcp.f32 %v1367_v63  ;;  %v5961_v63 = vld [vmem:[#allocation76_spill] sm:$0xff] }
 0x343   :  { %3253 = vrcp.f32 %v1374_v12  ;;  %v5965_v12 = vld [vmem:[#allocation80_spill] sm:$0xff] }
 0x34b   :  { %v3250_v1 = vpop.eup %3249 }
 0x34c   :  { %v3252_v5 = vpop.eup %3251  ;;  %v1378_v25 = vmul.f32 %v3250_v1, %v3248_v17  ;;  %v5963_v17 = vld [vmem:[#allocation78_spill] sm:$0xff] }
 0x34d   :  { %v1377_v19 = vmul.f32 %v3252_v5, %v4284_v45  ;;  %v3254_v28 = vpop.eup %3253 }
 0x34f   :  { %v4486_v59 = vadd.f32 %v1378_v25, %v1377_v19  ;;  %v5964_v25 = vld [vmem:[#allocation79_spill] sm:$0xff] }
 0x351   :  { %3255 = vtanh.f32 %v4486_v59 }
 0x35b   :  { %v3256_v21 = vpop.eup %3255 }
 0x35c   :  { %v1381_v41 = vmul.f32 %v3256_v21, %v3254_v28  ;;  %v5966_v28 = vld [vmem:[#allocation35_spill] sm:$0xff]  ;;  %v5967_v21 = vld [vmem:[#allocation36_spill] sm:$0xff] }
 0x35e   :  { %v4489_v16 = vpack.c.bf16 %v1381_v41, %v1381_v41 }
 0x360   :  { %1528 = vmatmul.mubr.bf16.vlgmr.msra.gmra.mrb[36].mxu0 %v4489_v16  ;;  %1569 = vmatmul.mubr.bf16.vlgmr.msra.gmra.mrb[36].mxu1 %v4489_v16 }
 0x361   :  { %1607 = vmatpush1.bf16.msra.mxu0 %v4051_v34  ;;  %1648 = vmatpush1.bf16.msra.mxu1 %v4053_v10 }
 0x362   :  { %1608 = vmatprep.subr.bf16.mxu0 %v4057_v43  ;;  %1649 = vmatprep.subr.bf16.mxu1 %v4059_v15 }
 0x365   :  { %1609 = vmatpush1.bf16.msra.mxu0 %v4065_v56  ;;  %1650 = vmatpush1.bf16.msra.mxu1 %v4067_v55 }
 0x366   :  { %1610 = vmatprep.subr.bf16.mxu0 %v4071_v3  ;;  %1651 = vmatprep.subr.bf16.mxu1 %v4073_v58 }
 0x369   :  { %1611 = vmatpush1.bf16.msra.mxu0 %v4077_v60  ;;  %1652 = vmatpush1.bf16.msra.mxu1 %v4079_v61 }
 0x36a   :  { %1612 = vmatprep.subr.bf16.mxu0 %v4083_v62  ;;  %1653 = vmatprep.subr.bf16.mxu1 %v4085_v0 }
 0x36d   :  { %1613 = vmatpush1.bf16.msra.mxu0 %v4089_v53  ;;  %1654 = vmatpush1.bf16.msra.mxu1 %v4091_v57 }
 0x36e   :  { %1614 = vmatprep.subr.bf16.mxu0 %v5861_v14  ;;  %1655 = vmatprep.subr.bf16.mxu1 %v5862_v8 }
 0x370   :  { %v1417_v34 = vpop.f32.mrb[32].mxu0  ;;  %v1458_v10 = vpop.f32.mrb[32].mxu1 }
 0x371   :  { %v1418_v43 = vadd.f32 %v1417_v34, %v4308_v7  ;;  %v1419_v15 = vpop.f32.mrb[33].mxu0  ;;  %v1460_v56 = vpop.f32.mrb[33].mxu1  ;;  %1615 = vmatpush1.bf16.msra.mxu0 %v5863_v24  ;;  %1656 = vmatpush1.bf16.msra.mxu1 %v5864_v26  ;;  %v1459_v45 = vadd.f32 %v1458_v10, %v4335_v42  ;;  %v5968_v34 = vld [vmem:[#allocation37_spill] sm:$0xff]  ;;  %v5969_v10 = vld [vmem:[#allocation38_spill] sm:$0xff] }
 0x372   :  { %v1420_v55 = vadd.f32 %v1419_v15, %v4314_v11  ;;  %v1421_v3 = vpop.f32.mrb[34].mxu0  ;;  %v1462_v58 = vpop.f32.mrb[34].mxu1  ;;  %1616 = vmatprep.subr.bf16.mxu0 %v5865_v30  ;;  %1657 = vmatprep.subr.bf16.mxu1 %v5866_v31  ;;  %v1461_v53 = vadd.f32 %v1460_v56, %v4326_v35  ;;  %v5941_v30 = vld [vmem:[#allocation51_spill] sm:$0xff]  ;;  %v5942_v31 = vld [vmem:[#allocation52_spill] sm:$0xff]  ;;  %v5972_v56 = vmov 0  }
 0x373   :  { %v2953_v60 = vmul.f32 -1.442695, %v1418_v43  ;;  %v1422_v61 = vpop.f32.mrb[35].mxu0  ;;  %v1463_v62 = vpop.f32.mrb[35].mxu1  ;;  %v5970_v43 = vld [vmem:[#allocation39_spill] sm:$0xff]  ;;  %v5971_v15 = vld [vmem:[#allocation40_spill] sm:$0xff] }
 0x374   :  { %v2954_v0 = vmul.f32 -1.442695, %v1420_v55  ;;  %v2955_v57 = vmul.f32 -1.442695, %v1461_v53  ;;  %v5973_v55 = vld [vmem:[#allocation41_spill] sm:$0xff]  ;;  %v5974_v3 = vld [vmem:[#allocation42_spill] sm:$0xff] }
 0x375   :  { %3257 = vpow2.f32 %v2953_v60  ;;  %1617 = vmatpush1.bf16.msra.mxu0 %v5869_v36  ;;  %1658 = vmatpush1.bf16.msra.mxu1 %v5870_v37  ;;  %v5943_v36 = vld [vmem:[#allocation53_spill] sm:$0xff]  ;;  %v5944_v37 = vld [vmem:[#allocation54_spill] sm:$0xff]  ;;  %v5975_v58 = vld [vmem:[#allocation43_spill] sm:$0xff] }
 0x376   :  { %3259 = vpow2.f32 %v2954_v0  ;;  %1618 = vmatprep.subr.bf16.mxu0 %v5871_v38  ;;  %1659 = vmatprep.subr.bf16.mxu1 %v5872_v39  ;;  %v5945_v38 = vld [vmem:[#allocation55_spill] sm:$0xff]  ;;  %v5946_v39 = vld [vmem:[#allocation56_spill] sm:$0xff]  ;;  %v5978_v61 = vld [vmem:[#allocation46_spill] sm:$0xff] }
 0x377   :  { %3261 = vpow2.f32 %v2955_v57  ;;  %v5976_v60 = vld [vmem:[#allocation44_spill] sm:$0xff]  ;;  %v5979_v62 = vld [vmem:[#allocation47_spill] sm:$0xff]  ;;  %v5981_v53 = vld [vmem:[#allocation49_spill] sm:$0xff] }
 0x378   :  { %3263 = vtanh.f32 %v1459_v45  ;;  %v5980_v0 = vld [vmem:[#allocation48_spill] sm:$0xff]  ;;  %v5982_v57 = vld [vmem:[#allocation50_spill] sm:$0xff] }
 0x379   :  { %1619 = vmatpush1.bf16.msra.mxu0 %v5875_v44  ;;  %1660 = vmatpush1.bf16.msra.mxu1 %v5876_v46  ;;  %v5947_v44 = vld [vmem:[#allocation57_spill] sm:$0xff]  ;;  %v5948_v46 = vld [vmem:[#allocation58_spill] sm:$0xff]  ;;  %v5983_v45 = vld [vmem:[#allocation60_spill] sm:$0xff] }
 0x37a   :  { %1620 = vmatprep.subr.bf16.mxu0 %v5877_v47  ;;  %1661 = vmatprep.subr.bf16.mxu1 %v5878_v48  ;;  %v5949_v47 = vld [vmem:[#allocation59_spill] sm:$0xff] }
 0x37d   :  { %1621 = vmatpush1.bf16.msra.mxu0 %v5879_v13  ;;  %1662 = vmatpush1.bf16.msra.mxu1 %v5880_v18  ;;  %v5950_v13 = vld [vmem:[#allocation61_spill] sm:$0xff]  ;;  %v5951_v18 = vld [vmem:[#allocation62_spill] sm:$0xff] }
 0x37e   :  { %1622 = vmatprep.subr.bf16.mxu0 %v5881_v20  ;;  %1663 = vmatprep.subr.bf16.mxu1 %v5882_v4 }
 0x37f   :  { %v3258_v14 = vpop.eup %3257 }
 0x380   :  { %v3260_v8 = vpop.eup %3259  ;;  %v1468_v24 = vadd.f32 1.0, %v3258_v14  ;;  %v5984_v14 = vld [vmem:[#allocation63_spill] sm:$0xff] }
 0x381   :  { %v1474_v26 = vadd.f32 1.0, %v3260_v8  ;;  %1623 = vmatpush1.bf16.msra.mxu0 %v5941_v30  ;;  %1664 = vmatpush1.bf16.msra.mxu1 %v5942_v31  ;;  %v3262_v48 = vpop.eup %3261  ;;  %v5985_v8 = vld [vmem:[#allocation64_spill] sm:$0xff]  ;;  %v5988_v30 = vld [vmem:[#allocation83_spill] sm:$0xff] }
 0x382   :  { %3265 = vrcp.f32 %v1468_v24  ;;  %1624 = vmatprep.subr.bf16.mxu0 %v5943_v36  ;;  %1665 = vmatprep.subr.bf16.mxu1 %v5944_v37  ;;  %v3264_v20 = vpop.eup %3263  ;;  %v1481_v22 = vadd.f32 1.0, %v3262_v48  ;;  %v5986_v24 = vld [vmem:[#allocation65_spill] sm:$0xff]  ;;  %v5989_v31 = vld [vmem:[#allocation84_spill] sm:$0xff]  ;;  %v5991_v37 = vld [vmem:[#allocation86_spill] sm:$0xff] }
 0x383   :  { %3267 = vrcp.f32 %v1474_v26  ;;  %v5987_v26 = vld [vmem:[#allocation66_spill] sm:$0xff]  ;;  %v5990_v36 = vld [vmem:[#allocation85_spill] sm:$0xff]  ;;  %v5997_v48 = vld [vmem:[#allocation92_spill] sm:$0xff] }
 0x384   :  { %3269 = vrcp.f32 %v1481_v22 }
 0x385   :  { %1625 = vmatpush1.bf16.msra.mxu0 %v5945_v38  ;;  %1666 = vmatpush1.bf16.msra.mxu1 %v5946_v39  ;;  %v5992_v38 = vld [vmem:[#allocation87_spill] sm:$0xff]  ;;  %v5993_v39 = vld [vmem:[#allocation88_spill] sm:$0xff] }
 0x386   :  { %1626 = vmatprep.subr.bf16.mxu0 %v5947_v44  ;;  %1667 = vmatprep.subr.bf16.mxu1 %v5948_v46  ;;  %v5994_v44 = vld [vmem:[#allocation89_spill] sm:$0xff]  ;;  %v5995_v46 = vld [vmem:[#allocation90_spill] sm:$0xff] }
 0x389   :  { %1627 = vmatpush1.bf16.msra.mxu0 %v5949_v47  ;;  %1668 = vmatpush1.bf16.msra.mxu1 %v5892_v9  ;;  %v5996_v47 = vld [vmem:[#allocation91_spill] sm:$0xff] }
 0x38a   :  { %1628 = vmatprep.subr.bf16.mxu0 %v5950_v13  ;;  %1669 = vmatprep.subr.bf16.mxu1 %v5951_v18  ;;  %v5998_v13 = vld [vmem:[#allocation93_spill] sm:$0xff] }
 0x38b   :  { %v4599_v18 = vld [vmem:[#allocation5 + $0x4] ss:$16 sps:$4 sm:$0xff]  }
 0x38c   :  { %v3266_v4 = vpop.eup %3265 }
 0x38d   :  { %v3268_v50 = vpop.eup %3267  ;;  %v1485_v29 = vmul.f32 %v3266_v4, %v3264_v20  ;;  %1629 = vmatpush1.bf16.msra.mxu0 %v5895_v32  ;;  %1670 = vmatpush1.bf16.msra.mxu1 %v5896_v33  ;;  %v5956_v32 = vld [vmem:[#allocation71_spill] sm:$0xff]  ;;  %v5957_v33 = vld [vmem:[#allocation72_spill] sm:$0xff] }
 0x38e   :  { %v1484_v54 = vmul.f32 %v3268_v50, %v4362_v2  ;;  %1630 = vmatprep.subr.bf16.mxu0 %v5897_v40  ;;  %1671 = vmatprep.subr.bf16.mxu1 %v5898_v23  ;;  %v5958_v40 = vld [vmem:[#allocation73_spill] sm:$0xff]  ;;  %v5959_v23 = vld [vmem:[#allocation74_spill] sm:$0xff]  ;;  %v5960_v2 = vld [vmem:[#allocation75_spill] sm:$0xff]  ;;  %v3270_v1 = vpop.eup %3269 }
 0x38f   :  { %v4602_v20 = vld [vmem:[#allocation5 + $0xc] ss:$16 sps:$4 sm:$0xff]  }
 0x390   :  { %v4546_v9 = vadd.f32 %v1485_v29, %v1484_v54  ;;  %v5999_v29 = vld [vmem:[#allocation11_spill] sm:$0xff] }
 0x391   :  { %1631 = vmatpush1.bf16.msra.mxu0 %v5952_v49  ;;  %1672 = vmatpush1.bf16.msra.mxu1 %v5953_v51  ;;  %v6000_v54 = vld [vmem:[#allocation15_spill] sm:$0xff] }
 0x392   :  { %1632 = vmatprep.subr.bf16.mxu0 %v5954_v52  ;;  %1673 = vmatprep.subr.bf16.mxu1 %v5955_v27  ;;  %3271 = vtanh.f32 %v4546_v9  ;;  %v6001_v27 = vld [vmem:[#allocation13_spill] sm:$0xff] }
 0x395   :  { %1633 = vmatpush1.bf16.msra.mxu0 %v5956_v32  ;;  %1674 = vmatpush1.bf16.msra.mxu1 %v5957_v33  ;;  %v6002_v33 = vld [vmem:[#allocation16_spill] sm:$0xff] }
 0x396   :  { %1634 = vmatprep.subr.bf16.mxu0 %v5958_v40  ;;  %1675 = vmatprep.subr.bf16.mxu1 %v5959_v23 }
 0x399   :  { %1635 = vmatpush1.bf16.msra.mxu0 %v5960_v2  ;;  %1676 = vmatpush1.bf16.msra.mxu1 %v5961_v63 }
 0x39a   :  { %1636 = vmatprep.subr.bf16.mxu0 %v5962_v6  ;;  %1677 = vmatprep.subr.bf16.mxu1 %v5963_v17 }
 0x39c   :  { %v3272_v5 = vpop.eup %3271 }
 0x39d   :  { %1637 = vmatpush1.bf16.msra.mxu0 %v5964_v25  ;;  %1678 = vmatpush1.bf16.msra.mxu1 %v5965_v12  ;;  %v1488_v19 = vmul.f32 %v3272_v5, %v3270_v1 }
 0x39e   :  { %1718 = vmatprep.subr.bf16.mxu0 %v5966_v28  ;;  %1759 = vmatprep.subr.bf16.mxu1 %v5967_v21 }
 0x39f   :  { %v1605_v41 = vpack.c.bf16 %v1488_v19, %v1488_v19 }
 0x3a1   :  { %1638 = vmatprep.mubr.bf16.mxu0 %v1605_v41  ;;  %1679 = vmatprep.mubr.bf16.mxu1 %v1605_v41 }
 0x3a2   :  { %1639 = vmatmul.mubr.bf16.vlgmr.msra.gmra.mrb[40].mxu0 %v4489_v16  ;;  %1680 = vmatmul.mubr.bf16.vlgmr.msra.gmra.mrb[40].mxu1 %v4489_v16  ;;  %v5977_v16 = vld [vmem:[#allocation45_spill] sm:$0xff] }
 0x3a3   :  { %1719 = vmatpush1.bf16.msra.mxu0 %v5968_v34  ;;  %1760 = vmatpush1.bf16.msra.mxu1 %v5969_v10 }
 0x3a4   :  { %1720 = vmatprep.subr.bf16.mxu0 %v5970_v43  ;;  %1761 = vmatprep.subr.bf16.mxu1 %v5971_v15 }
 0x3a5   :  { %1750 = vmatprep.mubr.bf16.mxu0 %v5972_v56  ;;  %1791 = vmatprep.mubr.bf16.mxu1 %v5972_v56 }
 0x3a7   :  { %1721 = vmatpush1.bf16.msra.mxu0 %v5973_v55  ;;  %1762 = vmatpush1.bf16.msra.mxu1 %v5974_v3 }
 0x3a8   :  { %1722 = vmatprep.subr.bf16.mxu0 %v5975_v58  ;;  %1763 = vmatprep.subr.bf16.mxu1 %v5976_v60 }
 0x3ab   :  { %1723 = vmatpush1.bf16.msra.mxu0 %v5977_v16  ;;  %1764 = vmatpush1.bf16.msra.mxu1 %v5978_v61 }
 0x3ac   :  { %1724 = vmatprep.subr.bf16.mxu0 %v5979_v62  ;;  %1765 = vmatprep.subr.bf16.mxu1 %v5980_v0 }
 0x3af   :  { %1725 = vmatpush1.bf16.msra.mxu0 %v5981_v53  ;;  %1766 = vmatpush1.bf16.msra.mxu1 %v5982_v57 }
 0x3b0   :  { %1726 = vmatprep.subr.bf16.mxu0 %v5983_v45  ;;  %1767 = vmatprep.subr.bf16.mxu1 %v5984_v14 }
 0x3b3   :  { %1727 = vmatpush1.bf16.msra.mxu0 %v5985_v8  ;;  %1768 = vmatpush1.bf16.msra.mxu1 %v5986_v24 }
 0x3b4   :  { %1728 = vmatprep.subr.bf16.mxu0 %v5987_v26  ;;  %1769 = vmatprep.subr.bf16.mxu1 %v5988_v30 }
 0x3b7   :  { %1729 = vmatpush1.bf16.msra.mxu0 %v5989_v31  ;;  %1770 = vmatpush1.bf16.msra.mxu1 %v5990_v36 }
 0x3b8   :  { %1730 = vmatprep.subr.bf16.mxu0 %v5991_v37  ;;  %1771 = vmatprep.subr.bf16.mxu1 %v5992_v38 }
 0x3bb   :  { %1731 = vmatpush1.bf16.msra.mxu0 %v5993_v39  ;;  %1772 = vmatpush1.bf16.msra.mxu1 %v5994_v44 }
 0x3bc   :  { %1732 = vmatprep.subr.bf16.mxu0 %v5995_v46  ;;  %1773 = vmatprep.subr.bf16.mxu1 %v5996_v47 }
 0x3bf   :  { %1733 = vmatpush1.bf16.msra.mxu0 %v5997_v48  ;;  %1774 = vmatpush1.bf16.msra.mxu1 %v5998_v13 }
 0x3c0   :  { %1829 = vmatprep.subr.bf16.mxu0 %v4599_v18  ;;  %1870 = vmatprep.subr.bf16.mxu1 %v4602_v20 }
 0x433   :  { %v1529_v4 = vpop.f32.mrb[36].mxu0  ;;  %v1570_v50 = vpop.f32.mrb[36].mxu1 }
 0x434   :  { %v1577_v22 = vadd.f32 %v1529_v4, %v5999_v29  ;;  %v1579_v49 = vadd.f32 %v1570_v50, %v6000_v54  ;;  %v1531_v51 = vpop.f32.mrb[37].mxu0  ;;  %v1572_v52 = vpop.f32.mrb[37].mxu1 }
 0x435   :  { %v1578_v32 = vadd.f32 %v1531_v51, %v6001_v27  ;;  %v1580_v40 = vadd.f32 %v1572_v52, %v6002_v33  ;;  %v1533_v23 = vpop.f32.mrb[38].mxu0  ;;  %v1574_v2 = vpop.f32.mrb[38].mxu1 }
 0x436   :  { %v2956_v63 = vmul.f32 -1.442695, %v1577_v22  ;;  %v1534_v6 = vpop.f32.mrb[39].mxu0  ;;  %v1575_v17 = vpop.f32.mrb[39].mxu1  ;;  %v4617_v23 = vld [vmem:[#allocation5] ss:$16 sps:$4 sm:$0xff]  }
 0x437   :  { %v2957_v1 = vmul.f32 -1.442695, %v1578_v32  ;;  %v2958_v5 = vmul.f32 -1.442695, %v1580_v40  ;;  %v4620_v2 = vld [vmem:[#allocation5 + $0x8] ss:$16 sps:$4 sm:$0xff]  }
 0x438   :  { %3273 = vpow2.f32 %v2956_v63  ;;  %v4626_v63 = vld [vmem:[#allocation5 + $0x2c] ss:$16 sps:$4 sm:$0xff]   ;;  %v4629_v6 = vld [vmem:[#allocation5 + $0x20] ss:$16 sps:$4 sm:$0xff]   ;;  %v4632_v17 = vld [vmem:[#allocation5 + $0x28] ss:$16 sps:$4 sm:$0xff]  }
 0x439   :  { %3275 = vpow2.f32 %v2957_v1  ;;  %v4635_v1 = vld [vmem:[#allocation5 + $0x44] ss:$16 sps:$4 sm:$0xff]  }
 0x43a   :  { %3277 = vpow2.f32 %v2958_v5  ;;  %v4638_v5 = vld [vmem:[#allocation5 + $0x4c] ss:$16 sps:$4 sm:$0xff]  }
 0x43b   :  { %3279 = vtanh.f32 %v1579_v49  ;;  %6003 = vst [vmem:[#allocation9_spill] sm:$0xff] %v4638_v5 }
 0x442   :  { %v3274_v25 = vpop.eup %3273 }
 0x443   :  { %v3276_v12 = vpop.eup %3275  ;;  %v1584_v19 = vadd.f32 1.0, %v3274_v25  ;;  %v4641_v25 = vld [vmem:[#allocation5 + $0x40] ss:$16 sps:$4 sm:$0xff]  }
 0x444   :  { %v1590_v41 = vadd.f32 1.0, %v3276_v12  ;;  %v3278_v4 = vpop.eup %3277  ;;  %6004 = vst [vmem:[#allocation12_spill] sm:$0xff] %v4641_v25  ;;  %v4644_v12 = vld [vmem:[#allocation5 + $0x48] ss:$16 sps:$4 sm:$0xff]  }
 0x445   :  { %3281 = vrcp.f32 %v1584_v19  ;;  %v3280_v50 = vpop.eup %3279  ;;  %v1597_v22 = vadd.f32 1.0, %v3278_v4  ;;  %6005 = vst [vmem:[#allocation10_spill] sm:$0xff] %v4644_v12  ;;  %v4647_v19 = vld [vmem:[#allocation5 + $0x64] ss:$16 sps:$4 sm:$0xff]   ;;  %v4653_v4 = vld [vmem:[#allocation5 + $0x60] ss:$16 sps:$4 sm:$0xff]  }
 0x446   :  { %3283 = vrcp.f32 %v1590_v41  ;;  %6006 = vst [vmem:[#allocation14_spill] sm:$0xff] %v4647_v19  ;;  %v4650_v41 = vld [vmem:[#allocation5 + $0x6c] ss:$16 sps:$4 sm:$0xff]   ;;  %6008 = vst [vmem:[#allocation52_spill] sm:$0xff] %v4653_v4 }
 0x447   :  { %3285 = vrcp.f32 %v1597_v22  ;;  %6007 = vst [vmem:[#allocation51_spill] sm:$0xff] %v4650_v41 }
 0x44f   :  { %v3282_v29 = vpop.eup %3281 }
 0x450   :  { %v3284_v54 = vpop.eup %3283  ;;  %v1601_v51 = vmul.f32 %v3282_v29, %v3280_v50  ;;  %v4656_v50 = vld [vmem:[#allocation5 + $0x68] ss:$16 sps:$4 sm:$0xff]   ;;  %v4659_v29 = vld [vmem:[#allocation5 + $0x84] ss:$16 sps:$4 sm:$0xff]  }
 0x451   :  { %v1600_v52 = vmul.f32 %v3284_v54, %v4486_v59  ;;  %v3286_v32 = vpop.eup %3285  ;;  %v4623_v59 = vld [vmem:[#allocation5 + $0x24] ss:$16 sps:$4 sm:$0xff]   ;;  %6009 = vst [vmem:[#allocation53_spill] sm:$0xff] %v4656_v50  ;;  %6010 = vst [vmem:[#allocation54_spill] sm:$0xff] %v4659_v29  ;;  %v4662_v54 = vld [vmem:[#allocation5 + $0x8c] ss:$16 sps:$4 sm:$0xff]  }
 0x452   :  { %6011 = vst [vmem:[#allocation55_spill] sm:$0xff] %v4662_v54 }
 0x453   :  { %v4610_v27 = vadd.f32 %v1601_v51, %v1600_v52  ;;  %v4665_v52 = vld [vmem:[#allocation5 + $0x80] ss:$16 sps:$4 sm:$0xff]  }
 0x454   :  { %6012 = vst [vmem:[#allocation56_spill] sm:$0xff] %v4665_v52 }
 0x455   :  { %3287 = vtanh.f32 %v4610_v27 }
 0x45f   :  { %v3288_v33 = vpop.eup %3287 }
 0x460   :  { %v1604_v40 = vmul.f32 %v3288_v33, %v3286_v32  ;;  %v4668_v32 = vld [vmem:[#allocation5 + $0x88] ss:$16 sps:$4 sm:$0xff]  }
 0x461   :  { %6013 = vst [vmem:[#allocation57_spill] sm:$0xff] %v4668_v32 }
 0x462   :  { %v4613_v49 = vpack.c.bf16 %v1604_v40, %v1604_v40 }
 0x464   :  { %1751 = vmatmul.mubr.bf16.vlgmr.msra.gmra.mrb[44].mxu0 %v4613_v49  ;;  %1792 = vmatmul.mubr.bf16.vlgmr.msra.gmra.mrb[44].mxu1 %v4613_v49 }
 0x465   :  { %1830 = vmatpush1.bf16.msra.mxu0 %v4617_v23  ;;  %1871 = vmatpush1.bf16.msra.mxu1 %v4620_v2 }
 0x466   :  { %1831 = vmatprep.subr.bf16.mxu0 %v4623_v59  ;;  %1872 = vmatprep.subr.bf16.mxu1 %v4626_v63 }
 0x469   :  { %1832 = vmatpush1.bf16.msra.mxu0 %v4629_v6  ;;  %1873 = vmatpush1.bf16.msra.mxu1 %v4632_v17 }
 0x46a   :  { %1833 = vmatprep.subr.bf16.mxu0 %v4635_v1  ;;  %1874 = vmatprep.subr.bf16.mxu1 %v4638_v5  ;;  %v4679_v5 = vld [vmem:[#allocation5 + $0xa0] ss:$16 sps:$4 sm:$0xff]  }
 0x46d   :  { %1834 = vmatpush1.bf16.msra.mxu0 %v4641_v25  ;;  %1875 = vmatpush1.bf16.msra.mxu1 %v4644_v12 }
 0x46e   :  { %1835 = vmatprep.subr.bf16.mxu0 %v4647_v19  ;;  %1876 = vmatprep.subr.bf16.mxu1 %v4650_v41 }
 0x471   :  { %1836 = vmatpush1.bf16.msra.mxu0 %v4653_v4  ;;  %1877 = vmatpush1.bf16.msra.mxu1 %v4656_v50  ;;  %v4672_v4 = vld [vmem:[#allocation5 + $0xa4] ss:$16 sps:$4 sm:$0xff]  }
 0x472   :  { %1837 = vmatprep.subr.bf16.mxu0 %v4659_v29  ;;  %1878 = vmatprep.subr.bf16.mxu1 %v4662_v54  ;;  %v4675_v29 = vld [vmem:[#allocation5 + $0xac] ss:$16 sps:$4 sm:$0xff]  }
 0x475   :  { %v1640_v51 = vpop.f32.mrb[40].mxu0  ;;  %v1681_v22 = vpop.f32.mrb[40].mxu1  ;;  %1838 = vmatpush1.bf16.msra.mxu0 %v4665_v52  ;;  %1879 = vmatpush1.bf16.msra.mxu1 %v4668_v32 }
 0x476   :  { %v1641_v33 = vadd.f32 %v1640_v51, %v4308_v7  ;;  %v1642_v40 = vpop.f32.mrb[41].mxu0  ;;  %v1683_v50 = vpop.f32.mrb[41].mxu1  ;;  %1839 = vmatprep.subr.bf16.mxu0 %v4672_v4  ;;  %1880 = vmatprep.subr.bf16.mxu1 %v4675_v29  ;;  %v4682_v51 = vld [vmem:[#allocation5 + $0xa8] ss:$16 sps:$4 sm:$0xff]   ;;  %v4685_v7 = vld [vmem:[#allocation5 + $0xc4] ss:$16 sps:$4 sm:$0xff]  }
 0x477   :  { %v1643_v54 = vadd.f32 %v1642_v40, %v4314_v11  ;;  %v1644_v41 = vpop.f32.mrb[42].mxu0  ;;  %v1685_v52 = vpop.f32.mrb[42].mxu1  ;;  %v4688_v40 = vld [vmem:[#allocation5 + $0xcc] ss:$16 sps:$4 sm:$0xff]  }
 0x478   :  { %v2959_v19 = vmul.f32 -1.442695, %v1641_v33  ;;  %v1645_v12 = vpop.f32.mrb[43].mxu0  ;;  %v1686_v25 = vpop.f32.mrb[43].mxu1  ;;  %v4695_v41 = vld [vmem:[#allocation5 + $0xc8] ss:$16 sps:$4 sm:$0xff]   ;;  %v1682_v33 = vadd.f32 %v1681_v22, %v4335_v42 }
 0x479   :  { %v2960_v32 = vmul.f32 -1.442695, %v1643_v54  ;;  %1840 = vmatpush1.bf16.msra.mxu0 %v4679_v5  ;;  %1881 = vmatpush1.bf16.msra.mxu1 %v4682_v51  ;;  %v1684_v25 = vadd.f32 %v1683_v50, %v4326_v35  ;;  %v4692_v12 = vld [vmem:[#allocation5 + $0xc0] ss:$16 sps:$4 sm:$0xff]   ;;  %6015 = vst [vmem:[#allocation59_spill] sm:$0xff] %v4695_v41 }
 0x47a   :  { %3289 = vpow2.f32 %v2959_v19  ;;  %1841 = vmatprep.subr.bf16.mxu0 %v4685_v7  ;;  %1882 = vmatprep.subr.bf16.mxu1 %v4688_v40  ;;  %6014 = vst [vmem:[#allocation58_spill] sm:$0xff] %v4692_v12  ;;  %v4698_v19 = vld [vmem:[#allocation5 + $0xe4] ss:$16 sps:$4 sm:$0xff]   ;;  %v4701_v54 = vld [vmem:[#allocation5 + $0xec] ss:$16 sps:$4 sm:$0xff]  }
 0x47b   :  { %3291 = vpow2.f32 %v2960_v32  ;;  %6016 = vst [vmem:[#allocation61_spill] sm:$0xff] %v4698_v19  ;;  %6017 = vst [vmem:[#allocation62_spill] sm:$0xff] %v4701_v54  ;;  %v2961_v52 = vmul.f32 -1.442695, %v1684_v25  ;;  %v4704_v32 = vld [vmem:[#allocation5 + $0xe0] ss:$16 sps:$4 sm:$0xff]  }
 0x47c   :  { %6018 = vst [vmem:[#allocation67_spill] sm:$0xff] %v4704_v32  ;;  %v4707_v50 = vld [vmem:[#allocation5 + $0xe8] ss:$16 sps:$4 sm:$0xff]   ;;  %v4711_v35 = vld [vmem:[#allocation5 + $0x104] ss:$16 sps:$4 sm:$0xff]  }
 0x47d   :  { %1842 = vmatpush1.bf16.msra.mxu0 %v4692_v12  ;;  %1883 = vmatpush1.bf16.msra.mxu1 %v4695_v41  ;;  %6019 = vst [vmem:[#allocation68_spill] sm:$0xff] %v4707_v50  ;;  %6020 = vst [vmem:[#allocation69_spill] sm:$0xff] %v4711_v35  ;;  %3293 = vpow2.f32 %v2961_v52  ;;  %v4717_v12 = vld [vmem:[#allocation5 + $0x100] ss:$16 sps:$4 sm:$0xff]   ;;  %v4723_v42 = vld [vmem:[#allocation5 + $0x124] ss:$16 sps:$4 sm:$0xff]  }
 0x47e   :  { %1843 = vmatprep.subr.bf16.mxu0 %v4698_v19  ;;  %1884 = vmatprep.subr.bf16.mxu1 %v4701_v54  ;;  %v4714_v19 = vld [vmem:[#allocation5 + $0x10c] ss:$16 sps:$4 sm:$0xff]   ;;  %6022 = vst [vmem:[#allocation71_spill] sm:$0xff] %v4717_v12  ;;  %3295 = vtanh.f32 %v1682_v33  ;;  %6024 = vst [vmem:[#allocation73_spill] sm:$0xff] %v4723_v42  ;;  %v4732_v52 = vld [vmem:[#allocation5 + $0x128] ss:$16 sps:$4 sm:$0xff]  }
 0x47f   :  { %6021 = vst [vmem:[#allocation70_spill] sm:$0xff] %v4714_v19  ;;  %6027 = vst [vmem:[#allocation76_spill] sm:$0xff] %v4732_v52  ;;  %v4735_v33 = vld [vmem:[#allocation5 + $0x144] ss:$16 sps:$4 sm:$0xff]  }
 0x480   :  { %6028 = vst [vmem:[#allocation77_spill] sm:$0xff] %v4735_v33 }
 0x481   :  { %1844 = vmatpush1.bf16.msra.mxu0 %v4704_v32  ;;  %1885 = vmatpush1.bf16.msra.mxu1 %v4707_v50  ;;  %v4720_v32 = vld [vmem:[#allocation5 + $0x108] ss:$16 sps:$4 sm:$0xff]   ;;  %v4766_v50 = vld [vmem:[#allocation5 + $0x180] ss:$16 sps:$4 sm:$0xff]  }
 0x482   :  { %1845 = vmatprep.subr.bf16.mxu0 %v4711_v35  ;;  %1886 = vmatprep.subr.bf16.mxu1 %v4714_v19  ;;  %6023 = vst [vmem:[#allocation72_spill] sm:$0xff] %v4720_v32  ;;  %v4726_v35 = vld [vmem:[#allocation5 + $0x12c] ss:$16 sps:$4 sm:$0xff]   ;;  %v4759_v19 = vld [vmem:[#allocation5 + $0x184] ss:$16 sps:$4 sm:$0xff]  }
 0x483   :  { %6025 = vst [vmem:[#allocation74_spill] sm:$0xff] %v4726_v35  ;;  %6035 = vst [vmem:[#allocation38_spill] sm:$0xff] %v4759_v19 }
 0x484   :  { %v3290_v54 = vpop.eup %3289 }
 0x485   :  { %v3292_v25 = vpop.eup %3291  ;;  %v1691_v41 = vadd.f32 1.0, %v3290_v54  ;;  %1846 = vmatpush1.bf16.msra.mxu0 %v4717_v12  ;;  %1887 = vmatpush1.bf16.msra.mxu1 %v4720_v32  ;;  %v4729_v54 = vld [vmem:[#allocation5 + $0x120] ss:$16 sps:$4 sm:$0xff]  }
 0x486   :  { %v1697_v22 = vadd.f32 1.0, %v3292_v25  ;;  %1847 = vmatprep.subr.bf16.mxu0 %v4723_v42  ;;  %1888 = vmatprep.subr.bf16.mxu1 %v4726_v35  ;;  %6026 = vst [vmem:[#allocation75_spill] sm:$0xff] %v4729_v54  ;;  %v4738_v25 = vld [vmem:[#allocation5 + $0x14c] ss:$16 sps:$4 sm:$0xff]   ;;  %v4741_v42 = vld [vmem:[#allocation5 + $0x140] ss:$16 sps:$4 sm:$0xff]  }
 0x487   :  { %3297 = vrcp.f32 %v1691_v41  ;;  %6029 = vst [vmem:[#allocation78_spill] sm:$0xff] %v4738_v25  ;;  %6030 = vst [vmem:[#allocation79_spill] sm:$0xff] %v4741_v42  ;;  %v4744_v41 = vld [vmem:[#allocation5 + $0x148] ss:$16 sps:$4 sm:$0xff]  }
 0x488   :  { %3299 = vrcp.f32 %v1697_v22  ;;  %6031 = vst [vmem:[#allocation80_spill] sm:$0xff] %v4744_v41  ;;  %v4747_v22 = vld [vmem:[#allocation5 + $0x164] ss:$16 sps:$4 sm:$0xff]  }
 0x489   :  { %1848 = vmatpush1.bf16.msra.mxu0 %v4729_v54  ;;  %1889 = vmatpush1.bf16.msra.mxu1 %v4732_v52  ;;  %6032 = vst [vmem:[#allocation35_spill] sm:$0xff] %v4747_v22  ;;  %v4750_v52 = vld [vmem:[#allocation5 + $0x16c] ss:$16 sps:$4 sm:$0xff]  }
 0x48a   :  { %1849 = vmatprep.subr.bf16.mxu0 %v4735_v33  ;;  %1890 = vmatprep.subr.bf16.mxu1 %v4738_v25  ;;  %6033 = vst [vmem:[#allocation36_spill] sm:$0xff] %v4750_v52  ;;  %v3294_v33 = vpop.eup %3293  ;;  %v4753_v25 = vld [vmem:[#allocation5 + $0x160] ss:$16 sps:$4 sm:$0xff]  }
 0x48b   :  { %v3296_v54 = vpop.eup %3295  ;;  %6034 = vst [vmem:[#allocation37_spill] sm:$0xff] %v4753_v25  ;;  %v1704_v12 = vadd.f32 1.0, %v3294_v33  ;;  %v4777_v33 = vld [vmem:[#allocation5 + $0x1ac] ss:$16 sps:$4 sm:$0xff]  }
 0x48c   :  { %6039 = vst [vmem:[#allocation42_spill] sm:$0xff] %v4777_v33 }
 0x48d   :  { %1850 = vmatpush1.bf16.msra.mxu0 %v4741_v42  ;;  %1891 = vmatpush1.bf16.msra.mxu1 %v4744_v41  ;;  %v4756_v42 = vld [vmem:[#allocation5 + $0x168] ss:$16 sps:$4 sm:$0xff]   ;;  %3301 = vrcp.f32 %v1704_v12  ;;  %v4790_v12 = vld [vmem:[#allocation5 + $0x1cc] ss:$16 sps:$4 sm:$0xff]  }
 0x48e   :  { %1851 = vmatprep.subr.bf16.mxu0 %v4747_v22  ;;  %1892 = vmatprep.subr.bf16.mxu1 %v4750_v52  ;;  %v4762_v22 = vld [vmem:[#allocation5 + $0x18c] ss:$16 sps:$4 sm:$0xff]   ;;  %6043 = vst [vmem:[#allocation46_spill] sm:$0xff] %v4790_v12 }
 0x48f   :  { %6036 = vst [vmem:[#allocation39_spill] sm:$0xff] %v4762_v22 }
 0x491   :  { %v3298_v35 = vpop.eup %3297  ;;  %1852 = vmatpush1.bf16.msra.mxu0 %v4753_v25  ;;  %1893 = vmatpush1.bf16.msra.mxu1 %v4756_v42  ;;  %v4769_v25 = vld [vmem:[#allocation5 + $0x188] ss:$16 sps:$4 sm:$0xff]  }
 0x492   :  { %v3300_v41 = vpop.eup %3299  ;;  %v1708_v32 = vmul.f32 %v3298_v35, %v3296_v54  ;;  %1853 = vmatprep.subr.bf16.mxu0 %v4759_v19  ;;  %1894 = vmatprep.subr.bf16.mxu1 %v4762_v22  ;;  %6037 = vst [vmem:[#allocation40_spill] sm:$0xff] %v4769_v25  ;;  %v4774_v54 = vld [vmem:[#allocation5 + $0x1a4] ss:$16 sps:$4 sm:$0xff]  }
 0x493   :  { %v1707_v52 = vmul.f32 %v3300_v41, %v4546_v9  ;;  %6038 = vst [vmem:[#allocation41_spill] sm:$0xff] %v4774_v54  ;;  %v4781_v9 = vld [vmem:[#allocation5 + $0x1a0] ss:$16 sps:$4 sm:$0xff]   ;;  %v4784_v41 = vld [vmem:[#allocation5 + $0x1a8] ss:$16 sps:$4 sm:$0xff]  }
 0x494   :  { %6040 = vst [vmem:[#allocation43_spill] sm:$0xff] %v4781_v9  ;;  %6041 = vst [vmem:[#allocation44_spill] sm:$0xff] %v4784_v41 }
 0x495   :  { %1854 = vmatpush1.bf16.msra.mxu0 %v4766_v50  ;;  %1895 = vmatpush1.bf16.msra.mxu1 %v4769_v25  ;;  %v4772_v35 = vadd.f32 %v1708_v32, %v1707_v52  ;;  %v4787_v32 = vld [vmem:[#allocation5 + $0x1c4] ss:$16 sps:$4 sm:$0xff]   ;;  %v4793_v52 = vld [vmem:[#allocation5 + $0x1c0] ss:$16 sps:$4 sm:$0xff]  }
 0x496   :  { %1855 = vmatprep.subr.bf16.mxu0 %v4774_v54  ;;  %1896 = vmatprep.subr.bf16.mxu1 %v4777_v33  ;;  %6042 = vst [vmem:[#allocation45_spill] sm:$0xff] %v4787_v32  ;;  %6044 = vst [vmem:[#allocation47_spill] sm:$0xff] %v4793_v52  ;;  %v4796_v33 = vld [vmem:[#allocation5 + $0x1c8] ss:$16 sps:$4 sm:$0xff]   ;;  %v4805_v25 = vld [vmem:[#allocation5 + $0x1e0] ss:$16 sps:$4 sm:$0xff]  }
 0x497   :  { %3303 = vtanh.f32 %v4772_v35  ;;  %6045 = vst [vmem:[#allocation48_spill] sm:$0xff] %v4796_v33  ;;  %6048 = vst [vmem:[#allocation60_spill] sm:$0xff] %v4805_v25 }
 0x499   :  { %1856 = vmatpush1.bf16.msra.mxu0 %v4781_v9  ;;  %1897 = vmatpush1.bf16.msra.mxu1 %v4784_v41  ;;  %v4799_v9 = vld [vmem:[#allocation5 + $0x1e4] ss:$16 sps:$4 sm:$0xff]   ;;  %v4802_v41 = vld [vmem:[#allocation5 + $0x1ec] ss:$16 sps:$4 sm:$0xff]  }
 0x49a   :  { %1857 = vmatprep.subr.bf16.mxu0 %v4787_v32  ;;  %1898 = vmatprep.subr.bf16.mxu1 %v4790_v12  ;;  %6046 = vst [vmem:[#allocation49_spill] sm:$0xff] %v4799_v9  ;;  %6047 = vst [vmem:[#allocation50_spill] sm:$0xff] %v4802_v41  ;;  %v3302_v32 = vpop.eup %3301  ;;  %v4808_v12 = vld [vmem:[#allocation5 + $0x1e8] ss:$16 sps:$4 sm:$0xff]  }
 0x49b   :  { %6049 = vst [vmem:[#allocation63_spill] sm:$0xff] %v4808_v12 }
 0x49d   :  { %1858 = vmatpush1.bf16.msra.mxu0 %v4793_v52  ;;  %1899 = vmatpush1.bf16.msra.mxu1 %v4796_v33 }
 0x49e   :  { %1859 = vmatprep.subr.bf16.mxu0 %v4799_v9  ;;  %1900 = vmatprep.subr.bf16.mxu1 %v4802_v41 }
 0x4a1   :  { %v3304_v54 = vpop.eup %3303  ;;  %1860 = vmatpush1.bf16.msra.mxu0 %v4805_v25  ;;  %1901 = vmatpush1.bf16.msra.mxu1 %v4808_v12 }
 0x4a2   :  { %v1711_v52 = vmul.f32 %v3304_v54, %v3302_v32  ;;  %1941 = vmatprep.subr.bf16.mxu0 %v5966_v28  ;;  %1982 = vmatprep.subr.bf16.mxu1 %v5967_v21  ;;  %v6055_v32 = vld [vmem:[#allocation12_spill] sm:$0xff] }
 0x4a4   :  { %v1828_v9 = vpack.c.bf16 %v1711_v52, %v1711_v52  ;;  %v6056_v52 = vld [vmem:[#allocation10_spill] sm:$0xff] }
 0x4a6   :  { %1861 = vmatprep.mubr.bf16.mxu0 %v1828_v9  ;;  %1902 = vmatprep.mubr.bf16.mxu1 %v1828_v9 }
 0x4a7   :  { %1862 = vmatmul.mubr.bf16.vlgmr.msra.gmra.mrb[48].mxu0 %v4613_v49  ;;  %1903 = vmatmul.mubr.bf16.vlgmr.msra.gmra.mrb[48].mxu1 %v4613_v49 }
 0x4a8   :  { %1942 = vmatpush1.bf16.msra.mxu0 %v5968_v34  ;;  %1983 = vmatpush1.bf16.msra.mxu1 %v5969_v10  ;;  %v6050_v34 = vld [vmem:[#allocation17_spill] sm:$0xff] }
 0x4a9   :  { %1943 = vmatprep.subr.bf16.mxu0 %v5970_v43  ;;  %1984 = vmatprep.subr.bf16.mxu1 %v5971_v15  ;;  %v6051_v43 = vld [vmem:[#allocation20_spill] sm:$0xff] }
 0x4aa   :  { %1973 = vmatprep.mubr.bf16.mxu0 %v5972_v56  ;;  %2014 = vmatprep.mubr.bf16.mxu1 %v5972_v56 }
 0x4ac   :  { %1944 = vmatpush1.bf16.msra.mxu0 %v5973_v55  ;;  %1985 = vmatpush1.bf16.msra.mxu1 %v5974_v3 }
 0x4ad   :  { %1945 = vmatprep.subr.bf16.mxu0 %v5975_v58  ;;  %1986 = vmatprep.subr.bf16.mxu1 %v5976_v60  ;;  %v6052_v58 = vld [vmem:[#allocation18_spill] sm:$0xff] }
 0x4b0   :  { %1946 = vmatpush1.bf16.msra.mxu0 %v5977_v16  ;;  %1987 = vmatpush1.bf16.msra.mxu1 %v5978_v61  ;;  %v6053_v16 = vld [vmem:[#allocation22_spill] sm:$0xff] }
 0x4b1   :  { %1947 = vmatprep.subr.bf16.mxu0 %v5979_v62  ;;  %1988 = vmatprep.subr.bf16.mxu1 %v5980_v0 }
 0x4b4   :  { %1948 = vmatpush1.bf16.msra.mxu0 %v5981_v53  ;;  %1989 = vmatpush1.bf16.msra.mxu1 %v5982_v57 }
 0x4b5   :  { %1949 = vmatprep.subr.bf16.mxu0 %v5983_v45  ;;  %1990 = vmatprep.subr.bf16.mxu1 %v5984_v14 }
 0x4b8   :  { %1950 = vmatpush1.bf16.msra.mxu0 %v5985_v8  ;;  %1991 = vmatpush1.bf16.msra.mxu1 %v5986_v24 }
 0x4b9   :  { %1951 = vmatprep.subr.bf16.mxu0 %v5987_v26  ;;  %1992 = vmatprep.subr.bf16.mxu1 %v5988_v30 }
 0x4bc   :  { %1952 = vmatpush1.bf16.msra.mxu0 %v5989_v31  ;;  %1993 = vmatpush1.bf16.msra.mxu1 %v5990_v36 }
 0x4bd   :  { %1953 = vmatprep.subr.bf16.mxu0 %v5991_v37  ;;  %1994 = vmatprep.subr.bf16.mxu1 %v5992_v38 }
 0x4c0   :  { %1954 = vmatpush1.bf16.msra.mxu0 %v5993_v39  ;;  %1995 = vmatpush1.bf16.msra.mxu1 %v5994_v44 }
 0x4c1   :  { %1955 = vmatprep.subr.bf16.mxu0 %v5995_v46  ;;  %1996 = vmatprep.subr.bf16.mxu1 %v5996_v47 }
 0x4c4   :  { %1956 = vmatpush1.bf16.msra.mxu0 %v5997_v48  ;;  %1997 = vmatpush1.bf16.msra.mxu1 %v5998_v13 }
 0x4c5   :  { %2052 = vmatprep.subr.bf16.mxu0 %v4599_v18  ;;  %2093 = vmatprep.subr.bf16.mxu1 %v4602_v20 }
 0x537   :  { %v1752_v28 = vpop.f32.mrb[44].mxu0  ;;  %v1793_v21 = vpop.f32.mrb[44].mxu1 }
 0x538   :  { %v1800_v10 = vadd.f32 %v1752_v28, %v6050_v34  ;;  %v1802_v15 = vadd.f32 %v1793_v21, %v6051_v43  ;;  %v1754_v55 = vpop.f32.mrb[45].mxu0  ;;  %v1795_v3 = vpop.f32.mrb[45].mxu1  ;;  %v6057_v28 = vld [vmem:[#allocation14_spill] sm:$0xff]  ;;  %v6058_v21 = vld [vmem:[#allocation51_spill] sm:$0xff]  ;;  %v6059_v34 = vld [vmem:[#allocation52_spill] sm:$0xff] }
 0x539   :  { %v1801_v60 = vadd.f32 %v1754_v55, %v6052_v58  ;;  %v1803_v61 = vadd.f32 %v1795_v3, %v6053_v16  ;;  %v1756_v62 = vpop.f32.mrb[46].mxu0  ;;  %v1797_v0 = vpop.f32.mrb[46].mxu1  ;;  %v6061_v43 = vld [vmem:[#allocation54_spill] sm:$0xff]  ;;  %v6063_v55 = vld [vmem:[#allocation56_spill] sm:$0xff]  ;;  %v6064_v3 = vld [vmem:[#allocation57_spill] sm:$0xff] }
 0x53a   :  { %v2962_v53 = vmul.f32 -1.442695, %v1800_v10  ;;  %v1757_v57 = vpop.f32.mrb[47].mxu0  ;;  %v1798_v45 = vpop.f32.mrb[47].mxu1  ;;  %v6060_v10 = vld [vmem:[#allocation53_spill] sm:$0xff] }
 0x53b   :  { %v2963_v14 = vmul.f32 -1.442695, %v1801_v60  ;;  %v2964_v8 = vmul.f32 -1.442695, %v1803_v61  ;;  %v6065_v16 = vld [vmem:[#allocation81_spill] sm:$0xff] }
 0x53c   :  { %3305 = vpow2.f32 %v2962_v53 }
 0x53d   :  { %3307 = vpow2.f32 %v2963_v14 }
 0x53e   :  { %3309 = vpow2.f32 %v2964_v8 }
 0x53f   :  { %3311 = vtanh.f32 %v1802_v15  ;;  %v6062_v15 = vld [vmem:[#allocation55_spill] sm:$0xff] }
 0x546   :  { %v3306_v24 = vpop.eup %3305 }
 0x547   :  { %v3308_v26 = vpop.eup %3307  ;;  %v1807_v30 = vadd.f32 1.0, %v3306_v24 }
 0x548   :  { %v1813_v31 = vadd.f32 1.0, %v3308_v26  ;;  %v3310_v36 = vpop.eup %3309 }
 0x549   :  { %3313 = vrcp.f32 %v1807_v30  ;;  %v3312_v37 = vpop.eup %3311  ;;  %v1820_v46 = vadd.f32 1.0, %v3310_v36  ;;  %v6066_v30 = vld [vmem:[#allocation58_spill] sm:$0xff]  ;;  %v6068_v36 = vld [vmem:[#allocation33_spill] sm:$0xff] }
 0x54a   :  { %3315 = vrcp.f32 %v1813_v31  ;;  %v6067_v31 = vld [vmem:[#allocation59_spill] sm:$0xff] }
 0x54b   :  { %3317 = vrcp.f32 %v1820_v46  ;;  %v6072_v46 = vld [vmem:[#allocation68_spill] sm:$0xff] }
 0x553   :  { %v3314_v38 = vpop.eup %3313 }
 0x554   :  { %v3316_v39 = vpop.eup %3315  ;;  %v1824_v44 = vmul.f32 %v3314_v38, %v3312_v37  ;;  %v6069_v38 = vld [vmem:[#allocation61_spill] sm:$0xff] }
 0x555   :  { %v1823_v47 = vmul.f32 %v3316_v39, %v4610_v27  ;;  %v3318_v13 = vpop.eup %3317  ;;  %v6054_v27 = vld [vmem:[#allocation9_spill] sm:$0xff]  ;;  %v6070_v39 = vld [vmem:[#allocation62_spill] sm:$0xff] }
 0x557   :  { %v4854_v48 = vadd.f32 %v1824_v44, %v1823_v47  ;;  %v6071_v44 = vld [vmem:[#allocation67_spill] sm:$0xff] }
 0x559   :  { %3319 = vtanh.f32 %v4854_v48 }
 0x563   :  { %v3320_v49 = vpop.eup %3319 }
 0x564   :  { %v1827_v54 = vmul.f32 %v3320_v49, %v3318_v13  ;;  %v6073_v13 = vld [vmem:[#allocation69_spill] sm:$0xff]  ;;  %v6074_v49 = vld [vmem:[#allocation70_spill] sm:$0xff] }
 0x566   :  { %v4857_v9 = vpack.c.bf16 %v1827_v54, %v1827_v54  ;;  %v6075_v54 = vld [vmem:[#allocation34_spill] sm:$0xff] }
 0x568   :  { %1974 = vmatmul.mubr.bf16.vlgmr.msra.gmra.mrb[52].mxu0 %v4857_v9  ;;  %2015 = vmatmul.mubr.bf16.vlgmr.msra.gmra.mrb[52].mxu1 %v4857_v9 }
 0x569   :  { %2053 = vmatpush1.bf16.msra.mxu0 %v4617_v23  ;;  %2094 = vmatpush1.bf16.msra.mxu1 %v4620_v2 }
 0x56a   :  { %2054 = vmatprep.subr.bf16.mxu0 %v4623_v59  ;;  %2095 = vmatprep.subr.bf16.mxu1 %v4626_v63 }
 0x56d   :  { %2055 = vmatpush1.bf16.msra.mxu0 %v4629_v6  ;;  %2096 = vmatpush1.bf16.msra.mxu1 %v4632_v17 }
 0x56e   :  { %2056 = vmatprep.subr.bf16.mxu0 %v4635_v1  ;;  %2097 = vmatprep.subr.bf16.mxu1 %v6054_v27 }
 0x571   :  { %2057 = vmatpush1.bf16.msra.mxu0 %v6055_v32  ;;  %2098 = vmatpush1.bf16.msra.mxu1 %v6056_v52 }
 0x572   :  { %2058 = vmatprep.subr.bf16.mxu0 %v6057_v28  ;;  %2099 = vmatprep.subr.bf16.mxu1 %v6058_v21 }
 0x575   :  { %2059 = vmatpush1.bf16.msra.mxu0 %v6059_v34  ;;  %2100 = vmatpush1.bf16.msra.mxu1 %v6060_v10 }
 0x576   :  { %2060 = vmatprep.subr.bf16.mxu0 %v6061_v43  ;;  %2101 = vmatprep.subr.bf16.mxu1 %v6062_v15 }
 0x579   :  { %2061 = vmatpush1.bf16.msra.mxu0 %v6063_v55  ;;  %2102 = vmatpush1.bf16.msra.mxu1 %v6064_v3 }
 0x57a   :  { %v1863_v58 = vpop.f32.mrb[48].mxu0  ;;  %v1904_v60 = vpop.f32.mrb[48].mxu1  ;;  %2062 = vmatprep.subr.bf16.mxu0 %v4672_v4  ;;  %2103 = vmatprep.subr.bf16.mxu1 %v4675_v29 }
 0x57b   :  { %v1864_v61 = vadd.f32 %v1863_v58, %v6065_v16  ;;  %v1865_v62 = vpop.f32.mrb[49].mxu0  ;;  %v1906_v0 = vpop.f32.mrb[49].mxu1  ;;  %v1905_v58 = vadd.f32 %v1904_v60, %v6075_v54  ;;  %v6082_v60 = vld [vmem:[#allocation77_spill] sm:$0xff] }
 0x57c   :  { %v1866_v53 = vadd.f32 %v1865_v62, %v4314_v11  ;;  %v1867_v57 = vpop.f32.mrb[50].mxu0  ;;  %v1908_v45 = vpop.f32.mrb[50].mxu1  ;;  %v1907_v37 = vadd.f32 %v1906_v0, %v6068_v36  ;;  %v6076_v62 = vld [vmem:[#allocation71_spill] sm:$0xff] }
 0x57d   :  { %v2965_v14 = vmul.f32 -1.442695, %v1864_v61  ;;  %v1868_v8 = vpop.f32.mrb[51].mxu0  ;;  %v1909_v24 = vpop.f32.mrb[51].mxu1  ;;  %2063 = vmatpush1.bf16.msra.mxu0 %v4679_v5  ;;  %2104 = vmatpush1.bf16.msra.mxu1 %v4682_v51  ;;  %v6078_v45 = vld [vmem:[#allocation73_spill] sm:$0xff] }
 0x57e   :  { %v2966_v26 = vmul.f32 -1.442695, %v1866_v53  ;;  %2064 = vmatprep.subr.bf16.mxu0 %v4685_v7  ;;  %2105 = vmatprep.subr.bf16.mxu1 %v4688_v40  ;;  %v2967_v47 = vmul.f32 -1.442695, %v1907_v37  ;;  %v6077_v53 = vld [vmem:[#allocation72_spill] sm:$0xff]  ;;  %v6080_v24 = vld [vmem:[#allocation75_spill] sm:$0xff] }
 0x57f   :  { %3321 = vpow2.f32 %v2965_v14  ;;  %v6079_v14 = vld [vmem:[#allocation74_spill] sm:$0xff] }
 0x580   :  { %3323 = vpow2.f32 %v2966_v26  ;;  %v6081_v26 = vld [vmem:[#allocation76_spill] sm:$0xff]  ;;  %v6083_v37 = vld [vmem:[#allocation78_spill] sm:$0xff] }
 0x581   :  { %2065 = vmatpush1.bf16.msra.mxu0 %v6066_v30  ;;  %2106 = vmatpush1.bf16.msra.mxu1 %v6067_v31  ;;  %3325 = vpow2.f32 %v2967_v47  ;;  %v6086_v47 = vld [vmem:[#allocation35_spill] sm:$0xff] }
 0x582   :  { %2066 = vmatprep.subr.bf16.mxu0 %v6069_v38  ;;  %2107 = vmatprep.subr.bf16.mxu1 %v6070_v39  ;;  %3327 = vtanh.f32 %v1905_v58 }
 0x585   :  { %2067 = vmatpush1.bf16.msra.mxu0 %v6071_v44  ;;  %2108 = vmatpush1.bf16.msra.mxu1 %v6072_v46 }
 0x586   :  { %2068 = vmatprep.subr.bf16.mxu0 %v6073_v13  ;;  %2109 = vmatprep.subr.bf16.mxu1 %v6074_v49 }
 0x589   :  { %v3322_v61 = vpop.eup %3321  ;;  %2069 = vmatpush1.bf16.msra.mxu0 %v6076_v62  ;;  %2110 = vmatpush1.bf16.msra.mxu1 %v6077_v53  ;;  %v6084_v53 = vld [vmem:[#allocation79_spill] sm:$0xff] }
 0x58a   :  { %v3324_v0 = vpop.eup %3323  ;;  %v1914_v57 = vadd.f32 1.0, %v3322_v61  ;;  %2070 = vmatprep.subr.bf16.mxu0 %v6078_v45  ;;  %2111 = vmatprep.subr.bf16.mxu1 %v6079_v14  ;;  %v6085_v61 = vld [vmem:[#allocation80_spill] sm:$0xff] }
 0x58b   :  { %v1920_v8 = vadd.f32 1.0, %v3324_v0  ;;  %v6087_v45 = vld [vmem:[#allocation36_spill] sm:$0xff]  ;;  %v3326_v58 = vpop.eup %3325 }
 0x58c   :  { %3329 = vrcp.f32 %v1914_v57  ;;  %v3328_v0 = vpop.eup %3327  ;;  %v6088_v57 = vld [vmem:[#allocation37_spill] sm:$0xff] }
 0x58d   :  { %3331 = vrcp.f32 %v1920_v8  ;;  %2071 = vmatpush1.bf16.msra.mxu0 %v6080_v24  ;;  %2112 = vmatpush1.bf16.msra.mxu1 %v6081_v26  ;;  %v6091_v26 = vld [vmem:[#allocation42_spill] sm:$0xff] }
 0x58e   :  { %2072 = vmatprep.subr.bf16.mxu0 %v6082_v60  ;;  %2113 = vmatprep.subr.bf16.mxu1 %v6083_v37 }
 0x591   :  { %2073 = vmatpush1.bf16.msra.mxu0 %v6084_v53  ;;  %2114 = vmatpush1.bf16.msra.mxu1 %v6085_v61  ;;  %v1927_v53 = vadd.f32 1.0, %v3326_v58  ;;  %v6094_v58 = vld [vmem:[#allocation45_spill] sm:$0xff] }
 0x592   :  { %2074 = vmatprep.subr.bf16.mxu0 %v6086_v47  ;;  %2115 = vmatprep.subr.bf16.mxu1 %v6087_v45  ;;  %v6089_v47 = vld [vmem:[#allocation40_spill] sm:$0xff]  ;;  %v6090_v45 = vld [vmem:[#allocation41_spill] sm:$0xff] }
 0x593   :  { %3333 = vrcp.f32 %v1927_v53 }
 0x595   :  { %2075 = vmatpush1.bf16.msra.mxu0 %v6088_v57  ;;  %2116 = vmatpush1.bf16.msra.mxu1 %v4756_v42 }
 0x596   :  { %v3330_v8 = vpop.eup %3329  ;;  %2076 = vmatprep.subr.bf16.mxu0 %v4759_v19  ;;  %2117 = vmatprep.subr.bf16.mxu1 %v4762_v22  ;;  %v6092_v19 = vld [vmem:[#allocation43_spill] sm:$0xff]  ;;  %v6093_v22 = vld [vmem:[#allocation44_spill] sm:$0xff] }
 0x597   :  { %v3332_v37 = vpop.eup %3331  ;;  %v1931_v60 = vmul.f32 %v3330_v8, %v3328_v0  ;;  %v6097_v0 = vld [vmem:[#allocation49_spill] sm:$0xff]  ;;  %v4934_v8 = vld [vmem:[#allocation3 + $0xc] ss:$16 sps:$4 sm:$0xff]  }
 0x598   :  { %v1930_v61 = vmul.f32 %v3332_v37, %v4772_v35  ;;  %v6095_v35 = vld [vmem:[#allocation46_spill] sm:$0xff]  ;;  %v6096_v37 = vld [vmem:[#allocation47_spill] sm:$0xff]  ;;  %6099 = vst [vmem:[#allocation65_spill] sm:$0xff] %v4934_v8 }
 0x599   :  { %2077 = vmatpush1.bf16.msra.mxu0 %v4766_v50  ;;  %2118 = vmatpush1.bf16.msra.mxu1 %v6089_v47 }
 0x59a   :  { %2078 = vmatprep.subr.bf16.mxu0 %v6090_v45  ;;  %2119 = vmatprep.subr.bf16.mxu1 %v6091_v26  ;;  %v4918_v57 = vadd.f32 %v1931_v60, %v1930_v61  ;;  %v4931_v61 = vld [vmem:[#allocation3 + $0x4] ss:$16 sps:$4 sm:$0xff]  }
 0x59b   :  { %6098 = vst [vmem:[#allocation64_spill] sm:$0xff] %v4931_v61 }
 0x59c   :  { %3335 = vtanh.f32 %v4918_v57 }
 0x59d   :  { %2079 = vmatpush1.bf16.msra.mxu0 %v6092_v19  ;;  %2120 = vmatpush1.bf16.msra.mxu1 %v6093_v22  ;;  %v3334_v60 = vpop.eup %3333 }
 0x59e   :  { %2080 = vmatprep.subr.bf16.mxu0 %v6094_v58  ;;  %2121 = vmatprep.subr.bf16.mxu1 %v6095_v35  ;;  %v6133_v35 = vld [vmem:[#allocation24_spill] sm:$0xff] }
 0x5a1   :  { %2081 = vmatpush1.bf16.msra.mxu0 %v6096_v37  ;;  %2122 = vmatpush1.bf16.msra.mxu1 %v4796_v33 }
 0x5a2   :  { %2082 = vmatprep.subr.bf16.mxu0 %v6097_v0  ;;  %2123 = vmatprep.subr.bf16.mxu1 %v4802_v41  ;;  %v6132_v41 = vld [vmem:[#allocation21_spill] sm:$0xff] }
 0x5a5   :  { %2083 = vmatpush1.bf16.msra.mxu0 %v4805_v25  ;;  %2124 = vmatpush1.bf16.msra.mxu1 %v4808_v12  ;;  %v4939_v25 = vld [vmem:[#allocation3] ss:$16 sps:$4 sm:$0xff]   ;;  %v4942_v12 = vld [vmem:[#allocation3 + $0x8] ss:$16 sps:$4 sm:$0xff]  }
 0x5a6   :  { %v3336_v53 = vpop.eup %3335  ;;  %2164 = vmatprep.subr.bf16.mxu0 %v4931_v61  ;;  %2205 = vmatprep.subr.bf16.mxu1 %v4934_v8  ;;  %6100 = vst [vmem:[#allocation66_spill] sm:$0xff] %v4939_v25  ;;  %6101 = vst [vmem:[#allocation83_spill] sm:$0xff] %v4942_v12  ;;  %v4945_v61 = vld [vmem:[#allocation3 + $0x24] ss:$16 sps:$4 sm:$0xff]  }
 0x5a7   :  { %v1934_v37 = vmul.f32 %v3336_v53, %v3334_v60  ;;  %6102 = vst [vmem:[#allocation84_spill] sm:$0xff] %v4945_v61  ;;  %v4948_v60 = vld [vmem:[#allocation3 + $0x2c] ss:$16 sps:$4 sm:$0xff]  }
 0x5a8   :  { %6103 = vst [vmem:[#allocation85_spill] sm:$0xff] %v4948_v60  ;;  %v4962_v53 = vld [vmem:[#allocation3 + $0x4c] ss:$16 sps:$4 sm:$0xff]  }
 0x5a9   :  { %v2051_v33 = vpack.c.bf16 %v1934_v37, %v1934_v37  ;;  %v4959_v37 = vld [vmem:[#allocation3 + $0x44] ss:$16 sps:$4 sm:$0xff]   ;;  %6107 = vst [vmem:[#allocation89_spill] sm:$0xff] %v4962_v53 }
 0x5aa   :  { %6106 = vst [vmem:[#allocation88_spill] sm:$0xff] %v4959_v37 }
 0x5ab   :  { %2084 = vmatprep.mubr.bf16.mxu0 %v2051_v33  ;;  %2125 = vmatprep.mubr.bf16.mxu1 %v2051_v33  ;;  %v4953_v33 = vld [vmem:[#allocation3 + $0x20] ss:$16 sps:$4 sm:$0xff]  }
 0x5ac   :  { %2085 = vmatmul.mubr.bf16.vlgmr.msra.gmra.mrb[56].mxu0 %v4857_v9  ;;  %2126 = vmatmul.mubr.bf16.vlgmr.msra.gmra.mrb[56].mxu1 %v4857_v9  ;;  %6104 = vst [vmem:[#allocation86_spill] sm:$0xff] %v4953_v33  ;;  %v4956_v9 = vld [vmem:[#allocation3 + $0x28] ss:$16 sps:$4 sm:$0xff]  }
 0x5ad   :  { %2165 = vmatpush1.bf16.msra.mxu0 %v4939_v25  ;;  %2206 = vmatpush1.bf16.msra.mxu1 %v4942_v12  ;;  %6105 = vst [vmem:[#allocation87_spill] sm:$0xff] %v4956_v9  ;;  %v6131_v12 = vld [vmem:[#allocation23_spill] sm:$0xff] }
 0x5ae   :  { %2166 = vmatprep.subr.bf16.mxu0 %v4945_v61  ;;  %2207 = vmatprep.subr.bf16.mxu1 %v4948_v60  ;;  %v4965_v60 = vld [vmem:[#allocation3 + $0x40] ss:$16 sps:$4 sm:$0xff]  }
 0x5af   :  { %2196 = vmatprep.mubr.bf16.mxu0 %v5972_v56  ;;  %2237 = vmatprep.mubr.bf16.mxu1 %v5972_v56  ;;  %6108 = vst [vmem:[#allocation90_spill] sm:$0xff] %v4965_v60  ;;  %v4968_v56 = vld [vmem:[#allocation3 + $0x48] ss:$16 sps:$4 sm:$0xff]   ;;  %v6130_v61 = vld [vmem:[#allocation19_spill] sm:$0xff] }
 0x5b0   :  { %6109 = vst [vmem:[#allocation91_spill] sm:$0xff] %v4968_v56 }
 0x5b1   :  { %2167 = vmatpush1.bf16.msra.mxu0 %v4953_v33  ;;  %2208 = vmatpush1.bf16.msra.mxu1 %v4956_v9  ;;  %v4971_v33 = vld [vmem:[#allocation3 + $0x64] ss:$16 sps:$4 sm:$0xff]   ;;  %v4974_v9 = vld [vmem:[#allocation3 + $0x6c] ss:$16 sps:$4 sm:$0xff]  }
 0x5b2   :  { %2168 = vmatprep.subr.bf16.mxu0 %v4959_v37  ;;  %2209 = vmatprep.subr.bf16.mxu1 %v4962_v53  ;;  %6110 = vst [vmem:[#allocation92_spill] sm:$0xff] %v4971_v33  ;;  %6111 = vst [vmem:[#allocation93_spill] sm:$0xff] %v4974_v9  ;;  %v4977_v37 = vld [vmem:[#allocation3 + $0x60] ss:$16 sps:$4 sm:$0xff]   ;;  %v4980_v53 = vld [vmem:[#allocation3 + $0x68] ss:$16 sps:$4 sm:$0xff]  }
 0x5b3   :  { %6112 = vst [vmem:[#allocation11_spill] sm:$0xff] %v4977_v37  ;;  %6113 = vst [vmem:[#allocation15_spill] sm:$0xff] %v4980_v53 }
 0x5b5   :  { %2169 = vmatpush1.bf16.msra.mxu0 %v4965_v60  ;;  %2210 = vmatpush1.bf16.msra.mxu1 %v4968_v56  ;;  %v4983_v60 = vld [vmem:[#allocation3 + $0x84] ss:$16 sps:$4 sm:$0xff]   ;;  %v4986_v56 = vld [vmem:[#allocation3 + $0x8c] ss:$16 sps:$4 sm:$0xff]  }
 0x5b6   :  { %2170 = vmatprep.subr.bf16.mxu0 %v4971_v33  ;;  %2211 = vmatprep.subr.bf16.mxu1 %v4974_v9  ;;  %6114 = vst [vmem:[#allocation13_spill] sm:$0xff] %v4983_v60  ;;  %6115 = vst [vmem:[#allocation16_spill] sm:$0xff] %v4986_v56  ;;  %v4989_v33 = vld [vmem:[#allocation3 + $0x80] ss:$16 sps:$4 sm:$0xff]   ;;  %v4992_v9 = vld [vmem:[#allocation3 + $0x88] ss:$16 sps:$4 sm:$0xff]  }
 0x5b7   :  { %6116 = vst [vmem:[#allocation17_spill] sm:$0xff] %v4989_v33  ;;  %6117 = vst [vmem:[#allocation20_spill] sm:$0xff] %v4992_v9 }
 0x5b9   :  { %2171 = vmatpush1.bf16.msra.mxu0 %v4977_v37  ;;  %2212 = vmatpush1.bf16.msra.mxu1 %v4980_v53  ;;  %v4995_v37 = vld [vmem:[#allocation3 + $0xa4] ss:$16 sps:$4 sm:$0xff]   ;;  %v4998_v53 = vld [vmem:[#allocation3 + $0xac] ss:$16 sps:$4 sm:$0xff]  }
 0x5ba   :  { %2172 = vmatprep.subr.bf16.mxu0 %v4983_v60  ;;  %2213 = vmatprep.subr.bf16.mxu1 %v4986_v56  ;;  %6118 = vst [vmem:[#allocation18_spill] sm:$0xff] %v4995_v37  ;;  %6119 = vst [vmem:[#allocation22_spill] sm:$0xff] %v4998_v53  ;;  %v5001_v60 = vld [vmem:[#allocation3 + $0xa0] ss:$16 sps:$4 sm:$0xff]   ;;  %v5004_v56 = vld [vmem:[#allocation3 + $0xa8] ss:$16 sps:$4 sm:$0xff]  }
 0x5bb   :  { %6120 = vst [vmem:[#allocation9_spill] sm:$0xff] %v5001_v60  ;;  %6121 = vst [vmem:[#allocation12_spill] sm:$0xff] %v5004_v56 }
 0x5bd   :  { %2173 = vmatpush1.bf16.msra.mxu0 %v4989_v33  ;;  %2214 = vmatpush1.bf16.msra.mxu1 %v4992_v9  ;;  %v5007_v33 = vld [vmem:[#allocation3 + $0xc4] ss:$16 sps:$4 sm:$0xff]   ;;  %v5010_v9 = vld [vmem:[#allocation3 + $0xcc] ss:$16 sps:$4 sm:$0xff]  }
 0x5be   :  { %2174 = vmatprep.subr.bf16.mxu0 %v4995_v37  ;;  %2215 = vmatprep.subr.bf16.mxu1 %v4998_v53  ;;  %6122 = vst [vmem:[#allocation10_spill] sm:$0xff] %v5007_v33  ;;  %6123 = vst [vmem:[#allocation14_spill] sm:$0xff] %v5010_v9  ;;  %v5013_v37 = vld [vmem:[#allocation3 + $0xc0] ss:$16 sps:$4 sm:$0xff]   ;;  %v5016_v53 = vld [vmem:[#allocation3 + $0xc8] ss:$16 sps:$4 sm:$0xff]  }
 0x5bf   :  { %6124 = vst [vmem:[#allocation51_spill] sm:$0xff] %v5013_v37  ;;  %6125 = vst [vmem:[#allocation52_spill] sm:$0xff] %v5016_v53 }
 0x5c1   :  { %2175 = vmatpush1.bf16.msra.mxu0 %v5001_v60  ;;  %2216 = vmatpush1.bf16.msra.mxu1 %v5004_v56  ;;  %v5019_v60 = vld [vmem:[#allocation3 + $0xe4] ss:$16 sps:$4 sm:$0xff]   ;;  %v5022_v56 = vld [vmem:[#allocation3 + $0xec] ss:$16 sps:$4 sm:$0xff]  }
 0x5c2   :  { %2176 = vmatprep.subr.bf16.mxu0 %v5007_v33  ;;  %2217 = vmatprep.subr.bf16.mxu1 %v5010_v9  ;;  %6126 = vst [vmem:[#allocation53_spill] sm:$0xff] %v5019_v60  ;;  %6127 = vst [vmem:[#allocation54_spill] sm:$0xff] %v5022_v56  ;;  %v5025_v33 = vld [vmem:[#allocation3 + $0xe0] ss:$16 sps:$4 sm:$0xff]   ;;  %v5028_v9 = vld [vmem:[#allocation3 + $0xe8] ss:$16 sps:$4 sm:$0xff]  }
 0x5c3   :  { %6128 = vst [vmem:[#allocation55_spill] sm:$0xff] %v5025_v33  ;;  %6129 = vst [vmem:[#allocation56_spill] sm:$0xff] %v5028_v9 }
 0x5c5   :  { %2177 = vmatpush1.bf16.msra.mxu0 %v5013_v37  ;;  %2218 = vmatpush1.bf16.msra.mxu1 %v5016_v53 }
 0x5c6   :  { %2178 = vmatprep.subr.bf16.mxu0 %v5019_v60  ;;  %2219 = vmatprep.subr.bf16.mxu1 %v5022_v56 }
 0x5c9   :  { %2179 = vmatpush1.bf16.msra.mxu0 %v5025_v33  ;;  %2220 = vmatpush1.bf16.msra.mxu1 %v5028_v9 }
 0x5ca   :  { %2275 = vmatprep.subr.bf16.mxu0 %v4599_v18  ;;  %2316 = vmatprep.subr.bf16.mxu1 %v4602_v20 }
 0x63b   :  { %v1975_v53 = vpop.f32.mrb[52].mxu0  ;;  %v2016_v37 = vpop.f32.mrb[52].mxu1 }
 0x63c   :  { %v2023_v60 = vadd.f32 %v1975_v53, %v6130_v61  ;;  %v2025_v25 = vadd.f32 %v2016_v37, %v6131_v12  ;;  %v1977_v8 = vpop.f32.mrb[53].mxu0  ;;  %v2018_v56 = vpop.f32.mrb[53].mxu1  ;;  %v6147_v37 = vld [vmem:[#allocation41_spill] sm:$0xff]  ;;  %v6148_v53 = vld [vmem:[#allocation42_spill] sm:$0xff] }
 0x63d   :  { %v2024_v0 = vadd.f32 %v1977_v8, %v6132_v41  ;;  %v2026_v33 = vadd.f32 %v2018_v56, %v6133_v35  ;;  %v1979_v58 = vpop.f32.mrb[54].mxu0  ;;  %v2020_v22 = vpop.f32.mrb[54].mxu1 }
 0x63e   :  { %v2968_v19 = vmul.f32 -1.442695, %v2023_v60  ;;  %v1980_v9 = vpop.f32.mrb[55].mxu0  ;;  %v2021_v26 = vpop.f32.mrb[55].mxu1 }
 0x63f   :  { %v2969_v18 = vmul.f32 -1.442695, %v2024_v0  ;;  %v2970_v20 = vmul.f32 -1.442695, %v2026_v33  ;;  %v6146_v9 = vld [vmem:[#allocation40_spill] sm:$0xff] }
 0x640   :  { %3337 = vpow2.f32 %v2968_v19 }
 0x641   :  { %3339 = vpow2.f32 %v2969_v18  ;;  %v6149_v18 = vld [vmem:[#allocation43_spill] sm:$0xff] }
 0x642   :  { %3341 = vpow2.f32 %v2970_v20  ;;  %v6150_v20 = vld [vmem:[#allocation44_spill] sm:$0xff] }
 0x643   :  { %3343 = vtanh.f32 %v2025_v25 }
 0x64a   :  { %v3338_v45 = vpop.eup %3337 }
 0x64b   :  { %v3340_v47 = vpop.eup %3339  ;;  %v2030_v61 = vadd.f32 1.0, %v3338_v45 }
 0x64c   :  { %v2036_v12 = vadd.f32 1.0, %v3340_v47  ;;  %v3342_v41 = vpop.eup %3341 }
 0x64d   :  { %3345 = vrcp.f32 %v2030_v61  ;;  %v3344_v8 = vpop.eup %3343  ;;  %v2043_v35 = vadd.f32 1.0, %v3342_v41  ;;  %v6151_v61 = vld [vmem:[#allocation45_spill] sm:$0xff] }
 0x64e   :  { %3347 = vrcp.f32 %v2036_v12  ;;  %v6154_v12 = vld [vmem:[#allocation48_spill] sm:$0xff]  ;;  %v6155_v41 = vld [vmem:[#allocation49_spill] sm:$0xff] }
 0x64f   :  { %3349 = vrcp.f32 %v2043_v35  ;;  %v6159_v35 = vld [vmem:[#allocation64_spill] sm:$0xff] }
 0x657   :  { %v3346_v56 = vpop.eup %3345 }
 0x658   :  { %v3348_v58 = vpop.eup %3347  ;;  %v2047_v22 = vmul.f32 %v3346_v56, %v3344_v8  ;;  %v6156_v8 = vld [vmem:[#allocation50_spill] sm:$0xff]  ;;  %v6157_v56 = vld [vmem:[#allocation60_spill] sm:$0xff] }
 0x659   :  { %v2046_v26 = vmul.f32 %v3348_v58, %v4854_v48  ;;  %v3350_v19 = vpop.eup %3349  ;;  %v6158_v58 = vld [vmem:[#allocation63_spill] sm:$0xff] }
 0x65b   :  { %v5038_v0 = vadd.f32 %v2047_v22, %v2046_v26  ;;  %v6160_v26 = vld [vmem:[#allocation65_spill] sm:$0xff] }
 0x65d   :  { %3351 = vtanh.f32 %v5038_v0 }
 0x667   :  { %v3352_v45 = vpop.eup %3351 }
 0x668   :  { %v2050_v60 = vmul.f32 %v3352_v45, %v3350_v19 }
 0x66a   :  { %v5041_v25 = vpack.c.bf16 %v2050_v60, %v2050_v60 }
 0x66c   :  { %2197 = vmatmul.mubr.bf16.vlgmr.msra.gmra.mrb[60].mxu0 %v5041_v25  ;;  %2238 = vmatmul.mubr.bf16.vlgmr.msra.gmra.mrb[60].mxu1 %v5041_v25 }
 0x66d   :  { %2276 = vmatpush1.bf16.msra.mxu0 %v4617_v23  ;;  %2317 = vmatpush1.bf16.msra.mxu1 %v4620_v2 }
 0x66e   :  { %2277 = vmatprep.subr.bf16.mxu0 %v4623_v59  ;;  %2318 = vmatprep.subr.bf16.mxu1 %v4626_v63 }
 0x671   :  { %2278 = vmatpush1.bf16.msra.mxu0 %v4629_v6  ;;  %2319 = vmatpush1.bf16.msra.mxu1 %v4632_v17 }
 0x672   :  { %2279 = vmatprep.subr.bf16.mxu0 %v4635_v1  ;;  %2320 = vmatprep.subr.bf16.mxu1 %v6054_v27 }
 0x675   :  { %2280 = vmatpush1.bf16.msra.mxu0 %v6055_v32  ;;  %2321 = vmatpush1.bf16.msra.mxu1 %v6056_v52 }
 0x676   :  { %2281 = vmatprep.subr.bf16.mxu0 %v6057_v28  ;;  %2322 = vmatprep.subr.bf16.mxu1 %v6058_v21  ;;  %v6135_v28 = vld [vmem:[#allocation73_spill] sm:$0xff] }
 0x679   :  { %2282 = vmatpush1.bf16.msra.mxu0 %v6059_v34  ;;  %2323 = vmatpush1.bf16.msra.mxu1 %v6060_v10 }
 0x67a   :  { %2283 = vmatprep.subr.bf16.mxu0 %v6061_v43  ;;  %2324 = vmatprep.subr.bf16.mxu1 %v6062_v15  ;;  %v6136_v43 = vld [vmem:[#allocation76_spill] sm:$0xff]  ;;  %v6137_v15 = vld [vmem:[#allocation77_spill] sm:$0xff] }
 0x67d   :  { %2284 = vmatpush1.bf16.msra.mxu0 %v6063_v55  ;;  %2325 = vmatpush1.bf16.msra.mxu1 %v6064_v3  ;;  %v6138_v55 = vld [vmem:[#allocation78_spill] sm:$0xff]  ;;  %v6139_v3 = vld [vmem:[#allocation79_spill] sm:$0xff] }
 0x67e   :  { %2285 = vmatprep.subr.bf16.mxu0 %v4672_v4  ;;  %2326 = vmatprep.subr.bf16.mxu1 %v4675_v29 }
 0x67f   :  { %v2086_v23 = vpop.f32.mrb[56].mxu0  ;;  %v2127_v2 = vpop.f32.mrb[56].mxu1 }
 0x680   :  { %v2087_v59 = vadd.f32 %v2086_v23, %v6065_v16  ;;  %v2088_v63 = vpop.f32.mrb[57].mxu0  ;;  %v2129_v6 = vpop.f32.mrb[57].mxu1  ;;  %v2128_v29 = vadd.f32 %v2127_v2, %v6075_v54  ;;  %v6161_v23 = vld [vmem:[#allocation66_spill] sm:$0xff]  ;;  %v6162_v2 = vld [vmem:[#allocation83_spill] sm:$0xff] }
 0x681   :  { %v2089_v17 = vadd.f32 %v2088_v63, %v4314_v11  ;;  %v2090_v1 = vpop.f32.mrb[58].mxu0  ;;  %v2131_v48 = vpop.f32.mrb[58].mxu1  ;;  %2286 = vmatpush1.bf16.msra.mxu0 %v4679_v5  ;;  %2327 = vmatpush1.bf16.msra.mxu1 %v4682_v51  ;;  %v2130_v5 = vadd.f32 %v2129_v6, %v6068_v36  ;;  %v6134_v51 = vld [vmem:[#allocation72_spill] sm:$0xff]  ;;  %v6164_v63 = vld [vmem:[#allocation85_spill] sm:$0xff]  ;;  %v6165_v6 = vmov 0  }
 0x682   :  { %v2971_v27 = vmul.f32 -1.442695, %v2087_v59  ;;  %v2091_v32 = vpop.f32.mrb[59].mxu0  ;;  %v2132_v52 = vpop.f32.mrb[59].mxu1  ;;  %2287 = vmatprep.subr.bf16.mxu0 %v4685_v7  ;;  %2328 = vmatprep.subr.bf16.mxu1 %v4688_v40  ;;  %v6163_v59 = vld [vmem:[#allocation84_spill] sm:$0xff]  ;;  %v6167_v1 = vld [vmem:[#allocation87_spill] sm:$0xff] }
 0x683   :  { %v2972_v4 = vmul.f32 -1.442695, %v2089_v17  ;;  %v2973_v7 = vmul.f32 -1.442695, %v2130_v5  ;;  %v6166_v17 = vld [vmem:[#allocation86_spill] sm:$0xff]  ;;  %v6168_v48 = vld [vmem:[#allocation88_spill] sm:$0xff] }
 0x684   :  { %3353 = vpow2.f32 %v2971_v27  ;;  %v6169_v27 = vld [vmem:[#allocation89_spill] sm:$0xff]  ;;  %v6171_v32 = vld [vmem:[#allocation91_spill] sm:$0xff]  ;;  %v6172_v52 = vld [vmem:[#allocation92_spill] sm:$0xff] }
 0x685   :  { %3355 = vpow2.f32 %v2972_v4  ;;  %2288 = vmatpush1.bf16.msra.mxu0 %v6066_v30  ;;  %2329 = vmatpush1.bf16.msra.mxu1 %v6067_v31  ;;  %v6140_v30 = vld [vmem:[#allocation80_spill] sm:$0xff]  ;;  %v6141_v31 = vld [vmem:[#allocation35_spill] sm:$0xff]  ;;  %v6173_v4 = vld [vmem:[#allocation93_spill] sm:$0xff] }
 0x686   :  { %2289 = vmatprep.subr.bf16.mxu0 %v6069_v38  ;;  %2330 = vmatprep.subr.bf16.mxu1 %v6070_v39  ;;  %3357 = vpow2.f32 %v2973_v7  ;;  %v6142_v38 = vld [vmem:[#allocation36_spill] sm:$0xff]  ;;  %v6174_v5 = vld [vmem:[#allocation11_spill] sm:$0xff] }
 0x687   :  { %3359 = vtanh.f32 %v2128_v29  ;;  %v6175_v7 = vld [vmem:[#allocation15_spill] sm:$0xff]  ;;  %v6176_v29 = vld [vmem:[#allocation13_spill] sm:$0xff] }
 0x689   :  { %2290 = vmatpush1.bf16.msra.mxu0 %v6071_v44  ;;  %2331 = vmatpush1.bf16.msra.mxu1 %v6072_v46  ;;  %v6143_v44 = vld [vmem:[#allocation37_spill] sm:$0xff] }
 0x68a   :  { %2291 = vmatprep.subr.bf16.mxu0 %v6073_v13  ;;  %2332 = vmatprep.subr.bf16.mxu1 %v6074_v49  ;;  %v6144_v13 = vld [vmem:[#allocation38_spill] sm:$0xff]  ;;  %v6145_v49 = vld [vmem:[#allocation39_spill] sm:$0xff] }
 0x68d   :  { %2292 = vmatpush1.bf16.msra.mxu0 %v6076_v62  ;;  %2333 = vmatpush1.bf16.msra.mxu1 %v6134_v51  ;;  %v6177_v51 = vld [vmem:[#allocation16_spill] sm:$0xff] }
 0x68e   :  { %v3354_v40 = vpop.eup %3353  ;;  %2293 = vmatprep.subr.bf16.mxu0 %v6135_v28  ;;  %2334 = vmatprep.subr.bf16.mxu1 %v6079_v14  ;;  %v6179_v28 = vld [vmem:[#allocation20_spill] sm:$0xff] }
 0x68f   :  { %v3356_v21 = vpop.eup %3355  ;;  %v2137_v34 = vadd.f32 1.0, %v3354_v40  ;;  %v6178_v40 = vld [vmem:[#allocation17_spill] sm:$0xff] }
 0x690   :  { %v2143_v10 = vadd.f32 1.0, %v3356_v21  ;;  %v3358_v39 = vpop.eup %3357  ;;  %v6180_v21 = vld [vmem:[#allocation18_spill] sm:$0xff] }
 0x691   :  { %3361 = vrcp.f32 %v2137_v34  ;;  %2294 = vmatpush1.bf16.msra.mxu0 %v6080_v24  ;;  %2335 = vmatpush1.bf16.msra.mxu1 %v6136_v43  ;;  %v3360_v46 = vpop.eup %3359  ;;  %v2150_v47 = vadd.f32 1.0, %v3358_v39  ;;  %v6181_v34 = vld [vmem:[#allocation22_spill] sm:$0xff]  ;;  %v6183_v43 = vld [vmem:[#allocation12_spill] sm:$0xff]  ;;  %v6190_v39 = vld [vmem:[#allocation55_spill] sm:$0xff] }
 0x692   :  { %3363 = vrcp.f32 %v2143_v10  ;;  %2295 = vmatprep.subr.bf16.mxu0 %v6137_v15  ;;  %2336 = vmatprep.subr.bf16.mxu1 %v6138_v55  ;;  %v6182_v10 = vld [vmem:[#allocation9_spill] sm:$0xff]  ;;  %v6184_v15 = vld [vmem:[#allocation10_spill] sm:$0xff] }
 0x693   :  { %3365 = vrcp.f32 %v2150_v47  ;;  %v6185_v55 = vld [vmem:[#allocation14_spill] sm:$0xff]  ;;  %v6193_v47 = vld [vmem:[#allocation28_spill] sm:$0xff] }
 0x695   :  { %2296 = vmatpush1.bf16.msra.mxu0 %v6139_v3  ;;  %2337 = vmatpush1.bf16.msra.mxu1 %v6140_v30  ;;  %v6186_v3 = vld [vmem:[#allocation51_spill] sm:$0xff]  ;;  %v6187_v30 = vld [vmem:[#allocation52_spill] sm:$0xff] }
 0x696   :  { %2297 = vmatprep.subr.bf16.mxu0 %v6141_v31  ;;  %2338 = vmatprep.subr.bf16.mxu1 %v6142_v38  ;;  %v6188_v31 = vld [vmem:[#allocation53_spill] sm:$0xff]  ;;  %v6189_v38 = vld [vmem:[#allocation54_spill] sm:$0xff] }
 0x699   :  { %2298 = vmatpush1.bf16.msra.mxu0 %v6143_v44  ;;  %2339 = vmatpush1.bf16.msra.mxu1 %v4756_v42  ;;  %v6191_v44 = vld [vmem:[#allocation56_spill] sm:$0xff] }
 0x69a   :  { %2299 = vmatprep.subr.bf16.mxu0 %v6144_v13  ;;  %2340 = vmatprep.subr.bf16.mxu1 %v6145_v49  ;;  %v5154_v13 = vld [vmem:[#allocation5 + $0xc] ss:$16 sps:$4 sm:$0xff]  }
 0x69b   :  { %v3362_v62 = vpop.eup %3361 }
 0x69c   :  { %v3364_v14 = vpop.eup %3363  ;;  %v2154_v24 = vmul.f32 %v3362_v62, %v3360_v46  ;;  %v5151_v46 = vld [vmem:[#allocation5 + $0x4] ss:$16 sps:$4 sm:$0xff]  }
 0x69d   :  { %v2153_v33 = vmul.f32 %v3364_v14, %v4918_v57  ;;  %2300 = vmatpush1.bf16.msra.mxu0 %v4766_v50  ;;  %2341 = vmatpush1.bf16.msra.mxu1 %v6146_v9  ;;  %v6152_v57 = vld [vmem:[#allocation46_spill] sm:$0xff]  ;;  %v6153_v50 = vld [vmem:[#allocation47_spill] sm:$0xff]  ;;  %v3366_v22 = vpop.eup %3365  ;;  %v6192_v14 = vld [vmem:[#allocation25_spill] sm:$0xff] }
 0x69e   :  { %2301 = vmatprep.subr.bf16.mxu0 %v6147_v37  ;;  %2342 = vmatprep.subr.bf16.mxu1 %v6148_v53  ;;  %v6194_v53 = vld [vmem:[#allocation26_spill] sm:$0xff] }
 0x69f   :  { %v5102_v42 = vadd.f32 %v2154_v24, %v2153_v33 }
 0x6a1   :  { %2302 = vmatpush1.bf16.msra.mxu0 %v6149_v18  ;;  %2343 = vmatpush1.bf16.msra.mxu1 %v6150_v20  ;;  %3367 = vtanh.f32 %v5102_v42  ;;  %v6195_v20 = vld [vmem:[#allocation30_spill] sm:$0xff] }
 0x6a2   :  { %2303 = vmatprep.subr.bf16.mxu0 %v6151_v61  ;;  %2344 = vmatprep.subr.bf16.mxu1 %v6152_v57 }
 0x6a5   :  { %2304 = vmatpush1.bf16.msra.mxu0 %v6153_v50  ;;  %2345 = vmatpush1.bf16.msra.mxu1 %v6154_v12 }
 0x6a6   :  { %2305 = vmatprep.subr.bf16.mxu0 %v6155_v41  ;;  %2346 = vmatprep.subr.bf16.mxu1 %v6156_v8 }
 0x6a9   :  { %2306 = vmatpush1.bf16.msra.mxu0 %v6157_v56  ;;  %2347 = vmatpush1.bf16.msra.mxu1 %v6158_v58 }
 0x6aa   :  { %2387 = vmatprep.subr.bf16.mxu0 %v6159_v35  ;;  %2428 = vmatprep.subr.bf16.mxu1 %v6160_v26 }
 0x6ab   :  { %v3368_v19 = vpop.eup %3367 }
 0x6ac   :  { %v2157_v45 = vmul.f32 %v3368_v19, %v3366_v22 }
 0x6ae   :  { %v2274_v60 = vpack.c.bf16 %v2157_v45, %v2157_v45 }
 0x6b0   :  { %2307 = vmatprep.mubr.bf16.mxu0 %v2274_v60  ;;  %2348 = vmatprep.mubr.bf16.mxu1 %v2274_v60 }
 0x6b1   :  { %2308 = vmatmul.mubr.bf16.vlgmr.msra.gmra.mrb[64].mxu0 %v5041_v25  ;;  %2349 = vmatmul.mubr.bf16.vlgmr.msra.gmra.mrb[64].mxu1 %v5041_v25  ;;  %v6170_v25 = vld [vmem:[#allocation90_spill] sm:$0xff] }
 0x6b2   :  { %2388 = vmatpush1.bf16.msra.mxu0 %v6161_v23  ;;  %2429 = vmatpush1.bf16.msra.mxu1 %v6162_v2 }
 0x6b3   :  { %2389 = vmatprep.subr.bf16.mxu0 %v6163_v59  ;;  %2430 = vmatprep.subr.bf16.mxu1 %v6164_v63 }
 0x6b4   :  { %2419 = vmatprep.mubr.bf16.mxu0 %v6165_v6  ;;  %2460 = vmatprep.mubr.bf16.mxu1 %v6165_v6 }
 0x6b6   :  { %2390 = vmatpush1.bf16.msra.mxu0 %v6166_v17  ;;  %2431 = vmatpush1.bf16.msra.mxu1 %v6167_v1 }
 0x6b7   :  { %2391 = vmatprep.subr.bf16.mxu0 %v6168_v48  ;;  %2432 = vmatprep.subr.bf16.mxu1 %v6169_v27 }
 0x6ba   :  { %2392 = vmatpush1.bf16.msra.mxu0 %v6170_v25  ;;  %2433 = vmatpush1.bf16.msra.mxu1 %v6171_v32  ;;  %v5169_v32 = vld [vmem:[#allocation5] ss:$16 sps:$4 sm:$0xff]  }
 0x6bb   :  { %2393 = vmatprep.subr.bf16.mxu0 %v6172_v52  ;;  %2434 = vmatprep.subr.bf16.mxu1 %v6173_v4  ;;  %v5172_v52 = vld [vmem:[#allocation5 + $0x8] ss:$16 sps:$4 sm:$0xff]   ;;  %v5178_v4 = vld [vmem:[#allocation5 + $0x2c] ss:$16 sps:$4 sm:$0xff]  }
 0x6be   :  { %2394 = vmatpush1.bf16.msra.mxu0 %v6174_v5  ;;  %2435 = vmatpush1.bf16.msra.mxu1 %v6175_v7  ;;  %v5181_v5 = vld [vmem:[#allocation5 + $0x20] ss:$16 sps:$4 sm:$0xff]   ;;  %v5184_v7 = vld [vmem:[#allocation5 + $0x28] ss:$16 sps:$4 sm:$0xff]  }
 0x6bf   :  { %2395 = vmatprep.subr.bf16.mxu0 %v6176_v29  ;;  %2436 = vmatprep.subr.bf16.mxu1 %v6177_v51  ;;  %v5187_v29 = vld [vmem:[#allocation5 + $0x44] ss:$16 sps:$4 sm:$0xff]   ;;  %v5190_v51 = vld [vmem:[#allocation5 + $0x4c] ss:$16 sps:$4 sm:$0xff]  }
 0x6c2   :  { %2396 = vmatpush1.bf16.msra.mxu0 %v6178_v40  ;;  %2437 = vmatpush1.bf16.msra.mxu1 %v6179_v28  ;;  %v5193_v40 = vld [vmem:[#allocation5 + $0x40] ss:$16 sps:$4 sm:$0xff]   ;;  %v5196_v28 = vld [vmem:[#allocation5 + $0x48] ss:$16 sps:$4 sm:$0xff]  }
 0x6c3   :  { %2397 = vmatprep.subr.bf16.mxu0 %v6180_v21  ;;  %2438 = vmatprep.subr.bf16.mxu1 %v6181_v34  ;;  %v5199_v21 = vld [vmem:[#allocation5 + $0x64] ss:$16 sps:$4 sm:$0xff]   ;;  %v5202_v34 = vld [vmem:[#allocation5 + $0x6c] ss:$16 sps:$4 sm:$0xff]  }
 0x6c6   :  { %2398 = vmatpush1.bf16.msra.mxu0 %v6182_v10  ;;  %2439 = vmatpush1.bf16.msra.mxu1 %v6183_v43  ;;  %v5205_v10 = vld [vmem:[#allocation5 + $0x60] ss:$16 sps:$4 sm:$0xff]   ;;  %v5208_v43 = vld [vmem:[#allocation5 + $0x68] ss:$16 sps:$4 sm:$0xff]  }
 0x6c7   :  { %2399 = vmatprep.subr.bf16.mxu0 %v6184_v15  ;;  %2440 = vmatprep.subr.bf16.mxu1 %v6185_v55  ;;  %v5211_v15 = vld [vmem:[#allocation5 + $0x84] ss:$16 sps:$4 sm:$0xff]   ;;  %v5214_v55 = vld [vmem:[#allocation5 + $0x8c] ss:$16 sps:$4 sm:$0xff]  }
 0x6ca   :  { %2400 = vmatpush1.bf16.msra.mxu0 %v6186_v3  ;;  %2441 = vmatpush1.bf16.msra.mxu1 %v6187_v30  ;;  %v5217_v3 = vld [vmem:[#allocation5 + $0x80] ss:$16 sps:$4 sm:$0xff]   ;;  %v5220_v30 = vld [vmem:[#allocation5 + $0x88] ss:$16 sps:$4 sm:$0xff]  }
 0x6cb   :  { %2401 = vmatprep.subr.bf16.mxu0 %v6188_v31  ;;  %2442 = vmatprep.subr.bf16.mxu1 %v6189_v38  ;;  %v5223_v31 = vld [vmem:[#allocation5 + $0xa4] ss:$16 sps:$4 sm:$0xff]   ;;  %v5226_v38 = vld [vmem:[#allocation5 + $0xac] ss:$16 sps:$4 sm:$0xff]  }
 0x6ce   :  { %2402 = vmatpush1.bf16.msra.mxu0 %v6190_v39  ;;  %2443 = vmatpush1.bf16.msra.mxu1 %v6191_v44 }
 0x6cf   :  { %2498 = vmatprep.subr.bf16.mxu0 %v5151_v46  ;;  %2539 = vmatprep.subr.bf16.mxu1 %v5154_v13 }
 0x73f   :  { %v2198_v49 = vpop.f32.mrb[60].mxu0  ;;  %v2239_v62 = vpop.f32.mrb[60].mxu1 }
 0x740   :  { %v2246_v24 = vadd.f32 %v2198_v49, %v6192_v14  ;;  %v2248_v33 = vadd.f32 %v2239_v62, %v6193_v47  ;;  %v2200_v9 = vpop.f32.mrb[61].mxu0  ;;  %v2241_v37 = vpop.f32.mrb[61].mxu1  ;;  %v5233_v47 = vld [vmem:[#allocation5 + $0xa8] ss:$16 sps:$4 sm:$0xff]  }
 0x741   :  { %v2247_v18 = vadd.f32 %v2200_v9, %v6194_v53  ;;  %v2249_v61 = vadd.f32 %v2241_v37, %v6195_v20  ;;  %v2202_v57 = vpop.f32.mrb[62].mxu0  ;;  %v2243_v50 = vpop.f32.mrb[62].mxu1  ;;  %v5237_v53 = vld [vmem:[#allocation5 + $0xc4] ss:$16 sps:$4 sm:$0xff]  }
 0x742   :  { %v2974_v12 = vmul.f32 -1.442695, %v2246_v24  ;;  %v2203_v41 = vpop.f32.mrb[63].mxu0  ;;  %v2244_v8 = vpop.f32.mrb[63].mxu1  ;;  %v5230_v24 = vld [vmem:[#allocation5 + $0xa0] ss:$16 sps:$4 sm:$0xff]  }
 0x743   :  { %v2975_v56 = vmul.f32 -1.442695, %v2247_v18  ;;  %v2976_v58 = vmul.f32 -1.442695, %v2249_v61  ;;  %v5240_v18 = vld [vmem:[#allocation5 + $0xcc] ss:$16 sps:$4 sm:$0xff]  }
 0x744   :  { %3369 = vpow2.f32 %v2974_v12  ;;  %v5243_v12 = vld [vmem:[#allocation5 + $0xc0] ss:$16 sps:$4 sm:$0xff]   ;;  %v5246_v41 = vld [vmem:[#allocation5 + $0xc8] ss:$16 sps:$4 sm:$0xff]   ;;  %v5249_v8 = vld [vmem:[#allocation5 + $0xe4] ss:$16 sps:$4 sm:$0xff]  }
 0x745   :  { %3371 = vpow2.f32 %v2975_v56  ;;  %v5252_v56 = vld [vmem:[#allocation5 + $0xec] ss:$16 sps:$4 sm:$0xff]  }
 0x746   :  { %3373 = vpow2.f32 %v2976_v58 }
 0x747   :  { %3375 = vtanh.f32 %v2248_v33 }
 0x74e   :  { %v3370_v22 = vpop.eup %3369 }
 0x74f   :  { %v3372_v35 = vpop.eup %3371  ;;  %v2253_v26 = vadd.f32 1.0, %v3370_v22  ;;  %v5256_v22 = vld [vmem:[#allocation5 + $0xe0] ss:$16 sps:$4 sm:$0xff]  }
 0x750   :  { %v2259_v19 = vadd.f32 1.0, %v3372_v35  ;;  %v3374_v45 = vpop.eup %3373  ;;  %v5259_v35 = vld [vmem:[#allocation5 + $0xe8] ss:$16 sps:$4 sm:$0xff]  }
 0x751   :  { %3377 = vrcp.f32 %v2253_v26  ;;  %v3376_v60 = vpop.eup %3375  ;;  %v2266_v63 = vadd.f32 1.0, %v3374_v45  ;;  %v5262_v26 = vld [vmem:[#allocation5 + $0x104] ss:$16 sps:$4 sm:$0xff]  }
 0x752   :  { %3379 = vrcp.f32 %v2259_v19  ;;  %v5265_v19 = vld [vmem:[#allocation5 + $0x10c] ss:$16 sps:$4 sm:$0xff]  }
 0x753   :  { %3381 = vrcp.f32 %v2266_v63  ;;  %v5278_v63 = vld [vmem:[#allocation5 + $0x12c] ss:$16 sps:$4 sm:$0xff]  }
 0x75b   :  { %v3378_v23 = vpop.eup %3377 }
 0x75c   :  { %v3380_v2 = vpop.eup %3379  ;;  %v2270_v59 = vmul.f32 %v3378_v23, %v3376_v60  ;;  %v5269_v23 = vld [vmem:[#allocation5 + $0x100] ss:$16 sps:$4 sm:$0xff]  }
 0x75d   :  { %v2269_v6 = vmul.f32 %v3380_v2, %v5038_v0  ;;  %v3382_v1 = vpop.eup %3381  ;;  %v5175_v0 = vld [vmem:[#allocation5 + $0x24] ss:$16 sps:$4 sm:$0xff]   ;;  %v5272_v2 = vld [vmem:[#allocation5 + $0x108] ss:$16 sps:$4 sm:$0xff]  }
 0x75f   :  { %v5162_v17 = vadd.f32 %v2270_v59, %v2269_v6  ;;  %v5275_v59 = vld [vmem:[#allocation5 + $0x124] ss:$16 sps:$4 sm:$0xff]  }
 0x761   :  { %6196 = vst [vmem:[#allocation57_spill] sm:$0xff] %v5162_v17  ;;  %3383 = vtanh.f32 %v5162_v17  ;;  %v5354_v17 = vld [vmem:[#allocation5 + $0x1ec] ss:$16 sps:$4 sm:$0xff]  }
 0x76b   :  { %v3384_v48 = vpop.eup %3383 }
 0x76c   :  { %v2273_v27 = vmul.f32 %v3384_v48, %v3382_v1 }
 0x76e   :  { %v5165_v25 = vpack.c.bf16 %v2273_v27, %v2273_v27 }
 0x770   :  { %2420 = vmatmul.mubr.bf16.vlgmr.msra.gmra.mrb[68].mxu0 %v5165_v25  ;;  %2461 = vmatmul.mubr.bf16.vlgmr.msra.gmra.mrb[68].mxu1 %v5165_v25 }
 0x771   :  { %2499 = vmatpush1.bf16.msra.mxu0 %v5169_v32  ;;  %2540 = vmatpush1.bf16.msra.mxu1 %v5172_v52 }
 0x772   :  { %2500 = vmatprep.subr.bf16.mxu0 %v5175_v0  ;;  %2541 = vmatprep.subr.bf16.mxu1 %v5178_v4 }
 0x775   :  { %2501 = vmatpush1.bf16.msra.mxu0 %v5181_v5  ;;  %2542 = vmatpush1.bf16.msra.mxu1 %v5184_v7 }
 0x776   :  { %2502 = vmatprep.subr.bf16.mxu0 %v5187_v29  ;;  %2543 = vmatprep.subr.bf16.mxu1 %v5190_v51 }
 0x779   :  { %2503 = vmatpush1.bf16.msra.mxu0 %v5193_v40  ;;  %2544 = vmatpush1.bf16.msra.mxu1 %v5196_v28 }
 0x77a   :  { %2504 = vmatprep.subr.bf16.mxu0 %v5199_v21  ;;  %2545 = vmatprep.subr.bf16.mxu1 %v5202_v34 }
 0x77d   :  { %2505 = vmatpush1.bf16.msra.mxu0 %v5205_v10  ;;  %2546 = vmatpush1.bf16.msra.mxu1 %v5208_v43 }
 0x77e   :  { %2506 = vmatprep.subr.bf16.mxu0 %v5211_v15  ;;  %2547 = vmatprep.subr.bf16.mxu1 %v5214_v55 }
 0x781   :  { %2507 = vmatpush1.bf16.msra.mxu0 %v5217_v3  ;;  %2548 = vmatpush1.bf16.msra.mxu1 %v5220_v30 }
 0x782   :  { %2508 = vmatprep.subr.bf16.mxu0 %v5223_v31  ;;  %2549 = vmatprep.subr.bf16.mxu1 %v5226_v38 }
 0x784   :  { %v2309_v39 = vpop.f32.mrb[64].mxu0  ;;  %v2350_v44 = vpop.f32.mrb[64].mxu1 }
 0x785   :  { %v2310_v49 = vadd.f32 %v2309_v39, %v6065_v16  ;;  %v2311_v62 = vpop.f32.mrb[65].mxu0  ;;  %v2352_v14 = vpop.f32.mrb[65].mxu1  ;;  %2509 = vmatpush1.bf16.msra.mxu0 %v5230_v24  ;;  %2550 = vmatpush1.bf16.msra.mxu1 %v5233_v47  ;;  %v2351_v60 = vadd.f32 %v2350_v44, %v6075_v54  ;;  %v5281_v39 = vld [vmem:[#allocation5 + $0x120] ss:$16 sps:$4 sm:$0xff]   ;;  %v5284_v44 = vld [vmem:[#allocation5 + $0x128] ss:$16 sps:$4 sm:$0xff]  }
 0x786   :  { %v2312_v33 = vadd.f32 %v2311_v62, %v4314_v11  ;;  %v2313_v9 = vpop.f32.mrb[66].mxu0  ;;  %v2354_v37 = vpop.f32.mrb[66].mxu1  ;;  %2510 = vmatprep.subr.bf16.mxu0 %v5237_v53  ;;  %2551 = vmatprep.subr.bf16.mxu1 %v5240_v18  ;;  %v2353_v58 = vadd.f32 %v2352_v14, %v6068_v36  ;;  %v5290_v62 = vld [vmem:[#allocation5 + $0x14c] ss:$16 sps:$4 sm:$0xff]   ;;  %v5293_v14 = vld [vmem:[#allocation5 + $0x140] ss:$16 sps:$4 sm:$0xff]  }
 0x787   :  { %v2977_v20 = vmul.f32 -1.442695, %v2310_v49  ;;  %v2314_v61 = vpop.f32.mrb[67].mxu0  ;;  %v2355_v57 = vpop.f32.mrb[67].mxu1  ;;  %v5287_v49 = vld [vmem:[#allocation5 + $0x144] ss:$16 sps:$4 sm:$0xff]  }
 0x788   :  { %v2978_v50 = vmul.f32 -1.442695, %v2312_v33  ;;  %v2979_v45 = vmul.f32 -1.442695, %v2353_v58  ;;  %v5296_v33 = vld [vmem:[#allocation5 + $0x148] ss:$16 sps:$4 sm:$0xff]  }
 0x789   :  { %3385 = vpow2.f32 %v2977_v20  ;;  %2511 = vmatpush1.bf16.msra.mxu0 %v5243_v12  ;;  %2552 = vmatpush1.bf16.msra.mxu1 %v5246_v41  ;;  %v5299_v9 = vld [vmem:[#allocation5 + $0x164] ss:$16 sps:$4 sm:$0xff]   ;;  %v5302_v37 = vld [vmem:[#allocation5 + $0x16c] ss:$16 sps:$4 sm:$0xff]   ;;  %v5305_v20 = vld [vmem:[#allocation5 + $0x160] ss:$16 sps:$4 sm:$0xff]  }
 0x78a   :  { %3387 = vpow2.f32 %v2978_v50  ;;  %2512 = vmatprep.subr.bf16.mxu0 %v5249_v8  ;;  %2553 = vmatprep.subr.bf16.mxu1 %v5252_v56  ;;  %v5308_v61 = vld [vmem:[#allocation5 + $0x168] ss:$16 sps:$4 sm:$0xff]   ;;  %v5311_v50 = vld [vmem:[#allocation5 + $0x184] ss:$16 sps:$4 sm:$0xff]   ;;  %v5314_v58 = vld [vmem:[#allocation5 + $0x18c] ss:$16 sps:$4 sm:$0xff]  }
 0x78b   :  { %3389 = vpow2.f32 %v2979_v45  ;;  %v5320_v54 = vld [vmem:[#allocation5 + $0x188] ss:$16 sps:$4 sm:$0xff]   ;;  %v5324_v11 = vld [vmem:[#allocation5 + $0x1a4] ss:$16 sps:$4 sm:$0xff]   ;;  %v5327_v16 = vld [vmem:[#allocation5 + $0x1ac] ss:$16 sps:$4 sm:$0xff]  }
 0x78c   :  { %3391 = vtanh.f32 %v2351_v60 }
 0x78d   :  { %2513 = vmatpush1.bf16.msra.mxu0 %v5256_v22  ;;  %2554 = vmatpush1.bf16.msra.mxu1 %v5259_v35 }
 0x78e   :  { %2514 = vmatprep.subr.bf16.mxu0 %v5262_v26  ;;  %2555 = vmatprep.subr.bf16.mxu1 %v5265_v19 }
 0x791   :  { %2515 = vmatpush1.bf16.msra.mxu0 %v5269_v23  ;;  %2556 = vmatpush1.bf16.msra.mxu1 %v5272_v2 }
 0x792   :  { %2516 = vmatprep.subr.bf16.mxu0 %v5275_v59  ;;  %2557 = vmatprep.subr.bf16.mxu1 %v5278_v63 }
 0x793   :  { %v3386_v6 = vpop.eup %3385 }
 0x794   :  { %v3388_v1 = vpop.eup %3387  ;;  %v2360_v48 = vadd.f32 1.0, %v3386_v6 }
 0x795   :  { %v2366_v27 = vadd.f32 1.0, %v3388_v1  ;;  %2517 = vmatpush1.bf16.msra.mxu0 %v5281_v39  ;;  %2558 = vmatpush1.bf16.msra.mxu1 %v5284_v44  ;;  %v3390_v57 = vpop.eup %3389 }
 0x796   :  { %3393 = vrcp.f32 %v2360_v48  ;;  %2518 = vmatprep.subr.bf16.mxu0 %v5287_v49  ;;  %2559 = vmatprep.subr.bf16.mxu1 %v5290_v62  ;;  %v3392_v45 = vpop.eup %3391  ;;  %v2373_v48 = vadd.f32 1.0, %v3390_v57  ;;  %v5332_v57 = vld [vmem:[#allocation5 + $0x1a0] ss:$16 sps:$4 sm:$0xff]  }
 0x797   :  { %3395 = vrcp.f32 %v2366_v27  ;;  %v5317_v27 = vld [vmem:[#allocation5 + $0x180] ss:$16 sps:$4 sm:$0xff]  }
 0x798   :  { %3397 = vrcp.f32 %v2373_v48  ;;  %v5351_v48 = vld [vmem:[#allocation5 + $0x1e4] ss:$16 sps:$4 sm:$0xff]  }
 0x799   :  { %2519 = vmatpush1.bf16.msra.mxu0 %v5293_v14  ;;  %2560 = vmatpush1.bf16.msra.mxu1 %v5296_v33  ;;  %6202 = vst [vmem:[#allocation68_spill] sm:$0xff] %v5351_v48 }
 0x79a   :  { %2520 = vmatprep.subr.bf16.mxu0 %v5299_v9  ;;  %2561 = vmatprep.subr.bf16.mxu1 %v5302_v37 }
 0x79d   :  { %2521 = vmatpush1.bf16.msra.mxu0 %v5305_v20  ;;  %2562 = vmatpush1.bf16.msra.mxu1 %v5308_v61 }
 0x79e   :  { %2522 = vmatprep.subr.bf16.mxu0 %v5311_v50  ;;  %2563 = vmatprep.subr.bf16.mxu1 %v5314_v58 }
 0x7a0   :  { %v3394_v60 = vpop.eup %3393 }
 0x7a1   :  { %v3396_v6 = vpop.eup %3395  ;;  %v2377_v1 = vmul.f32 %v3394_v60, %v3392_v45  ;;  %2523 = vmatpush1.bf16.msra.mxu0 %v5317_v27  ;;  %2564 = vmatpush1.bf16.msra.mxu1 %v5320_v54  ;;  %v5335_v60 = vld [vmem:[#allocation5 + $0x1a8] ss:$16 sps:$4 sm:$0xff]  }
 0x7a2   :  { %v2376_v36 = vmul.f32 %v3396_v6, %v5102_v42  ;;  %2524 = vmatprep.subr.bf16.mxu0 %v5324_v11  ;;  %2565 = vmatprep.subr.bf16.mxu1 %v5327_v16  ;;  %v5338_v42 = vld [vmem:[#allocation5 + $0x1c4] ss:$16 sps:$4 sm:$0xff]   ;;  %v5341_v6 = vld [vmem:[#allocation5 + $0x1cc] ss:$16 sps:$4 sm:$0xff]  }
 0x7a3   :  { %6198 = vst [vmem:[#allocation59_spill] sm:$0xff] %v5338_v42  ;;  %6199 = vst [vmem:[#allocation61_spill] sm:$0xff] %v5341_v6 }
 0x7a4   :  { %v5330_v45 = vadd.f32 %v2377_v1, %v2376_v36  ;;  %v5345_v36 = vld [vmem:[#allocation5 + $0x1c0] ss:$16 sps:$4 sm:$0xff]   ;;  %v5348_v1 = vld [vmem:[#allocation5 + $0x1c8] ss:$16 sps:$4 sm:$0xff]  }
 0x7a5   :  { %2525 = vmatpush1.bf16.msra.mxu0 %v5332_v57  ;;  %2566 = vmatpush1.bf16.msra.mxu1 %v5335_v60  ;;  %6200 = vst [vmem:[#allocation62_spill] sm:$0xff] %v5345_v36  ;;  %6201 = vst [vmem:[#allocation67_spill] sm:$0xff] %v5348_v1 }
 0x7a6   :  { %6197 = vst [vmem:[#allocation58_spill] sm:$0xff] %v5330_v45  ;;  %2526 = vmatprep.subr.bf16.mxu0 %v5338_v42  ;;  %2567 = vmatprep.subr.bf16.mxu1 %v5341_v6  ;;  %3399 = vtanh.f32 %v5330_v45  ;;  %v5357_v42 = vld [vmem:[#allocation5 + $0x1e0] ss:$16 sps:$4 sm:$0xff]   ;;  %v5360_v45 = vld [vmem:[#allocation5 + $0x1e8] ss:$16 sps:$4 sm:$0xff]  }
 0x7a9   :  { %2527 = vmatpush1.bf16.msra.mxu0 %v5345_v36  ;;  %2568 = vmatpush1.bf16.msra.mxu1 %v5348_v1  ;;  %v3398_v1 = vpop.eup %3397 }
 0x7aa   :  { %2528 = vmatprep.subr.bf16.mxu0 %v5351_v48  ;;  %2569 = vmatprep.subr.bf16.mxu1 %v5354_v17 }
 0x7ad   :  { %2529 = vmatpush1.bf16.msra.mxu0 %v5357_v42  ;;  %2570 = vmatpush1.bf16.msra.mxu1 %v5360_v45 }
 0x7ae   :  { %2606 = vmatprep.subr.bf16.mxu0 %v5151_v46  ;;  %2647 = vmatprep.subr.bf16.mxu1 %v5154_v13  ;;  %v6203_v46 = vld [vmem:[#allocation59_spill] sm:$0xff]  ;;  %v6204_v13 = vld [vmem:[#allocation61_spill] sm:$0xff] }
 0x7b0   :  { %v3400_v36 = vpop.eup %3399 }
 0x7b1   :  { %v2380_v6 = vmul.f32 %v3400_v36, %v3398_v1 }
 0x7b3   :  { %v2497_v48 = vpack.c.bf16 %v2380_v6, %v2380_v6 }
 0x7b5   :  { %2530 = vmatprep.mubr.bf16.mxu0 %v2497_v48  ;;  %2571 = vmatprep.mubr.bf16.mxu1 %v2497_v48 }
 0x7b6   :  { %2531 = vmatmul.mubr.bf16.vlgmr.msra.gmra.mrb[72].mxu0 %v5165_v25  ;;  %2572 = vmatmul.mubr.bf16.vlgmr.msra.gmra.mrb[72].mxu1 %v5165_v25  ;;  %v6205_v25 = vld [vmem:[#allocation62_spill] sm:$0xff] }
 0x7b7   :  { %2607 = vmatpush1.bf16.msra.mxu0 %v5169_v32  ;;  %2648 = vmatpush1.bf16.msra.mxu1 %v5172_v52  ;;  %v6206_v32 = vld [vmem:[#allocation67_spill] sm:$0xff]  ;;  %v6207_v52 = vld [vmem:[#allocation68_spill] sm:$0xff] }
 0x7b8   :  { %2608 = vmatprep.subr.bf16.mxu0 %v5175_v0  ;;  %2649 = vmatprep.subr.bf16.mxu1 %v5178_v4  ;;  %v6209_v4 = vld [vmem:[#allocation31_spill] sm:$0xff] }
 0x7bb   :  { %2609 = vmatpush1.bf16.msra.mxu0 %v5181_v5  ;;  %2650 = vmatpush1.bf16.msra.mxu1 %v5184_v7 }
 0x7bc   :  { %2610 = vmatprep.subr.bf16.mxu0 %v5187_v29  ;;  %2651 = vmatprep.subr.bf16.mxu1 %v5190_v51  ;;  %v6210_v51 = vld [vmem:[#allocation29_spill] sm:$0xff] }
 0x7bf   :  { %2611 = vmatpush1.bf16.msra.mxu0 %v5193_v40  ;;  %2652 = vmatpush1.bf16.msra.mxu1 %v5196_v28  ;;  %v6211_v28 = vld [vmem:[#allocation32_spill] sm:$0xff] }
 0x7c0   :  { %2612 = vmatprep.subr.bf16.mxu0 %v5199_v21  ;;  %2653 = vmatprep.subr.bf16.mxu1 %v5202_v34 }
 0x7c3   :  { %2613 = vmatpush1.bf16.msra.mxu0 %v5205_v10  ;;  %2654 = vmatpush1.bf16.msra.mxu1 %v5208_v43 }
 0x7c4   :  { %2614 = vmatprep.subr.bf16.mxu0 %v5211_v15  ;;  %2655 = vmatprep.subr.bf16.mxu1 %v5214_v55 }
 0x7c7   :  { %2615 = vmatpush1.bf16.msra.mxu0 %v5217_v3  ;;  %2656 = vmatpush1.bf16.msra.mxu1 %v5220_v30 }
 0x7c8   :  { %2616 = vmatprep.subr.bf16.mxu0 %v5223_v31  ;;  %2657 = vmatprep.subr.bf16.mxu1 %v5226_v38 }
 0x7cb   :  { %2617 = vmatpush1.bf16.msra.mxu0 %v5230_v24  ;;  %2658 = vmatpush1.bf16.msra.mxu1 %v5233_v47 }
 0x7cc   :  { %2618 = vmatprep.subr.bf16.mxu0 %v5237_v53  ;;  %2659 = vmatprep.subr.bf16.mxu1 %v5240_v18 }
 0x7cf   :  { %2619 = vmatpush1.bf16.msra.mxu0 %v5243_v12  ;;  %2660 = vmatpush1.bf16.msra.mxu1 %v5246_v41 }
 0x7d0   :  { %2620 = vmatprep.subr.bf16.mxu0 %v5249_v8  ;;  %2661 = vmatprep.subr.bf16.mxu1 %v5252_v56  ;;  %v6212_v56 = vld [vmem:[#allocation57_spill] sm:$0xff] }
 0x7d3   :  { %2621 = vmatpush1.bf16.msra.mxu0 %v5256_v22  ;;  %2662 = vmatpush1.bf16.msra.mxu1 %v5259_v35 }
 0x7d4   :  { %2622 = vmatprep.subr.bf16.mxu0 %v5262_v26  ;;  %2663 = vmatprep.subr.bf16.mxu1 %v5265_v19 }
 0x7d7   :  { %2623 = vmatpush1.bf16.msra.mxu0 %v5269_v23  ;;  %2664 = vmatpush1.bf16.msra.mxu1 %v5272_v2 }
 0x7d8   :  { %2624 = vmatprep.subr.bf16.mxu0 %v5275_v59  ;;  %2665 = vmatprep.subr.bf16.mxu1 %v5278_v63  ;;  %v6213_v63 = vld [vmem:[#allocation81_spill] sm:$0xff] }
 0x7db   :  { %2625 = vmatpush1.bf16.msra.mxu0 %v5281_v39  ;;  %2666 = vmatpush1.bf16.msra.mxu1 %v5284_v44 }
 0x7dc   :  { %2626 = vmatprep.subr.bf16.mxu0 %v5287_v49  ;;  %2667 = vmatprep.subr.bf16.mxu1 %v5290_v62  ;;  %v6214_v62 = vld [vmem:[#allocation82_spill] sm:$0xff] }
 0x7df   :  { %2627 = vmatpush1.bf16.msra.mxu0 %v5293_v14  ;;  %2668 = vmatpush1.bf16.msra.mxu1 %v5296_v33 }
 0x7e0   :  { %2628 = vmatprep.subr.bf16.mxu0 %v5299_v9  ;;  %2669 = vmatprep.subr.bf16.mxu1 %v5302_v37 }
 0x7e3   :  { %2629 = vmatpush1.bf16.msra.mxu0 %v5305_v20  ;;  %2670 = vmatpush1.bf16.msra.mxu1 %v5308_v61 }
 0x7e4   :  { %2630 = vmatprep.subr.bf16.mxu0 %v5311_v50  ;;  %2671 = vmatprep.subr.bf16.mxu1 %v5314_v58  ;;  %v6215_v58 = vld [vmem:[#allocation33_spill] sm:$0xff] }
 0x7e7   :  { %2631 = vmatpush1.bf16.msra.mxu0 %v5317_v27  ;;  %2672 = vmatpush1.bf16.msra.mxu1 %v5320_v54  ;;  %v6208_v54 = vld [vmem:[#allocation27_spill] sm:$0xff] }
 0x7e8   :  { %2632 = vmatprep.subr.bf16.mxu0 %v5324_v11  ;;  %2673 = vmatprep.subr.bf16.mxu1 %v5327_v16 }
 0x7eb   :  { %2633 = vmatpush1.bf16.msra.mxu0 %v5332_v57  ;;  %2674 = vmatpush1.bf16.msra.mxu1 %v5335_v60  ;;  %v6216_v57 = vld [vmem:[#allocation34_spill] sm:$0xff] }
 0x7ec   :  { %2634 = vmatprep.subr.bf16.mxu0 %v6203_v46  ;;  %2675 = vmatprep.subr.bf16.mxu1 %v6204_v13 }
 0x7ef   :  { %2635 = vmatpush1.bf16.msra.mxu0 %v6205_v25  ;;  %2676 = vmatpush1.bf16.msra.mxu1 %v6206_v32 }
 0x7f0   :  { %2636 = vmatprep.subr.bf16.mxu0 %v6207_v52  ;;  %2677 = vmatprep.subr.bf16.mxu1 %v5354_v17 }
 0x7f3   :  { %2637 = vmatpush1.bf16.msra.mxu0 %v5357_v42  ;;  %2678 = vmatpush1.bf16.msra.mxu1 %v5360_v45 }
 0x843   :  { %v2421_v11 = vpop.f32.mrb[68].mxu0  ;;  %v2462_v16 = vpop.f32.mrb[68].mxu1 }
 0x844   :  { %v2469_v0 = vadd.f32 %v2421_v11, %v6208_v54  ;;  %v2471_v5 = vadd.f32 %v2462_v16, %v6209_v4  ;;  %v2423_v7 = vpop.f32.mrb[69].mxu0  ;;  %v2464_v29 = vpop.f32.mrb[69].mxu1  ;;  %v6217_v11 = vld [vmem:[#allocation58_spill] sm:$0xff] }
 0x845   :  { %v2470_v40 = vadd.f32 %v2423_v7, %v6210_v51  ;;  %v2472_v21 = vadd.f32 %v2464_v29, %v6211_v28  ;;  %v2425_v34 = vpop.f32.mrb[70].mxu0  ;;  %v2466_v10 = vpop.f32.mrb[70].mxu1  ;;  %v3185_v51 = vld [vmem:[%s5483_s6] sm:$0xff]   ;;  %v3186_v28 = vld [vmem:[%s5483_s6 + $0x8] sm:$0xff]  }
 0x846   :  { %v2980_v43 = vmul.f32 -1.442695, %v2469_v0  ;;  %v2426_v17 = vpop.f32.mrb[71].mxu0  ;;  %v2467_v15 = vpop.f32.mrb[71].mxu1  ;;  %v3188_v34 = vld [vmem:[%s5483_s6 + $0x18] sm:$0xff]   ;;  %v3189_v10 = vld [vmem:[%s5483_s6 + $0x20] sm:$0xff]  }
 0x847   :  { %v2981_v55 = vmul.f32 -1.442695, %v2470_v40  ;;  %v2982_v3 = vmul.f32 -1.442695, %v2472_v21  ;;  %v3696_v40 = vmov 0.0   ;;  %v3187_v21 = vld [vmem:[%s5483_s6 + $0x10] sm:$0xff]  }
 0x848   :  { %3401 = vpow2.f32 %v2980_v43  ;;  %3007 = vmatprep.subr.bf16.mxu0 %v3696_v40  ;;  %v3190_v43 = vld [vmem:[%s5483_s6 + $0x28] sm:$0xff]   ;;  %v3191_v17 = vld [vmem:[%s5483_s6 + $0x30] sm:$0xff]   ;;  %v3192_v15 = vld [vmem:[%s5483_s6 + $0x38] sm:$0xff]  }
 0x849   :  { %3403 = vpow2.f32 %v2981_v55 }
 0x84a   :  { %3405 = vpow2.f32 %v2982_v3 }
 0x84b   :  { %3407 = vtanh.f32 %v2471_v5 }
 0x852   :  { %v3402_v30 = vpop.eup %3401 }
 0x853   :  { %v3404_v31 = vpop.eup %3403  ;;  %v2476_v38 = vadd.f32 1.0, %v3402_v30 }
 0x854   :  { %v2482_v24 = vadd.f32 1.0, %v3404_v31  ;;  %v3406_v47 = vpop.eup %3405 }
 0x855   :  { %3409 = vrcp.f32 %v2476_v38  ;;  %v3408_v53 = vpop.eup %3407  ;;  %v2489_v8 = vadd.f32 1.0, %v3406_v47 }
 0x856   :  { %3411 = vrcp.f32 %v2482_v24 }
 0x857   :  { %3413 = vrcp.f32 %v2489_v8 }
 0x85f   :  { %v3410_v18 = vpop.eup %3409 }
 0x860   :  { %v3412_v12 = vpop.eup %3411  ;;  %v2493_v41 = vmul.f32 %v3410_v18, %v3408_v53 }
 0x861   :  { %v2492_v22 = vmul.f32 %v3412_v12, %v6212_v56  ;;  %v3414_v26 = vpop.eup %3413 }
 0x863   :  { %v2494_v35 = vadd.f32 %v2493_v41, %v2492_v22 }
 0x865   :  { %3415 = vtanh.f32 %v2494_v35 }
 0x86f   :  { %v3416_v19 = vpop.eup %3415 }
 0x870   :  { %v2496_v23 = vmul.f32 %v3416_v19, %v3414_v26 }
 0x872   :  { %v2604_v29 = vpack.c.bf16 %v2496_v23, %v2496_v23 }
 0x889   :  { %v2532_v2 = vpop.f32.mrb[72].mxu0  ;;  %v2573_v59 = vpop.f32.mrb[72].mxu1 }
 0x88a   :  { %v2533_v39 = vadd.f32 %v2532_v2, %v6213_v63  ;;  %v2534_v44 = vpop.f32.mrb[73].mxu0  ;;  %v2575_v49 = vpop.f32.mrb[73].mxu1  ;;  %v2574_v60 = vadd.f32 %v2573_v59, %v6216_v57 }
 0x88b   :  { %v2535_v14 = vadd.f32 %v2534_v44, %v6214_v62  ;;  %v2536_v33 = vpop.f32.mrb[74].mxu0  ;;  %v2577_v9 = vpop.f32.mrb[74].mxu1  ;;  %v2576_v27 = vadd.f32 %v2575_v49, %v6215_v58 }
 0x88c   :  { %v2983_v37 = vmul.f32 -1.442695, %v2533_v39  ;;  %v2537_v20 = vpop.f32.mrb[75].mxu0  ;;  %v2578_v61 = vpop.f32.mrb[75].mxu1 }
 0x88d   :  { %v2984_v50 = vmul.f32 -1.442695, %v2535_v14  ;;  %v2985_v45 = vmul.f32 -1.442695, %v2576_v27 }
 0x88e   :  { %3417 = vpow2.f32 %v2983_v37 }
 0x88f   :  { %3419 = vpow2.f32 %v2984_v50  ;;  %v2989_v50 = vld [vmem:[%s5484_s7] ss:$0 sm:$0xff] }
 0x890   :  { %3421 = vpow2.f32 %v2985_v45 }
 0x891   :  { %3423 = vtanh.f32 %v2574_v60 }
 0x898   :  { %v3418_v42 = vpop.eup %3417 }
 0x899   :  { %v3420_v6 = vpop.eup %3419  ;;  %v2583_v36 = vadd.f32 1.0, %v3418_v42 }
 0x89a   :  { %v2589_v1 = vadd.f32 1.0, %v3420_v6  ;;  %v3422_v48 = vpop.eup %3421 }
 0x89b   :  { %3425 = vrcp.f32 %v2583_v36  ;;  %v3424_v46 = vpop.eup %3423  ;;  %v2596_v52 = vadd.f32 1.0, %v3422_v48 }
 0x89c   :  { %3427 = vrcp.f32 %v2589_v1 }
 0x89d   :  { %3429 = vrcp.f32 %v2596_v52 }
 0x8a5   :  { %v3426_v13 = vpop.eup %3425 }
 0x8a6   :  { %v3428_v25 = vpop.eup %3427  ;;  %v2600_v32 = vmul.f32 %v3426_v13, %v3424_v46 }
 0x8a7   :  { %v2599_v16 = vmul.f32 %v3428_v25, %v6217_v11  ;;  %v3430_v0 = vpop.eup %3429 }
 0x8a9   :  { %v5439_v54 = vadd.f32 %v2600_v32, %v2599_v16 }
 0x8ab   :  { %3431 = vtanh.f32 %v5439_v54 }
 0x8b5   :  { %v3432_v4 = vpop.eup %3431 }
 0x8b6   :  { %v2603_v5 = vmul.f32 %v3432_v4, %v3430_v0 }
 0x8b8   :  { %v2605_v7 = vpack.c.bf16 %v2603_v5, %v2603_v5 }
 0x8ba   :  { %2638 = vmatprep.mubr.bf16.mxu0 %v2605_v7  ;;  %2679 = vmatprep.mubr.bf16.mxu1 %v2605_v7 }
 0x8bb   :  { %2639 = vmatmul.mubr.bf16.vlgmr.msra.gmra.mrb[76].mxu0 %v2604_v29  ;;  %2680 = vmatmul.mubr.bf16.vlgmr.msra.gmra.mrb[76].mxu1 %v2604_v29 }
 0x8bc   :  { %3008 = vmatpush3.bf16.msra.mxu0 %v3185_v51  ;;  %3023 = vmatprep.mubr.msk.bf16.mxu0 %vm3697_vm2, %v3696_v40 }
 0x8bd   :  { %3009 = vmatprep.subr.bf16.mxu0 %v3696_v40 }
 0x8c0   :  { %3010 = vmatpush3.bf16.msra.mxu0 %v3186_v28 }
 0x8c1   :  { %3011 = vmatprep.subr.bf16.mxu0 %v3696_v40 }
 0x8c4   :  { %3012 = vmatpush3.bf16.msra.mxu0 %v3187_v21 }
 0x8c5   :  { %3013 = vmatprep.subr.bf16.mxu0 %v3696_v40 }
 0x8c8   :  { %3014 = vmatpush3.bf16.msra.mxu0 %v3188_v34 }
 0x8c9   :  { %3015 = vmatprep.subr.bf16.mxu0 %v3696_v40 }
 0x8cc   :  { %3016 = vmatpush3.bf16.msra.mxu0 %v3189_v10 }
 0x8cd   :  { %3017 = vmatprep.subr.bf16.mxu0 %v3696_v40 }
 0x8d0   :  { %3018 = vmatpush3.bf16.msra.mxu0 %v3190_v43 }
 0x8d1   :  { %3019 = vmatprep.subr.bf16.mxu0 %v3696_v40 }
 0x8d4   :  { %3020 = vmatpush3.bf16.msra.mxu0 %v3191_v17 }
 0x8d5   :  { %3021 = vmatprep.subr.bf16.mxu0 %v3696_v40 }
 0x8d8   :  { %3022 = vmatpush3.bf16.msra.mxu0 %v3192_v15 }
 0x98e   :  { %v2640_v55 = vpop.f32.mrb[76].mxu0  ;;  %v2681_v3 = vpop.f32.mrb[76].mxu1 }
 0x98f   :  { %v2641_v30 = vadd.f32 %v2640_v55, %v6213_v63  ;;  %v2642_v31 = vpop.f32.mrb[77].mxu0  ;;  %v2683_v38 = vpop.f32.mrb[77].mxu1  ;;  %v2682_v35 = vadd.f32 %v2681_v3, %v6216_v57 }
 0x990   :  { %v2643_v24 = vadd.f32 %v2642_v31, %v6214_v62  ;;  %v2644_v47 = vpop.f32.mrb[78].mxu0  ;;  %v2685_v53 = vpop.f32.mrb[78].mxu1  ;;  %v2684_v56 = vadd.f32 %v2683_v38, %v6215_v58 }
 0x991   :  { %v2986_v18 = vmul.f32 -1.442695, %v2641_v30  ;;  %v2645_v12 = vpop.f32.mrb[79].mxu0  ;;  %v2686_v41 = vpop.f32.mrb[79].mxu1 }
 0x992   :  { %v2987_v8 = vmul.f32 -1.442695, %v2643_v24  ;;  %v2988_v22 = vmul.f32 -1.442695, %v2684_v56 }
 0x993   :  { %3433 = vpow2.f32 %v2986_v18 }
 0x994   :  { %3435 = vpow2.f32 %v2987_v8 }
 0x995   :  { %3437 = vpow2.f32 %v2988_v22 }
 0x996   :  { %3439 = vtanh.f32 %v2682_v35 }
 0x99d   :  { %v3434_v26 = vpop.eup %3433 }
 0x99e   :  { %v3436_v19 = vpop.eup %3435  ;;  %v2691_v23 = vadd.f32 1.0, %v3434_v26 }
 0x99f   :  { %v2697_v2 = vadd.f32 1.0, %v3436_v19  ;;  %v3438_v59 = vpop.eup %3437 }
 0x9a0   :  { %3441 = vrcp.f32 %v2691_v23  ;;  %v3440_v63 = vpop.eup %3439  ;;  %v2704_v62 = vadd.f32 1.0, %v3438_v59 }
 0x9a1   :  { %3443 = vrcp.f32 %v2697_v2 }
 0x9a2   :  { %3445 = vrcp.f32 %v2704_v62 }
 0x9aa   :  { %v3442_v39 = vpop.eup %3441 }
 0x9ab   :  { %v3444_v44 = vpop.eup %3443  ;;  %v2708_v49 = vmul.f32 %v3442_v39, %v3440_v63 }
 0x9ac   :  { %v2707_v14 = vmul.f32 %v3444_v44, %v5439_v54  ;;  %v3446_v9 = vpop.eup %3445 }
 0x9ae   :  { %v2709_v33 = vadd.f32 %v2708_v49, %v2707_v14 }
 0x9b0   :  { %3447 = vtanh.f32 %v2709_v33 }
 0x9ba   :  { %v3448_v37 = vpop.eup %3447 }
 0x9bb   :  { %v2711_v20 = vmul.f32 %v3448_v37, %v3446_v9 }
 0x9bd   :  { %v2712_v61 = vpack.c.bf16 %v2711_v20, %v2711_v20 }
 0x9bf   :  { %3024 = vmatmul.mubr.bf16.vlgmr.msra.gmra.mrb[80].mxu0 %v2712_v61 }
 0xa92   :  { %v2818_v58 = vpop.f32.mrb[80].mxu0 }
 0xa93   :  { %v2819_v27 = vadd.f32 %v2989_v50, %v2818_v58  ;;  %v3025_v45 = vpop.f32.mrb[81].mxu0 }
 0xa94   :  { %v2821_v57 = vpop.f32.mrb[82].mxu0 }
 0xa95   :  { %2824 = vst [vmem:[%s5485_s8] sm:$0xff] %v2819_v27  ;;  %v3026_v60 = vpop.f32.mrb[83].mxu0 }
 0xa96   :  { %2829 = vsyncpa [#allocation4], 1 }
 0xa97   :  { %2830 = vsyncpa [#allocation6], 1 }

</bundles_post_ra>
